<compile_context>
chip_gen: v5e
topology: v5e:2x2
jax: 0.10.0
libtpu: 0.0.40
codegen_flags: <defaults>
</compile_context>

<pallas_src>
import jax
import jax.numpy as jnp
from jax import lax
from jax.experimental import pallas as pl
from jax.experimental.pallas import tpu as pltpu

EPS = 1e-5
_GUARD = 16          # guard rows above/below the packed activation slab (one bf16 tile)


def _round_up(x, m):
    return ((x + m - 1) // m) * m


def _pick_nb(n, hp):
    """Largest divisor of the batch with Nb*hp <= 256 (keeps MXU M well fed)."""
    cap = max(1, 256 // hp)
    nb = 1
    for d in range(1, min(n, cap) + 1):
        if n % d == 0:
            nb = d
    return nb


# ----------------------------------------------------------------------------
# The single fused kernel: conv_1 + residual trunk + policy/value heads
# ----------------------------------------------------------------------------
def _fused_net_kernel(x_ref, c1w_ref, c1sb_ref, wb1_ref, wb2_ref, sb_ref,
                      hw_ref, hsb_ref, wp_ref, bp_ref, wv1_ref, bv1_ref,
                      wv2_ref, bv2_ref,
                      pol_ref, val_ref,
                      xin_ref, act_ref, mid_ref, feat_ref):
    k = pl.program_id(1)
    last = pl.num_programs(1) - 1

    Nb, HP, WCI = x_ref.shape            # images per tile, padded height, W*Cin
    WC = act_ref.shape[1]                # W * num_features
    G = _GUARD
    S = Nb * HP                          # packed slab height
    H = wp_ref.shape[0]                  # valid rows per image (board height)

    # validity mask: per-image rows 1..H are real, row 0 / rows H+1..HP-1 are halo/pad
    rid = lax.broadcasted_iota(jnp.int32, (S, 1), 0) % HP
    valid = (rid >= 1) & (rid <= H)

    def conv3(src_ref, w_ref):
        # out[r] = sum_ky slab[r - 1 + ky] @ w[ky]   (dx-banded 3x3 conv, 3 MXU matmuls)
        acc = jnp.dot(src_ref[G - 1:G - 1 + S, :], w_ref[0],
                      preferred_element_type=jnp.float32)
        acc = acc + jnp.dot(src_ref[G:G + S, :], w_ref[1],
                            preferred_element_type=jnp.float32)
        acc = acc + jnp.dot(src_ref[G + 1:G + 1 + S, :], w_ref[2],
                            preferred_element_type=jnp.float32)
        return acc

    @pl.when(k == 0)
    def _():
        # zero the guard rows once per batch tile, stage the input slab, run conv_1
        xin_ref[0:G, :] = jnp.zeros((G, WCI), xin_ref.dtype)
        xin_ref[G + S:G + S + G, :] = jnp.zeros((G, WCI), xin_ref.dtype)
        act_ref[0:G, :] = jnp.zeros((G, WC), act_ref.dtype)
        act_ref[G + S:G + S + G, :] = jnp.zeros((G, WC), act_ref.dtype)
        mid_ref[0:G, :] = jnp.zeros((G, WC), mid_ref.dtype)
        mid_ref[G + S:G + S + G, :] = jnp.zeros((G, WC), mid_ref.dtype)
        for n in range(Nb):                      # aligned (HP, WCI) copies
            xin_ref[G + n * HP:G + (n + 1) * HP, :] = x_ref[n]
        acc = conv3(xin_ref, c1w_ref)
        y = jnp.maximum(acc * c1sb_ref[0:1, :] + c1sb_ref[1:2, :], 0.0)
        act_ref[G:G + S, :] = jnp.where(valid, y, 0.0).astype(act_ref.dtype)

    @pl.when(k > 0)
    def _():
        # residual block k-1: relu(bn2(conv2(relu(bn1(conv1(x))))) + x)
        acc1 = conv3(act_ref, wb1_ref.at[0])
        h1 = jnp.maximum(acc1 * sb_ref[0, 0:1, :] + sb_ref[0, 1:2, :], 0.0)
        mid_ref[G:G + S, :] = jnp.where(valid, h1, 0.0).astype(mid_ref.dtype)
        acc2 = conv3(mid_ref, wb2_ref.at[0])
        y = (acc2 * sb_ref[0, 2:3, :] + sb_ref[0, 3:4, :]
             + act_ref[G:G + S, :].astype(jnp.float32))
        y = jnp.maximum(y, 0.0)
        act_ref[G:G + S, :] = jnp.where(valid, y, 0.0).astype(act_ref.dtype)

    @pl.when(k == last)
    def _():
        # fused heads: combined policy/value 1x1 conv (block-diagonal over w, f32),
        # then the three FCs.  feat lanes = (w, c_pad16) = W*16 (lane-dense).
        slab = act_ref[G:G + S, :].astype(jnp.float32)
        f = jnp.dot(slab, hw_ref[...], preferred_element_type=jnp.float32)
        feat_ref[...] = jnp.maximum(f * hsb_ref[0:1, :] + hsb_ref[1:2, :], 0.0)

        PP = pol_ref.shape[2]
        VH = wv1_ref.shape[2]
        pol = jnp.zeros((Nb, PP), jnp.float32)
        vin = jnp.zeros((Nb, VH), jnp.float32)
        for h in range(H):
            # row h of every image (stride = padded image height)
            rows = feat_ref[pl.ds(1 + h, Nb, stride=HP), :]
            pol = pol + jnp.dot(rows, wp_ref[h], preferred_element_type=jnp.float32)
            vin = vin + jnp.dot(rows, wv1_ref[h], preferred_element_type=jnp.float32)
        pol_ref[0] = pol + bp_ref[...]
        v = jnp.maximum(vin + bv1_ref[...], 0.0)
        val_ref[0] = jnp.tanh(
            jnp.dot(v, wv2_ref[...], preferred_element_type=jnp.float32) + bv2_ref[...])


def _fused_forward(xp, ip, *, Nb):
    """xp: (N, HP, W*Cin) bf16 with zero halo/pad rows.  Returns padded policy/value."""
    N, HP, WCI = xp.shape
    nblk, _, WC, _ = ip["wb1"].shape
    WCH = ip["hw"].shape[1]
    Hh, _, PP = ip["wp"].shape
    VP = ip["wv2"].shape[1]
    NT = N // Nb
    S = Nb * HP
    G = _GUARD

    def widx(b, k):
        return (jnp.maximum(k - 1, 0), 0, 0, 0)

    def sidx(b, k):
        return (jnp.maximum(k - 1, 0), 0, 0)

    return pl.pallas_call(
        _fused_net_kernel,
        out_shape=(jax.ShapeDtypeStruct((NT, Nb, PP), jnp.float32),
                   jax.ShapeDtypeStruct((NT, Nb, VP), jnp.float32)),
        grid=(NT, nblk + 1),
        in_specs=[
            pl.BlockSpec((Nb, HP, WCI), lambda b, k: (b, 0, 0)),     # input (per batch tile)
            pl.BlockSpec((3, WCI, WC), lambda b, k: (0, 0, 0)),      # conv_1 banded weight
            pl.BlockSpec((2, WC), lambda b, k: (0, 0)),              # conv_1 BN scale/bias
            pl.BlockSpec((1, 3, WC, WC), widx),                      # block conv1 weights
            pl.BlockSpec((1, 3, WC, WC), widx),                      # block conv2 weights
            pl.BlockSpec((1, 4, WC), sidx),                          # block BN scale/bias
            pl.BlockSpec((WC, WCH), lambda b, k: (0, 0)),            # head 1x1 conv (blockdiag)
            pl.BlockSpec((2, WCH), lambda b, k: (0, 0)),             # head BN scale/bias
            pl.BlockSpec((Hh, WCH, PP), lambda b, k: (0, 0, 0)),     # policy FC (per row h)
            pl.BlockSpec((1, PP), lambda b, k: (0, 0)),              # policy FC bias
            pl.BlockSpec((Hh, WCH, 64), lambda b, k: (0, 0, 0)),     # value FC1 (per row h)
            pl.BlockSpec((1, 64), lambda b, k: (0, 0)),              # value FC1 bias
            pl.BlockSpec((64, VP), lambda b, k: (0, 0)),             # value FC2
            pl.BlockSpec((1, VP), lambda b, k: (0, 0)),              # value FC2 bias
        ],
        out_specs=(pl.BlockSpec((1, Nb, PP), lambda b, k: (b, 0, 0)),
                   pl.BlockSpec((1, Nb, VP), lambda b, k: (b, 0, 0))),
        scratch_shapes=[
            pltpu.VMEM((G + S + G, WCI), jnp.bfloat16),   # staged input slab (+guards)
            pltpu.VMEM((G + S + G, WC), jnp.bfloat16),    # carried activation slab
            pltpu.VMEM((G + S + G, WC), jnp.bfloat16),    # residual-block intermediate
            pltpu.VMEM((S, WCH), jnp.float32),            # head-conv features
        ],
        compiler_params=pltpu.CompilerParams(
            dimension_semantics=("parallel", "arbitrary")),
    )(xp, ip["c1w"], ip["c1sb"], ip["wb1"], ip["wb2"], ip["sb"],
      ip["hw"], ip["hsb"], ip["wp"], ip["bp"], ip["wv1"], ip["bv1"],
      ip["wv2"], ip["bv2"])


# ----------------------------------------------------------------------------
# Forward pass (matches ConvNetwork.forward; DataParallel is a no-op wrapper)
# ----------------------------------------------------------------------------
@jax.jit
def alphazero_forward(state_nchw, ip):
    N, Cin, H, W = state_nchw.shape
    HP = _round_up(H + 2, 16)
    P = H * W + 1
    # NCHW -> (N, H, W*Cin) bf16 lane-dense layout, zero halo/pad rows (rows 0, H+1..HP-1)
    x = jnp.transpose(state_nchw, (0, 2, 3, 1)).astype(jnp.bfloat16).reshape(N, H, W * Cin)
    xp = jnp.pad(x, ((0, 0), (1, HP - 1 - H), (0, 0)))
    Nb = _pick_nb(N, HP)
    pol3, val3 = _fused_forward(xp, ip, Nb=Nb)
    policy = pol3.reshape(N, -1)[:, :P]
    value = val3.reshape(N, -1)[:, :1]
    return policy, value


# ----------------------------------------------------------------------------
# Parameter preparation (one-time layout plumbing, outside the jitted forward)
# ----------------------------------------------------------------------------
def bn_fold(gamma, beta, mean, var, conv_bias=None):
    scale = gamma / jnp.sqrt(var + EPS)
    shift = beta - mean * scale
    if conv_bias is not None:
        shift = shift + conv_bias * scale
    return scale, shift


def _band_conv3x3(w_oihw, W, dtype=jnp.bfloat16):
    """(Cout, Cin, 3, 3) -> dx-banded (3, W*Cin, W*Cout) for the (rows, W*C) layout."""
    cout, cin = w_oihw.shape[0], w_oihw.shape[1]
    wt = jnp.transpose(w_oihw, (2, 3, 1, 0))  # (ky, kx, Cin, Cout)
    B = jnp.zeros((3, W * cin, W * cout), jnp.float32)
    for ky in range(3):
        for kx in range(3):
            for wo in range(W):
                wi = wo + kx - 1
                if 0 <= wi < W:
                    B = B.at[ky, wi * cin:(wi + 1) * cin,
                             wo * cout:(wo + 1) * cout].set(wt[ky, kx])
    return B.astype(dtype)


def _tile_sb(v, W):
    """Per-channel scale/bias -> (W*C,) vector matching the (w, c) lane order."""
    return jnp.tile(v.astype(jnp.float32), W)


def prepare_inference_params(p, board_size):
    H = W = board_size
    F = p["conv1_w"].shape[0]
    WC = W * F
    assert len(p["blocks"]) >= 1
    ip = {}

    # conv_1
    s, b = bn_fold(**p["bn1"])
    ip["c1w"] = _band_conv3x3(p["conv1_w"], W)
    ip["c1sb"] = jnp.stack([_tile_sb(s, W), _tile_sb(b, W)], axis=0)          # (2, WC)

    # residual blocks, stacked along a leading block axis
    wb1_l, wb2_l, sb_l = [], [], []
    for blk in p["blocks"]:
        s1, b1 = bn_fold(**blk["bn1"])
        s2, b2 = bn_fold(**blk["bn2"])
        wb1_l.append(_band_conv3x3(blk["w1"], W))
        wb2_l.append(_band_conv3x3(blk["w2"], W))
        sb_l.append(jnp.stack([_tile_sb(s1, W), _tile_sb(b1, W),
                               _tile_sb(s2, W), _tile_sb(b2, W)], axis=0))
    ip["wb1"] = jnp.stack(wb1_l, axis=0)                                      # (nblk,3,WC,WC)
    ip["wb2"] = jnp.stack(wb2_l, axis=0)
    ip["sb"] = jnp.stack(sb_l, axis=0)                                        # (nblk,4,WC)

    # combined policy(4)+value(2) 1x1 conv, block-diagonal over w, Cout padded 6 -> 16
    CH = 16
    WCH = W * CH
    sp, bp_ = bn_fold(**p["pol_bn"], conv_bias=p["pol_b"])
    sv, bv_ = bn_fold(**p["val_bn"], conv_bias=p["val_b"])
    pw = p["pol_w"].reshape(4, F)
    vw = p["val_w"].reshape(2, F)
    blockw = (jnp.zeros((F, CH), jnp.float32)
              .at[:, 0:4].set(pw.T).at[:, 4:6].set(vw.T))
    hw = jnp.zeros((WC, WCH), jnp.float32)
    for w in range(W):
        hw = hw.at[w * F:(w + 1) * F, w * CH:(w + 1) * CH].set(blockw)
    ip["hw"] = hw
    svec = jnp.zeros((CH,), jnp.float32).at[0:4].set(sp).at[4:6].set(sv)
    bvec = jnp.zeros((CH,), jnp.float32).at[0:4].set(bp_).at[4:6].set(bv_)
    ip["hsb"] = jnp.stack([jnp.tile(svec, W), jnp.tile(bvec, W)], axis=0)     # (2, WCH)

    # FC weights: permute rows from PyTorch NCHW-flatten (c,h,w) to our per-row-h
    # (w, c_pad16) lane order; pad output widths to full 128-lane tiles.
    P = board_size ** 2 + 1
    PP = _round_up(P, 128)
    wp_t = p["pol_fc_w"].reshape(P, 4, H, W).transpose(2, 3, 1, 0)            # (H,W,4,P)
    wp = jnp.zeros((H, W, CH, PP), jnp.float32).at[:, :, 0:4, 0:P].set(wp_t)
    ip["wp"] = wp.reshape(H, WCH, PP)
    ip["bp"] = jnp.zeros((1, PP), jnp.float32).at[0, 0:P].set(p["pol_fc_b"])
    wv1_t = p["val_fc1_w"].reshape(64, 2, H, W).transpose(2, 3, 1, 0)         # (H,W,2,64)
    wv1 = jnp.zeros((H, W, CH, 64), jnp.float32).at[:, :, 4:6, :].set(wv1_t)
    ip["wv1"] = wv1.reshape(H, WCH, 64)
    ip["bv1"] = p["val_fc1_b"].reshape(1, 64).astype(jnp.float32)
    VP = 128
    ip["wv2"] = jnp.zeros((64, VP), jnp.float32).at[:, 0].set(p["val_fc2_w"][0])
    ip["bv2"] = jnp.zeros((1, VP), jnp.float32).at[0, 0].set(p["val_fc2_b"][0])
    return ip


# ----------------------------------------------------------------------------
# Parameter init (deterministic, synthetic, PyTorch-layout)
# ----------------------------------------------------------------------------
def init_params(key, board_size, input_dim, num_features, num_blocks):
    keys = iter(jax.random.split(key, 256))

    def nrm(shape, std=0.1):
        return std * jax.random.normal(next(keys), shape, jnp.float32)

    def bn(c):
        return dict(
            gamma=1.0 + nrm((c,)),
            beta=nrm((c,)),
            mean=nrm((c,)),
            var=1.0 + 0.5 * jax.random.uniform(next(keys), (c,), jnp.float32),
        )

    p = {}
    p["conv1_w"] = nrm((num_features, input_dim, 3, 3))
    p["bn1"] = bn(num_features)
    p["blocks"] = []
    for _ in range(num_blocks):
        p["blocks"].append(dict(
            w1=nrm((num_features, num_features, 3, 3)), bn1=bn(num_features),
            w2=nrm((num_features, num_features, 3, 3)), bn2=bn(num_features),
        ))
    p["pol_w"] = nrm((4, num_features, 1, 1)); p["pol_b"] = nrm((4,))
    p["pol_bn"] = bn(4)
    p["pol_fc_w"] = nrm((board_size ** 2 + 1, board_size ** 2 * 4))
    p["pol_fc_b"] = nrm((board_size ** 2 + 1,))
    p["val_w"] = nrm((2, num_features, 1, 1)); p["val_b"] = nrm((2,))
    p["val_bn"] = bn(2)
    p["val_fc1_w"] = nrm((64, board_size ** 2 * 2)); p["val_fc1_b"] = nrm((64,))
    p["val_fc2_w"] = nrm((1, 64)); p["val_fc2_b"] = nrm((1,))
    return p


# ----------------------------------------------------------------------------
# Pure-JAX f32 reference (for correctness check only)
# ----------------------------------------------------------------------------
def reference_forward(state_nchw, p, board_size):
    def bn_apply(y, bn):
        g = bn["gamma"][None, :, None, None]
        be = bn["beta"][None, :, None, None]
        m = bn["mean"][None, :, None, None]
        v = bn["var"][None, :, None, None]
        return (y - m) / jnp.sqrt(v + EPS) * g + be

    def conv(x, w, b=None):
        y = lax.conv_general_dilated(x, w, (1, 1), "SAME",
                                     dimension_numbers=("NCHW", "OIHW", "NCHW"))
        if b is not None:
            y = y + b[None, :, None, None]
        return y

    relu = lambda z: jnp.maximum(z, 0.0)
    x = relu(bn_apply(conv(state_nchw, p["conv1_w"]), p["bn1"]))
    for blk in p["blocks"]:
        h = relu(bn_apply(conv(x, blk["w1"]), blk["bn1"]))
        x = relu(bn_apply(conv(h, blk["w2"]), blk["bn2"]) + x)
    N = x.shape[0]
    pol = relu(bn_apply(conv(x, p["pol_w"], p["pol_b"]), p["pol_bn"])).reshape(N, -1)
    policy = pol @ p["pol_fc_w"].T + p["pol_fc_b"]
    val = relu(bn_apply(conv(x, p["val_w"], p["val_b"]), p["val_bn"])).reshape(N, -1)
    v = relu(val @ p["val_fc1_w"].T + p["val_fc1_b"])
    value = jnp.tanh(v @ p["val_fc2_w"].T + p["val_fc2_b"])
    return policy, value


if __name__ == "__main__":
    board_size, input_dim, num_features, num_blocks, batch = 8, 4, 32, 2, 2

    key = jax.random.PRNGKey(0)
    kp, kx = jax.random.split(key)
    params = init_params(kp, board_size, input_dim, num_features, num_blocks)
    state = jax.random.normal(kx, (batch, input_dim, board_size, board_size), jnp.float32)

    infer_params = prepare_inference_params(params, board_size)

    policy, value = alphazero_forward(state, infer_params)
    jax.block_until_ready((policy, value))

    assert policy.shape == (batch, board_size ** 2 + 1)
    assert value.shape == (batch, 1)

    # bf16 trunk vs f32 reference -> loosened tolerance.
    ref_p, ref_v = reference_forward(state, params, board_size)
    perr = float(jnp.max(jnp.abs(policy - ref_p)))
    verr = float(jnp.max(jnp.abs(value - ref_v)))
    assert jnp.allclose(policy, ref_p, atol=5e-2, rtol=5e-2), f"policy max err {perr}"
    assert jnp.allclose(value, ref_v, atol=5e-2, rtol=5e-2), f"value max err {verr}"

    print("KERNEL_OK")
</pallas_src>

<mosaic_0001>
module attributes {stable_mosaic.version = 11 : i64} {
  func.func @_fused_net_kernel(%arg0: i32, %arg1: i32, %arg2: memref<2x16x32xbf16, #tpu.memory_space<vmem>>, %arg3: memref<3x32x256xbf16, #tpu.memory_space<vmem>>, %arg4: memref<2x256xf32, #tpu.memory_space<vmem>>, %arg5: memref<1x3x256x256xbf16, #tpu.memory_space<vmem>>, %arg6: memref<1x3x256x256xbf16, #tpu.memory_space<vmem>>, %arg7: memref<1x4x256xf32, #tpu.memory_space<vmem>>, %arg8: memref<256x128xf32, #tpu.memory_space<vmem>>, %arg9: memref<2x128xf32, #tpu.memory_space<vmem>>, %arg10: memref<8x128x128xf32, #tpu.memory_space<vmem>>, %arg11: memref<1x128xf32, #tpu.memory_space<vmem>>, %arg12: memref<8x128x64xf32, #tpu.memory_space<vmem>>, %arg13: memref<1x64xf32, #tpu.memory_space<vmem>>, %arg14: memref<64x128xf32, #tpu.memory_space<vmem>>, %arg15: memref<1x128xf32, #tpu.memory_space<vmem>>, %arg16: memref<1x2x128xf32, #tpu.memory_space<vmem>>, %arg17: memref<1x2x128xf32, #tpu.memory_space<vmem>>, %arg18: memref<64x32xbf16, #tpu.memory_space<vmem>>, %arg19: memref<64x256xbf16, #tpu.memory_space<vmem>>, %arg20: memref<64x256xbf16, #tpu.memory_space<vmem>>, %arg21: memref<32x128xf32, #tpu.memory_space<vmem>>) attributes {dimension_semantics = [#tpu.dimension_semantics<parallel>, #tpu.dimension_semantics<arbitrary>], iteration_bounds = array<i64: 1, 3>, scalar_prefetch = 0 : i64, scratch_operands = 4 : i64, tpu.core_type = #tpu.core_type<tc>, window_params = [{transform_indices = @transform_0, window_bounds = array<i64: 2, 16, 32>}, {pipeline_mode = #tpu.pipeline_mode<synchronous>, transform_indices = @transform_1, window_bounds = array<i64: 3, 32, 256>}, {pipeline_mode = #tpu.pipeline_mode<synchronous>, transform_indices = @transform_2, window_bounds = array<i64: 2, 256>}, {transform_indices = @transform_3, window_bounds = array<i64: 1, 3, 256, 256>}, {transform_indices = @transform_4, window_bounds = array<i64: 1, 3, 256, 256>}, {transform_indices = @transform_5, window_bounds = array<i64: 1, 4, 256>}, {pipeline_mode = #tpu.pipeline_mode<synchronous>, transform_indices = @transform_6, window_bounds = array<i64: 256, 128>}, {pipeline_mode = #tpu.pipeline_mode<synchronous>, transform_indices = @transform_7, window_bounds = array<i64: 2, 128>}, {pipeline_mode = #tpu.pipeline_mode<synchronous>, transform_indices = @transform_8, window_bounds = array<i64: 8, 128, 128>}, {pipeline_mode = #tpu.pipeline_mode<synchronous>, transform_indices = @transform_9, window_bounds = array<i64: 1, 128>}, {pipeline_mode = #tpu.pipeline_mode<synchronous>, transform_indices = @transform_10, window_bounds = array<i64: 8, 128, 64>}, {pipeline_mode = #tpu.pipeline_mode<synchronous>, transform_indices = @transform_11, window_bounds = array<i64: 1, 64>}, {pipeline_mode = #tpu.pipeline_mode<synchronous>, transform_indices = @transform_12, window_bounds = array<i64: 64, 128>}, {pipeline_mode = #tpu.pipeline_mode<synchronous>, transform_indices = @transform_13, window_bounds = array<i64: 1, 128>}, {transform_indices = @transform_14, window_bounds = array<i64: 1, 2, 128>}, {transform_indices = @transform_15, window_bounds = array<i64: 1, 2, 128>}]} {
    %0 = tpu.iota {dimensions = array<i32: 0>} : vector<32x1xi32>
    %c16_i32 = arith.constant 16 : i32
    %c0_i32 = arith.constant 0 : i32
    %1 = arith.cmpi eq, %c16_i32, %c0_i32 : i32
    %c1_i32 = arith.constant 1 : i32
    %2 = arith.select %1, %c1_i32, %c16_i32 : i32
    %3 = vector.broadcast %2 : i32 to vector<32x1xi32>
    %4 = arith.remsi %0, %3 : vector<32x1xi32>
    %c0_i32_0 = arith.constant 0 : i32
    %5 = vector.broadcast %c0_i32_0 : i32 to vector<32x1xi32>
    %6 = arith.cmpi ne, %4, %5 : vector<32x1xi32>
    %c0_i32_1 = arith.constant 0 : i32
    %7 = vector.broadcast %c0_i32_1 : i32 to vector<32x1xi32>
    %8 = arith.cmpi slt, %4, %7 : vector<32x1xi32>
    %c0_i32_2 = arith.constant 0 : i32
    %9 = arith.cmpi slt, %2, %c0_i32_2 : i32
    %10 = vector.broadcast %9 : i1 to vector<32x1xi1>
    %11 = vector.broadcast %10 : vector<32x1xi1> to vector<32x1xi1>
    %12 = arith.xori %8, %11 : vector<32x1xi1>
    %13 = arith.andi %12, %6 : vector<32x1xi1>
    %14 = vector.broadcast %2 : i32 to vector<32x1xi32>
    %15 = arith.addi %4, %14 : vector<32x1xi32>
    %16 = arith.select %13, %15, %4 : vector<32x1xi1>, vector<32x1xi32>
    %c1_i32_3 = arith.constant 1 : i32
    %17 = vector.broadcast %c1_i32_3 : i32 to vector<32x1xi32>
    %18 = arith.cmpi sge, %16, %17 : vector<32x1xi32>
    %c8_i32 = arith.constant 8 : i32
    %19 = vector.broadcast %c8_i32 : i32 to vector<32x1xi32>
    %20 = arith.cmpi sle, %16, %19 : vector<32x1xi32>
    %21 = arith.andi %18, %20 : vector<32x1xi1>
    %c0_i32_4 = arith.constant 0 : i32
    %22 = arith.cmpi eq, %arg1, %c0_i32_4 : i32
    %23 = arith.extui %22 : i1 to i32
    %c0_i32_5 = arith.constant 0 : i32
    %24 = arith.cmpi ne, %23, %c0_i32_5 : i32
    scf.if %24 {
      %cst = arith.constant 0.000000e+00 : bf16
      %31 = vector.broadcast %cst : bf16 to vector<16x32xbf16>
      %c0 = arith.constant 0 : index
      %c0_9 = arith.constant 0 : index
      %32 = vector.load %arg18[%c0, %c0_9] : memref<64x32xbf16, #tpu.memory_space<vmem>>, vector<16x32xbf16>
      tpu.vector_store %arg18[%c0, %c0_9], %31 {strides = array<i32>} : memref<64x32xbf16, #tpu.memory_space<vmem>>, vector<16x32xbf16>,
      %cst_10 = arith.constant 0.000000e+00 : bf16
      %33 = vector.broadcast %cst_10 : bf16 to vector<16x32xbf16>
      %c48 = arith.constant 48 : index
      %c0_11 = arith.constant 0 : index
      %34 = vector.load %arg18[%c48, %c0_11] : memref<64x32xbf16, #tpu.memory_space<vmem>>, vector<16x32xbf16>
      tpu.vector_store %arg18[%c48, %c0_11], %33 {strides = array<i32>} : memref<64x32xbf16, #tpu.memory_space<vmem>>, vector<16x32xbf16>,
      %cst_12 = arith.constant 0.000000e+00 : bf16
      %35 = vector.broadcast %cst_12 : bf16 to vector<16x256xbf16>
      %c0_13 = arith.constant 0 : index
      %c0_14 = arith.constant 0 : index
      %36 = vector.load %arg19[%c0_13, %c0_14] : memref<64x256xbf16, #tpu.memory_space<vmem>>, vector<16x256xbf16>
      tpu.vector_store %arg19[%c0_13, %c0_14], %35 {strides = array<i32>} : memref<64x256xbf16, #tpu.memory_space<vmem>>, vector<16x256xbf16>,
      %cst_15 = arith.constant 0.000000e+00 : bf16
      %37 = vector.broadcast %cst_15 : bf16 to vector<16x256xbf16>
      %c48_16 = arith.constant 48 : index
      %c0_17 = arith.constant 0 : index
      %38 = vector.load %arg19[%c48_16, %c0_17] : memref<64x256xbf16, #tpu.memory_space<vmem>>, vector<16x256xbf16>
      tpu.vector_store %arg19[%c48_16, %c0_17], %37 {strides = array<i32>} : memref<64x256xbf16, #tpu.memory_space<vmem>>, vector<16x256xbf16>,
      %cst_18 = arith.constant 0.000000e+00 : bf16
      %39 = vector.broadcast %cst_18 : bf16 to vector<16x256xbf16>
      %c0_19 = arith.constant 0 : index
      %c0_20 = arith.constant 0 : index
      %40 = vector.load %arg20[%c0_19, %c0_20] : memref<64x256xbf16, #tpu.memory_space<vmem>>, vector<16x256xbf16>
      tpu.vector_store %arg20[%c0_19, %c0_20], %39 {strides = array<i32>} : memref<64x256xbf16, #tpu.memory_space<vmem>>, vector<16x256xbf16>,
      %cst_21 = arith.constant 0.000000e+00 : bf16
      %41 = vector.broadcast %cst_21 : bf16 to vector<16x256xbf16>
      %c48_22 = arith.constant 48 : index
      %c0_23 = arith.constant 0 : index
      %42 = vector.load %arg20[%c48_22, %c0_23] : memref<64x256xbf16, #tpu.memory_space<vmem>>, vector<16x256xbf16>
      tpu.vector_store %arg20[%c48_22, %c0_23], %41 {strides = array<i32>} : memref<64x256xbf16, #tpu.memory_space<vmem>>, vector<16x256xbf16>,
      %c0_24 = arith.constant 0 : index
      %c0_25 = arith.constant 0 : index
      %c0_26 = arith.constant 0 : index
      %43 = vector.load %arg2[%c0_24, %c0_25, %c0_26] : memref<2x16x32xbf16, #tpu.memory_space<vmem>>, vector<1x16x32xbf16>
      %44 = vector.shape_cast %43 : vector<1x16x32xbf16> to vector<16x32xbf16>
      %c16 = arith.constant 16 : index
      %c0_27 = arith.constant 0 : index
      %45 = vector.load %arg18[%c16, %c0_27] : memref<64x32xbf16, #tpu.memory_space<vmem>>, vector<16x32xbf16>
      tpu.vector_store %arg18[%c16, %c0_27], %44 {strides = array<i32>} : memref<64x32xbf16, #tpu.memory_space<vmem>>, vector<16x32xbf16>,
      %c1 = arith.constant 1 : index
      %c0_28 = arith.constant 0 : index
      %c0_29 = arith.constant 0 : index
      %46 = vector.load %arg2[%c1, %c0_28, %c0_29] : memref<2x16x32xbf16, #tpu.memory_space<vmem>>, vector<1x16x32xbf16>
      %47 = vector.shape_cast %46 : vector<1x16x32xbf16> to vector<16x32xbf16>
      %c32 = arith.constant 32 : index
      %c0_30 = arith.constant 0 : index
      %48 = vector.load %arg18[%c32, %c0_30] : memref<64x32xbf16, #tpu.memory_space<vmem>>, vector<16x32xbf16>
      tpu.vector_store %arg18[%c32, %c0_30], %47 {strides = array<i32>} : memref<64x32xbf16, #tpu.memory_space<vmem>>, vector<16x32xbf16>,
      %c15 = arith.constant 15 : index
      %c0_31 = arith.constant 0 : index
      %49 = vector.load %arg18[%c15, %c0_31] : memref<64x32xbf16, #tpu.memory_space<vmem>>, vector<32x32xbf16>
      %c0_32 = arith.constant 0 : index
      %c0_33 = arith.constant 0 : index
      %c0_34 = arith.constant 0 : index
      %50 = vector.load %arg3[%c0_32, %c0_33, %c0_34] : memref<3x32x256xbf16, #tpu.memory_space<vmem>>, vector<1x32x256xbf16>
      %51 = vector.shape_cast %50 : vector<1x32x256xbf16> to vector<32x256xbf16>
      %cst_35 = arith.constant dense<0.000000e+00> : vector<32x256xf32>
      %52 = tpu.matmul %49, %51, %cst_35 {dimension_numbers = #tpu.dot_dimension_numbers<[1], [0], [0], [1], [0, 0, 1, 1], [], []>} : vector<32x32xbf16>, vector<32x256xbf16>, vector<32x256xf32> -> vector<32x256xf32>
      %c16_36 = arith.constant 16 : index
      %c0_37 = arith.constant 0 : index
      %53 = vector.load %arg18[%c16_36, %c0_37] : memref<64x32xbf16, #tpu.memory_space<vmem>>, vector<32x32xbf16>
      %c1_38 = arith.constant 1 : index
      %c0_39 = arith.constant 0 : index
      %c0_40 = arith.constant 0 : index
      %54 = vector.load %arg3[%c1_38, %c0_39, %c0_40] : memref<3x32x256xbf16, #tpu.memory_space<vmem>>, vector<1x32x256xbf16>
      %55 = vector.shape_cast %54 : vector<1x32x256xbf16> to vector<32x256xbf16>
      %cst_41 = arith.constant dense<0.000000e+00> : vector<32x256xf32>
      %56 = tpu.matmul %53, %55, %cst_41 {dimension_numbers = #tpu.dot_dimension_numbers<[1], [0], [0], [1], [0, 0, 1, 1], [], []>} : vector<32x32xbf16>, vector<32x256xbf16>, vector<32x256xf32> -> vector<32x256xf32>
      %57 = arith.addf %52, %56 : vector<32x256xf32>
      %c17 = arith.constant 17 : index
      %c0_42 = arith.constant 0 : index
      %58 = vector.load %arg18[%c17, %c0_42] : memref<64x32xbf16, #tpu.memory_space<vmem>>, vector<32x32xbf16>
      %c2 = arith.constant 2 : index
      %c0_43 = arith.constant 0 : index
      %c0_44 = arith.constant 0 : index
      %59 = vector.load %arg3[%c2, %c0_43, %c0_44] : memref<3x32x256xbf16, #tpu.memory_space<vmem>>, vector<1x32x256xbf16>
      %60 = vector.shape_cast %59 : vector<1x32x256xbf16> to vector<32x256xbf16>
      %cst_45 = arith.constant dense<0.000000e+00> : vector<32x256xf32>
      %61 = tpu.matmul %58, %60, %cst_45 {dimension_numbers = #tpu.dot_dimension_numbers<[1], [0], [0], [1], [0, 0, 1, 1], [], []>} : vector<32x32xbf16>, vector<32x256xbf16>, vector<32x256xf32> -> vector<32x256xf32>
      %62 = arith.addf %57, %61 : vector<32x256xf32>
      %c0_46 = arith.constant 0 : index
      %c0_47 = arith.constant 0 : index
      %63 = vector.load %arg4[%c0_46, %c0_47] : memref<2x256xf32, #tpu.memory_space<vmem>>, vector<1x256xf32>
      %64 = vector.broadcast %63 : vector<1x256xf32> to vector<32x256xf32>
      %65 = arith.mulf %62, %64 : vector<32x256xf32>
      %c1_48 = arith.constant 1 : index
      %c0_49 = arith.constant 0 : index
      %66 = vector.load %arg4[%c1_48, %c0_49] : memref<2x256xf32, #tpu.memory_space<vmem>>, vector<1x256xf32>
      %67 = vector.broadcast %66 : vector<1x256xf32> to vector<32x256xf32>
      %68 = arith.addf %65, %67 : vector<32x256xf32>
      %cst_50 = arith.constant 0.000000e+00 : f32
      %69 = vector.broadcast %cst_50 : f32 to vector<32x256xf32>
      %70 = arith.maximumf %68, %69 : vector<32x256xf32>
      %cst_51 = arith.constant 0.000000e+00 : f32
      %71 = vector.shape_cast %21 : vector<32x1xi1> to vector<32x1xi1>
      %72 = vector.broadcast %71 : vector<32x1xi1> to vector<32x256xi1>
      %73 = vector.broadcast %cst_51 : f32 to vector<32x256xf32>
      %74 = arith.select %72, %70, %73 : vector<32x256xi1>, vector<32x256xf32>
      %75 = arith.truncf %74 : vector<32x256xf32> to vector<32x256xbf16>
      %c16_52 = arith.constant 16 : index
      %c0_53 = arith.constant 0 : index
      %76 = vector.load %arg19[%c16_52, %c0_53] : memref<64x256xbf16, #tpu.memory_space<vmem>>, vector<32x256xbf16>
      tpu.vector_store %arg19[%c16_52, %c0_53], %75 {strides = array<i32>} : memref<64x256xbf16, #tpu.memory_space<vmem>>, vector<32x256xbf16>,
    } else {
    }
    %c0_i32_6 = arith.constant 0 : i32
    %25 = arith.cmpi sgt, %arg1, %c0_i32_6 : i32
    %26 = arith.extui %25 : i1 to i32
    %c0_i32_7 = arith.constant 0 : i32
    %27 = arith.cmpi ne, %26, %c0_i32_7 : i32
    scf.if %27 {
      %c15 = arith.constant 15 : index
      %c0 = arith.constant 0 : index
      %31 = vector.load %arg19[%c15, %c0] : memref<64x256xbf16, #tpu.memory_space<vmem>>, vector<32x256xbf16>
      %c0_i32_9 = arith.constant 0 : i32
      %c0_i32_10 = arith.constant 0 : i32
      %c0_i32_11 = arith.constant 0 : i32
      %c0_i32_12 = arith.constant 0 : i32
      %32 = tpu.memref_slice %arg5[%c0_i32_9, %c0_i32_10, %c0_i32_11, %c0_i32_12] : memref<1x3x256x256xbf16, #tpu.memory_space<vmem>> -> memref<1x3x256x256xbf16, #tpu.memory_space<vmem>>
      %33 = tpu.memref_squeeze %32 : memref<1x3x256x256xbf16, #tpu.memory_space<vmem>> -> memref<3x256x256xbf16, #tpu.memory_space<vmem>>
      %c0_13 = arith.constant 0 : index
      %c0_14 = arith.constant 0 : index
      %c0_15 = arith.constant 0 : index
      %34 = vector.load %33[%c0_13, %c0_14, %c0_15] : memref<3x256x256xbf16, #tpu.memory_space<vmem>>, vector<1x256x256xbf16>
      %35 = vector.shape_cast %34 : vector<1x256x256xbf16> to vector<256x256xbf16>
      %cst = arith.constant dense<0.000000e+00> : vector<32x256xf32>
      %36 = tpu.matmul %31, %35, %cst {dimension_numbers = #tpu.dot_dimension_numbers<[1], [0], [0], [1], [0, 0, 1, 1], [], []>} : vector<32x256xbf16>, vector<256x256xbf16>, vector<32x256xf32> -> vector<32x256xf32>
      %c16 = arith.constant 16 : index
      %c0_16 = arith.constant 0 : index
      %37 = vector.load %arg19[%c16, %c0_16] : memref<64x256xbf16, #tpu.memory_space<vmem>>, vector<32x256xbf16>
      %c0_i32_17 = arith.constant 0 : i32
      %c0_i32_18 = arith.constant 0 : i32
      %c0_i32_19 = arith.constant 0 : i32
      %c0_i32_20 = arith.constant 0 : i32
      %38 = tpu.memref_slice %arg5[%c0_i32_17, %c0_i32_18, %c0_i32_19, %c0_i32_20] : memref<1x3x256x256xbf16, #tpu.memory_space<vmem>> -> memref<1x3x256x256xbf16, #tpu.memory_space<vmem>>
      %39 = tpu.memref_squeeze %38 : memref<1x3x256x256xbf16, #tpu.memory_space<vmem>> -> memref<3x256x256xbf16, #tpu.memory_space<vmem>>
      %c1 = arith.constant 1 : index
      %c0_21 = arith.constant 0 : index
      %c0_22 = arith.constant 0 : index
      %40 = vector.load %39[%c1, %c0_21, %c0_22] : memref<3x256x256xbf16, #tpu.memory_space<vmem>>, vector<1x256x256xbf16>
      %41 = vector.shape_cast %40 : vector<1x256x256xbf16> to vector<256x256xbf16>
      %cst_23 = arith.constant dense<0.000000e+00> : vector<32x256xf32>
      %42 = tpu.matmul %37, %41, %cst_23 {dimension_numbers = #tpu.dot_dimension_numbers<[1], [0], [0], [1], [0, 0, 1, 1], [], []>} : vector<32x256xbf16>, vector<256x256xbf16>, vector<32x256xf32> -> vector<32x256xf32>
      %43 = arith.addf %36, %42 : vector<32x256xf32>
      %c17 = arith.constant 17 : index
      %c0_24 = arith.constant 0 : index
      %44 = vector.load %arg19[%c17, %c0_24] : memref<64x256xbf16, #tpu.memory_space<vmem>>, vector<32x256xbf16>
      %c0_i32_25 = arith.constant 0 : i32
      %c0_i32_26 = arith.constant 0 : i32
      %c0_i32_27 = arith.constant 0 : i32
      %c0_i32_28 = arith.constant 0 : i32
      %45 = tpu.memref_slice %arg5[%c0_i32_25, %c0_i32_26, %c0_i32_27, %c0_i32_28] : memref<1x3x256x256xbf16, #tpu.memory_space<vmem>> -> memref<1x3x256x256xbf16, #tpu.memory_space<vmem>>
      %46 = tpu.memref_squeeze %45 : memref<1x3x256x256xbf16, #tpu.memory_space<vmem>> -> memref<3x256x256xbf16, #tpu.memory_space<vmem>>
      %c2 = arith.constant 2 : index
      %c0_29 = arith.constant 0 : index
      %c0_30 = arith.constant 0 : index
      %47 = vector.load %46[%c2, %c0_29, %c0_30] : memref<3x256x256xbf16, #tpu.memory_space<vmem>>, vector<1x256x256xbf16>
      %48 = vector.shape_cast %47 : vector<1x256x256xbf16> to vector<256x256xbf16>
      %cst_31 = arith.constant dense<0.000000e+00> : vector<32x256xf32>
      %49 = tpu.matmul %44, %48, %cst_31 {dimension_numbers = #tpu.dot_dimension_numbers<[1], [0], [0], [1], [0, 0, 1, 1], [], []>} : vector<32x256xbf16>, vector<256x256xbf16>, vector<32x256xf32> -> vector<32x256xf32>
      %50 = arith.addf %43, %49 : vector<32x256xf32>
      %c0_32 = arith.constant 0 : index
      %c0_33 = arith.constant 0 : index
      %c0_34 = arith.constant 0 : index
      %51 = vector.load %arg7[%c0_32, %c0_33, %c0_34] : memref<1x4x256xf32, #tpu.memory_space<vmem>>, vector<1x1x256xf32>
      %52 = vector.shape_cast %51 : vector<1x1x256xf32> to vector<1x256xf32>
      %53 = vector.broadcast %52 : vector<1x256xf32> to vector<32x256xf32>
      %54 = arith.mulf %50, %53 : vector<32x256xf32>
      %c0_35 = arith.constant 0 : index
      %c1_36 = arith.constant 1 : index
      %c0_37 = arith.constant 0 : index
      %55 = vector.load %arg7[%c0_35, %c1_36, %c0_37] : memref<1x4x256xf32, #tpu.memory_space<vmem>>, vector<1x1x256xf32>
      %56 = vector.shape_cast %55 : vector<1x1x256xf32> to vector<1x256xf32>
      %57 = vector.broadcast %56 : vector<1x256xf32> to vector<32x256xf32>
      %58 = arith.addf %54, %57 : vector<32x256xf32>
      %cst_38 = arith.constant 0.000000e+00 : f32
      %59 = vector.broadcast %cst_38 : f32 to vector<32x256xf32>
      %60 = arith.maximumf %58, %59 : vector<32x256xf32>
      %cst_39 = arith.constant 0.000000e+00 : f32
      %61 = vector.shape_cast %21 : vector<32x1xi1> to vector<32x1xi1>
      %62 = vector.broadcast %61 : vector<32x1xi1> to vector<32x256xi1>
      %63 = vector.broadcast %cst_39 : f32 to vector<32x256xf32>
      %64 = arith.select %62, %60, %63 : vector<32x256xi1>, vector<32x256xf32>
      %65 = arith.truncf %64 : vector<32x256xf32> to vector<32x256xbf16>
      %c16_40 = arith.constant 16 : index
      %c0_41 = arith.constant 0 : index
      %66 = vector.load %arg20[%c16_40, %c0_41] : memref<64x256xbf16, #tpu.memory_space<vmem>>, vector<32x256xbf16>
      tpu.vector_store %arg20[%c16_40, %c0_41], %65 {strides = array<i32>} : memref<64x256xbf16, #tpu.memory_space<vmem>>, vector<32x256xbf16>,
      %c15_42 = arith.constant 15 : index
      %c0_43 = arith.constant 0 : index
      %67 = vector.load %arg20[%c15_42, %c0_43] : memref<64x256xbf16, #tpu.memory_space<vmem>>, vector<32x256xbf16>
      %c0_i32_44 = arith.constant 0 : i32
      %c0_i32_45 = arith.constant 0 : i32
      %c0_i32_46 = arith.constant 0 : i32
      %c0_i32_47 = arith.constant 0 : i32
      %68 = tpu.memref_slice %arg6[%c0_i32_44, %c0_i32_45, %c0_i32_46, %c0_i32_47] : memref<1x3x256x256xbf16, #tpu.memory_space<vmem>> -> memref<1x3x256x256xbf16, #tpu.memory_space<vmem>>
      %69 = tpu.memref_squeeze %68 : memref<1x3x256x256xbf16, #tpu.memory_space<vmem>> -> memref<3x256x256xbf16, #tpu.memory_space<vmem>>
      %c0_48 = arith.constant 0 : index
      %c0_49 = arith.constant 0 : index
      %c0_50 = arith.constant 0 : index
      %70 = vector.load %69[%c0_48, %c0_49, %c0_50] : memref<3x256x256xbf16, #tpu.memory_space<vmem>>, vector<1x256x256xbf16>
      %71 = vector.shape_cast %70 : vector<1x256x256xbf16> to vector<256x256xbf16>
      %cst_51 = arith.constant dense<0.000000e+00> : vector<32x256xf32>
      %72 = tpu.matmul %67, %71, %cst_51 {dimension_numbers = #tpu.dot_dimension_numbers<[1], [0], [0], [1], [0, 0, 1, 1], [], []>} : vector<32x256xbf16>, vector<256x256xbf16>, vector<32x256xf32> -> vector<32x256xf32>
      %c16_52 = arith.constant 16 : index
      %c0_53 = arith.constant 0 : index
      %73 = vector.load %arg20[%c16_52, %c0_53] : memref<64x256xbf16, #tpu.memory_space<vmem>>, vector<32x256xbf16>
      %c0_i32_54 = arith.constant 0 : i32
      %c0_i32_55 = arith.constant 0 : i32
      %c0_i32_56 = arith.constant 0 : i32
      %c0_i32_57 = arith.constant 0 : i32
      %74 = tpu.memref_slice %arg6[%c0_i32_54, %c0_i32_55, %c0_i32_56, %c0_i32_57] : memref<1x3x256x256xbf16, #tpu.memory_space<vmem>> -> memref<1x3x256x256xbf16, #tpu.memory_space<vmem>>
      %75 = tpu.memref_squeeze %74 : memref<1x3x256x256xbf16, #tpu.memory_space<vmem>> -> memref<3x256x256xbf16, #tpu.memory_space<vmem>>
      %c1_58 = arith.constant 1 : index
      %c0_59 = arith.constant 0 : index
      %c0_60 = arith.constant 0 : index
      %76 = vector.load %75[%c1_58, %c0_59, %c0_60] : memref<3x256x256xbf16, #tpu.memory_space<vmem>>, vector<1x256x256xbf16>
      %77 = vector.shape_cast %76 : vector<1x256x256xbf16> to vector<256x256xbf16>
      %cst_61 = arith.constant dense<0.000000e+00> : vector<32x256xf32>
      %78 = tpu.matmul %73, %77, %cst_61 {dimension_numbers = #tpu.dot_dimension_numbers<[1], [0], [0], [1], [0, 0, 1, 1], [], []>} : vector<32x256xbf16>, vector<256x256xbf16>, vector<32x256xf32> -> vector<32x256xf32>
      %79 = arith.addf %72, %78 : vector<32x256xf32>
      %c17_62 = arith.constant 17 : index
      %c0_63 = arith.constant 0 : index
      %80 = vector.load %arg20[%c17_62, %c0_63] : memref<64x256xbf16, #tpu.memory_space<vmem>>, vector<32x256xbf16>
      %c0_i32_64 = arith.constant 0 : i32
      %c0_i32_65 = arith.constant 0 : i32
      %c0_i32_66 = arith.constant 0 : i32
      %c0_i32_67 = arith.constant 0 : i32
      %81 = tpu.memref_slice %arg6[%c0_i32_64, %c0_i32_65, %c0_i32_66, %c0_i32_67] : memref<1x3x256x256xbf16, #tpu.memory_space<vmem>> -> memref<1x3x256x256xbf16, #tpu.memory_space<vmem>>
      %82 = tpu.memref_squeeze %81 : memref<1x3x256x256xbf16, #tpu.memory_space<vmem>> -> memref<3x256x256xbf16, #tpu.memory_space<vmem>>
      %c2_68 = arith.constant 2 : index
      %c0_69 = arith.constant 0 : index
      %c0_70 = arith.constant 0 : index
      %83 = vector.load %82[%c2_68, %c0_69, %c0_70] : memref<3x256x256xbf16, #tpu.memory_space<vmem>>, vector<1x256x256xbf16>
      %84 = vector.shape_cast %83 : vector<1x256x256xbf16> to vector<256x256xbf16>
      %cst_71 = arith.constant dense<0.000000e+00> : vector<32x256xf32>
      %85 = tpu.matmul %80, %84, %cst_71 {dimension_numbers = #tpu.dot_dimension_numbers<[1], [0], [0], [1], [0, 0, 1, 1], [], []>} : vector<32x256xbf16>, vector<256x256xbf16>, vector<32x256xf32> -> vector<32x256xf32>
      %86 = arith.addf %79, %85 : vector<32x256xf32>
      %c0_72 = arith.constant 0 : index
      %c2_73 = arith.constant 2 : index
      %c0_74 = arith.constant 0 : index
      %87 = vector.load %arg7[%c0_72, %c2_73, %c0_74] : memref<1x4x256xf32, #tpu.memory_space<vmem>>, vector<1x1x256xf32>
      %88 = vector.shape_cast %87 : vector<1x1x256xf32> to vector<1x256xf32>
      %89 = vector.broadcast %88 : vector<1x256xf32> to vector<32x256xf32>
      %90 = arith.mulf %86, %89 : vector<32x256xf32>
      %c0_75 = arith.constant 0 : index
      %c3 = arith.constant 3 : index
      %c0_76 = arith.constant 0 : index
      %91 = vector.load %arg7[%c0_75, %c3, %c0_76] : memref<1x4x256xf32, #tpu.memory_space<vmem>>, vector<1x1x256xf32>
      %92 = vector.shape_cast %91 : vector<1x1x256xf32> to vector<1x256xf32>
      %93 = vector.broadcast %92 : vector<1x256xf32> to vector<32x256xf32>
      %94 = arith.addf %90, %93 : vector<32x256xf32>
      %c16_77 = arith.constant 16 : index
      %c0_78 = arith.constant 0 : index
      %95 = vector.load %arg19[%c16_77, %c0_78] : memref<64x256xbf16, #tpu.memory_space<vmem>>, vector<32x256xbf16>
      %96 = arith.extf %95 : vector<32x256xbf16> to vector<32x256xf32>
      %97 = arith.addf %94, %96 : vector<32x256xf32>
      %cst_79 = arith.constant 0.000000e+00 : f32
      %98 = vector.broadcast %cst_79 : f32 to vector<32x256xf32>
      %99 = arith.maximumf %97, %98 : vector<32x256xf32>
      %cst_80 = arith.constant 0.000000e+00 : f32
      %100 = vector.shape_cast %21 : vector<32x1xi1> to vector<32x1xi1>
      %101 = vector.broadcast %100 : vector<32x1xi1> to vector<32x256xi1>
      %102 = vector.broadcast %cst_80 : f32 to vector<32x256xf32>
      %103 = arith.select %101, %99, %102 : vector<32x256xi1>, vector<32x256xf32>
      %104 = arith.truncf %103 : vector<32x256xf32> to vector<32x256xbf16>
      %c16_81 = arith.constant 16 : index
      %c0_82 = arith.constant 0 : index
      %105 = vector.load %arg19[%c16_81, %c0_82] : memref<64x256xbf16, #tpu.memory_space<vmem>>, vector<32x256xbf16>
      tpu.vector_store %arg19[%c16_81, %c0_82], %104 {strides = array<i32>} : memref<64x256xbf16, #tpu.memory_space<vmem>>, vector<32x256xbf16>,
    } else {
    }
    %c2_i32 = arith.constant 2 : i32
    %28 = arith.cmpi eq, %arg1, %c2_i32 : i32
    %29 = arith.extui %28 : i1 to i32
    %c0_i32_8 = arith.constant 0 : i32
    %30 = arith.cmpi ne, %29, %c0_i32_8 : i32
    scf.if %30 {
      %c16 = arith.constant 16 : index
      %c0 = arith.constant 0 : index
      %31 = vector.load %arg19[%c16, %c0] : memref<64x256xbf16, #tpu.memory_space<vmem>>, vector<32x256xbf16>
      %32 = arith.extf %31 : vector<32x256xbf16> to vector<32x256xf32>
      %c0_9 = arith.constant 0 : index
      %c0_10 = arith.constant 0 : index
      %33 = vector.load %arg8[%c0_9, %c0_10] : memref<256x128xf32, #tpu.memory_space<vmem>>, vector<256x128xf32>
      %cst = arith.constant dense<0.000000e+00> : vector<32x128xf32>
      %34 = tpu.matmul %32, %33, %cst {dimension_numbers = #tpu.dot_dimension_numbers<[1], [0], [0], [1], [0, 0, 1, 1], [], []>} : vector<32x256xf32>, vector<256x128xf32>, vector<32x128xf32> -> vector<32x128xf32>
      %c0_11 = arith.constant 0 : index
      %c0_12 = arith.constant 0 : index
      %35 = vector.load %arg9[%c0_11, %c0_12] : memref<2x128xf32, #tpu.memory_space<vmem>>, vector<1x128xf32>
      %36 = vector.broadcast %35 : vector<1x128xf32> to vector<32x128xf32>
      %37 = arith.mulf %34, %36 : vector<32x128xf32>
      %c1 = arith.constant 1 : index
      %c0_13 = arith.constant 0 : index
      %38 = vector.load %arg9[%c1, %c0_13] : memref<2x128xf32, #tpu.memory_space<vmem>>, vector<1x128xf32>
      %39 = vector.broadcast %38 : vector<1x128xf32> to vector<32x128xf32>
      %40 = arith.addf %37, %39 : vector<32x128xf32>
      %cst_14 = arith.constant 0.000000e+00 : f32
      %41 = vector.broadcast %cst_14 : f32 to vector<32x128xf32>
      %42 = arith.maximumf %40, %41 : vector<32x128xf32>
      %c0_15 = arith.constant 0 : index
      %c0_16 = arith.constant 0 : index
      %43 = vector.load %arg21[%c0_15, %c0_16] : memref<32x128xf32, #tpu.memory_space<vmem>>, vector<32x128xf32>
      tpu.vector_store %arg21[%c0_15, %c0_16], %42 {strides = array<i32>} : memref<32x128xf32, #tpu.memory_space<vmem>>, vector<32x128xf32>,
      %cst_17 = arith.constant 0.000000e+00 : f32
      %44 = vector.broadcast %cst_17 : f32 to vector<2x128xf32>
      %cst_18 = arith.constant 0.000000e+00 : f32
      %45 = vector.broadcast %cst_18 : f32 to vector<2x64xf32>
      %c1_19 = arith.constant 1 : index
      %c0_20 = arith.constant 0 : index
      %46 = tpu.strided_load %arg21[%c1_19, %c0_20] {strides = array<i32: 16, 1>} : memref<32x128xf32, #tpu.memory_space<vmem>>, vector<2x128xf32>
      %c0_21 = arith.constant 0 : index
      %c0_22 = arith.constant 0 : index
      %c0_23 = arith.constant 0 : index
      %47 = vector.load %arg10[%c0_21, %c0_22, %c0_23] : memref<8x128x128xf32, #tpu.memory_space<vmem>>, vector<1x128x128xf32>
      %48 = vector.shape_cast %47 : vector<1x128x128xf32> to vector<128x128xf32>
      %cst_24 = arith.constant dense<0.000000e+00> : vector<2x128xf32>
      %49 = tpu.matmul %46, %48, %cst_24 {dimension_numbers = #tpu.dot_dimension_numbers<[1], [0], [0], [1], [0, 0, 1, 1], [], []>} : vector<2x128xf32>, vector<128x128xf32>, vector<2x128xf32> -> vector<2x128xf32>
      %50 = arith.addf %44, %49 : vector<2x128xf32>
      %c0_25 = arith.constant 0 : index
      %c0_26 = arith.constant 0 : index
      %c0_27 = arith.constant 0 : index
      %51 = vector.load %arg12[%c0_25, %c0_26, %c0_27] : memref<8x128x64xf32, #tpu.memory_space<vmem>>, vector<1x128x64xf32>
      %52 = vector.shape_cast %51 : vector<1x128x64xf32> to vector<128x64xf32>
      %cst_28 = arith.constant dense<0.000000e+00> : vector<2x64xf32>
      %53 = tpu.matmul %46, %52, %cst_28 {dimension_numbers = #tpu.dot_dimension_numbers<[1], [0], [0], [1], [0, 0, 1, 1], [], []>} : vector<2x128xf32>, vector<128x64xf32>, vector<2x64xf32> -> vector<2x64xf32>
      %54 = arith.addf %45, %53 : vector<2x64xf32>
      %c2 = arith.constant 2 : index
      %c0_29 = arith.constant 0 : index
      %55 = tpu.strided_load %arg21[%c2, %c0_29] {strides = array<i32: 16, 1>} : memref<32x128xf32, #tpu.memory_space<vmem>>, vector<2x128xf32>
      %c1_30 = arith.constant 1 : index
      %c0_31 = arith.constant 0 : index
      %c0_32 = arith.constant 0 : index
      %56 = vector.load %arg10[%c1_30, %c0_31, %c0_32] : memref<8x128x128xf32, #tpu.memory_space<vmem>>, vector<1x128x128xf32>
      %57 = vector.shape_cast %56 : vector<1x128x128xf32> to vector<128x128xf32>
      %cst_33 = arith.constant dense<0.000000e+00> : vector<2x128xf32>
      %58 = tpu.matmul %55, %57, %cst_33 {dimension_numbers = #tpu.dot_dimension_numbers<[1], [0], [0], [1], [0, 0, 1, 1], [], []>} : vector<2x128xf32>, vector<128x128xf32>, vector<2x128xf32> -> vector<2x128xf32>
      %59 = arith.addf %50, %58 : vector<2x128xf32>
      %c1_34 = arith.constant 1 : index
      %c0_35 = arith.constant 0 : index
      %c0_36 = arith.constant 0 : index
      %60 = vector.load %arg12[%c1_34, %c0_35, %c0_36] : memref<8x128x64xf32, #tpu.memory_space<vmem>>, vector<1x128x64xf32>
      %61 = vector.shape_cast %60 : vector<1x128x64xf32> to vector<128x64xf32>
      %cst_37 = arith.constant dense<0.000000e+00> : vector<2x64xf32>
      %62 = tpu.matmul %55, %61, %cst_37 {dimension_numbers = #tpu.dot_dimension_numbers<[1], [0], [0], [1], [0, 0, 1, 1], [], []>} : vector<2x128xf32>, vector<128x64xf32>, vector<2x64xf32> -> vector<2x64xf32>
      %63 = arith.addf %54, %62 : vector<2x64xf32>
      %c3 = arith.constant 3 : index
      %c0_38 = arith.constant 0 : index
      %64 = tpu.strided_load %arg21[%c3, %c0_38] {strides = array<i32: 16, 1>} : memref<32x128xf32, #tpu.memory_space<vmem>>, vector<2x128xf32>
      %c2_39 = arith.constant 2 : index
      %c0_40 = arith.constant 0 : index
      %c0_41 = arith.constant 0 : index
      %65 = vector.load %arg10[%c2_39, %c0_40, %c0_41] : memref<8x128x128xf32, #tpu.memory_space<vmem>>, vector<1x128x128xf32>
      %66 = vector.shape_cast %65 : vector<1x128x128xf32> to vector<128x128xf32>
      %cst_42 = arith.constant dense<0.000000e+00> : vector<2x128xf32>
      %67 = tpu.matmul %64, %66, %cst_42 {dimension_numbers = #tpu.dot_dimension_numbers<[1], [0], [0], [1], [0, 0, 1, 1], [], []>} : vector<2x128xf32>, vector<128x128xf32>, vector<2x128xf32> -> vector<2x128xf32>
      %68 = arith.addf %59, %67 : vector<2x128xf32>
      %c2_43 = arith.constant 2 : index
      %c0_44 = arith.constant 0 : index
      %c0_45 = arith.constant 0 : index
      %69 = vector.load %arg12[%c2_43, %c0_44, %c0_45] : memref<8x128x64xf32, #tpu.memory_space<vmem>>, vector<1x128x64xf32>
      %70 = vector.shape_cast %69 : vector<1x128x64xf32> to vector<128x64xf32>
      %cst_46 = arith.constant dense<0.000000e+00> : vector<2x64xf32>
      %71 = tpu.matmul %64, %70, %cst_46 {dimension_numbers = #tpu.dot_dimension_numbers<[1], [0], [0], [1], [0, 0, 1, 1], [], []>} : vector<2x128xf32>, vector<128x64xf32>, vector<2x64xf32> -> vector<2x64xf32>
      %72 = arith.addf %63, %71 : vector<2x64xf32>
      %c4 = arith.constant 4 : index
      %c0_47 = arith.constant 0 : index
      %73 = tpu.strided_load %arg21[%c4, %c0_47] {strides = array<i32: 16, 1>} : memref<32x128xf32, #tpu.memory_space<vmem>>, vector<2x128xf32>
      %c3_48 = arith.constant 3 : index
      %c0_49 = arith.constant 0 : index
      %c0_50 = arith.constant 0 : index
      %74 = vector.load %arg10[%c3_48, %c0_49, %c0_50] : memref<8x128x128xf32, #tpu.memory_space<vmem>>, vector<1x128x128xf32>
      %75 = vector.shape_cast %74 : vector<1x128x128xf32> to vector<128x128xf32>
      %cst_51 = arith.constant dense<0.000000e+00> : vector<2x128xf32>
      %76 = tpu.matmul %73, %75, %cst_51 {dimension_numbers = #tpu.dot_dimension_numbers<[1], [0], [0], [1], [0, 0, 1, 1], [], []>} : vector<2x128xf32>, vector<128x128xf32>, vector<2x128xf32> -> vector<2x128xf32>
      %77 = arith.addf %68, %76 : vector<2x128xf32>
      %c3_52 = arith.constant 3 : index
      %c0_53 = arith.constant 0 : index
      %c0_54 = arith.constant 0 : index
      %78 = vector.load %arg12[%c3_52, %c0_53, %c0_54] : memref<8x128x64xf32, #tpu.memory_space<vmem>>, vector<1x128x64xf32>
      %79 = vector.shape_cast %78 : vector<1x128x64xf32> to vector<128x64xf32>
      %cst_55 = arith.constant dense<0.000000e+00> : vector<2x64xf32>
      %80 = tpu.matmul %73, %79, %cst_55 {dimension_numbers = #tpu.dot_dimension_numbers<[1], [0], [0], [1], [0, 0, 1, 1], [], []>} : vector<2x128xf32>, vector<128x64xf32>, vector<2x64xf32> -> vector<2x64xf32>
      %81 = arith.addf %72, %80 : vector<2x64xf32>
      %c5 = arith.constant 5 : index
      %c0_56 = arith.constant 0 : index
      %82 = tpu.strided_load %arg21[%c5, %c0_56] {strides = array<i32: 16, 1>} : memref<32x128xf32, #tpu.memory_space<vmem>>, vector<2x128xf32>
      %c4_57 = arith.constant 4 : index
      %c0_58 = arith.constant 0 : index
      %c0_59 = arith.constant 0 : index
      %83 = vector.load %arg10[%c4_57, %c0_58, %c0_59] : memref<8x128x128xf32, #tpu.memory_space<vmem>>, vector<1x128x128xf32>
      %84 = vector.shape_cast %83 : vector<1x128x128xf32> to vector<128x128xf32>
      %cst_60 = arith.constant dense<0.000000e+00> : vector<2x128xf32>
      %85 = tpu.matmul %82, %84, %cst_60 {dimension_numbers = #tpu.dot_dimension_numbers<[1], [0], [0], [1], [0, 0, 1, 1], [], []>} : vector<2x128xf32>, vector<128x128xf32>, vector<2x128xf32> -> vector<2x128xf32>
      %86 = arith.addf %77, %85 : vector<2x128xf32>
      %c4_61 = arith.constant 4 : index
      %c0_62 = arith.constant 0 : index
      %c0_63 = arith.constant 0 : index
      %87 = vector.load %arg12[%c4_61, %c0_62, %c0_63] : memref<8x128x64xf32, #tpu.memory_space<vmem>>, vector<1x128x64xf32>
      %88 = vector.shape_cast %87 : vector<1x128x64xf32> to vector<128x64xf32>
      %cst_64 = arith.constant dense<0.000000e+00> : vector<2x64xf32>
      %89 = tpu.matmul %82, %88, %cst_64 {dimension_numbers = #tpu.dot_dimension_numbers<[1], [0], [0], [1], [0, 0, 1, 1], [], []>} : vector<2x128xf32>, vector<128x64xf32>, vector<2x64xf32> -> vector<2x64xf32>
      %90 = arith.addf %81, %89 : vector<2x64xf32>
      %c6 = arith.constant 6 : index
      %c0_65 = arith.constant 0 : index
      %91 = tpu.strided_load %arg21[%c6, %c0_65] {strides = array<i32: 16, 1>} : memref<32x128xf32, #tpu.memory_space<vmem>>, vector<2x128xf32>
      %c5_66 = arith.constant 5 : index
      %c0_67 = arith.constant 0 : index
      %c0_68 = arith.constant 0 : index
      %92 = vector.load %arg10[%c5_66, %c0_67, %c0_68] : memref<8x128x128xf32, #tpu.memory_space<vmem>>, vector<1x128x128xf32>
      %93 = vector.shape_cast %92 : vector<1x128x128xf32> to vector<128x128xf32>
      %cst_69 = arith.constant dense<0.000000e+00> : vector<2x128xf32>
      %94 = tpu.matmul %91, %93, %cst_69 {dimension_numbers = #tpu.dot_dimension_numbers<[1], [0], [0], [1], [0, 0, 1, 1], [], []>} : vector<2x128xf32>, vector<128x128xf32>, vector<2x128xf32> -> vector<2x128xf32>
      %95 = arith.addf %86, %94 : vector<2x128xf32>
      %c5_70 = arith.constant 5 : index
      %c0_71 = arith.constant 0 : index
      %c0_72 = arith.constant 0 : index
      %96 = vector.load %arg12[%c5_70, %c0_71, %c0_72] : memref<8x128x64xf32, #tpu.memory_space<vmem>>, vector<1x128x64xf32>
      %97 = vector.shape_cast %96 : vector<1x128x64xf32> to vector<128x64xf32>
      %cst_73 = arith.constant dense<0.000000e+00> : vector<2x64xf32>
      %98 = tpu.matmul %91, %97, %cst_73 {dimension_numbers = #tpu.dot_dimension_numbers<[1], [0], [0], [1], [0, 0, 1, 1], [], []>} : vector<2x128xf32>, vector<128x64xf32>, vector<2x64xf32> -> vector<2x64xf32>
      %99 = arith.addf %90, %98 : vector<2x64xf32>
      %c7 = arith.constant 7 : index
      %c0_74 = arith.constant 0 : index
      %100 = tpu.strided_load %arg21[%c7, %c0_74] {strides = array<i32: 16, 1>} : memref<32x128xf32, #tpu.memory_space<vmem>>, vector<2x128xf32>
      %c6_75 = arith.constant 6 : index
      %c0_76 = arith.constant 0 : index
      %c0_77 = arith.constant 0 : index
      %101 = vector.load %arg10[%c6_75, %c0_76, %c0_77] : memref<8x128x128xf32, #tpu.memory_space<vmem>>, vector<1x128x128xf32>
      %102 = vector.shape_cast %101 : vector<1x128x128xf32> to vector<128x128xf32>
      %cst_78 = arith.constant dense<0.000000e+00> : vector<2x128xf32>
      %103 = tpu.matmul %100, %102, %cst_78 {dimension_numbers = #tpu.dot_dimension_numbers<[1], [0], [0], [1], [0, 0, 1, 1], [], []>} : vector<2x128xf32>, vector<128x128xf32>, vector<2x128xf32> -> vector<2x128xf32>
      %104 = arith.addf %95, %103 : vector<2x128xf32>
      %c6_79 = arith.constant 6 : index
      %c0_80 = arith.constant 0 : index
      %c0_81 = arith.constant 0 : index
      %105 = vector.load %arg12[%c6_79, %c0_80, %c0_81] : memref<8x128x64xf32, #tpu.memory_space<vmem>>, vector<1x128x64xf32>
      %106 = vector.shape_cast %105 : vector<1x128x64xf32> to vector<128x64xf32>
      %cst_82 = arith.constant dense<0.000000e+00> : vector<2x64xf32>
      %107 = tpu.matmul %100, %106, %cst_82 {dimension_numbers = #tpu.dot_dimension_numbers<[1], [0], [0], [1], [0, 0, 1, 1], [], []>} : vector<2x128xf32>, vector<128x64xf32>, vector<2x64xf32> -> vector<2x64xf32>
      %108 = arith.addf %99, %107 : vector<2x64xf32>
      %c8 = arith.constant 8 : index
      %c0_83 = arith.constant 0 : index
      %109 = tpu.strided_load %arg21[%c8, %c0_83] {strides = array<i32: 16, 1>} : memref<32x128xf32, #tpu.memory_space<vmem>>, vector<2x128xf32>
      %c7_84 = arith.constant 7 : index
      %c0_85 = arith.constant 0 : index
      %c0_86 = arith.constant 0 : index
      %110 = vector.load %arg10[%c7_84, %c0_85, %c0_86] : memref<8x128x128xf32, #tpu.memory_space<vmem>>, vector<1x128x128xf32>
      %111 = vector.shape_cast %110 : vector<1x128x128xf32> to vector<128x128xf32>
      %cst_87 = arith.constant dense<0.000000e+00> : vector<2x128xf32>
      %112 = tpu.matmul %109, %111, %cst_87 {dimension_numbers = #tpu.dot_dimension_numbers<[1], [0], [0], [1], [0, 0, 1, 1], [], []>} : vector<2x128xf32>, vector<128x128xf32>, vector<2x128xf32> -> vector<2x128xf32>
      %113 = arith.addf %104, %112 : vector<2x128xf32>
      %c7_88 = arith.constant 7 : index
      %c0_89 = arith.constant 0 : index
      %c0_90 = arith.constant 0 : index
      %114 = vector.load %arg12[%c7_88, %c0_89, %c0_90] : memref<8x128x64xf32, #tpu.memory_space<vmem>>, vector<1x128x64xf32>
      %115 = vector.shape_cast %114 : vector<1x128x64xf32> to vector<128x64xf32>
      %cst_91 = arith.constant dense<0.000000e+00> : vector<2x64xf32>
      %116 = tpu.matmul %109, %115, %cst_91 {dimension_numbers = #tpu.dot_dimension_numbers<[1], [0], [0], [1], [0, 0, 1, 1], [], []>} : vector<2x128xf32>, vector<128x64xf32>, vector<2x64xf32> -> vector<2x64xf32>
      %117 = arith.addf %108, %116 : vector<2x64xf32>
      %c0_92 = arith.constant 0 : index
      %c0_93 = arith.constant 0 : index
      %118 = vector.load %arg11[%c0_92, %c0_93] : memref<1x128xf32, #tpu.memory_space<vmem>>, vector<1x128xf32>
      %119 = vector.broadcast %118 : vector<1x128xf32> to vector<2x128xf32>
      %120 = arith.addf %113, %119 : vector<2x128xf32>
      %c0_94 = arith.constant 0 : index
      %c0_95 = arith.constant 0 : index
      %c0_96 = arith.constant 0 : index
      %121 = vector.load %arg16[%c0_94, %c0_95, %c0_96] : memref<1x2x128xf32, #tpu.memory_space<vmem>>, vector<1x2x128xf32>
      %122 = vector.shape_cast %121 : vector<1x2x128xf32> to vector<2x128xf32>
      %123 = vector.shape_cast %120 : vector<2x128xf32> to vector<1x2x128xf32>
      tpu.vector_store %arg16[%c0_94, %c0_95, %c0_96], %123 {strides = array<i32>} : memref<1x2x128xf32, #tpu.memory_space<vmem>>, vector<1x2x128xf32>,
      %c0_97 = arith.constant 0 : index
      %c0_98 = arith.constant 0 : index
      %124 = vector.load %arg13[%c0_97, %c0_98] : memref<1x64xf32, #tpu.memory_space<vmem>>, vector<1x64xf32>
      %125 = vector.broadcast %124 : vector<1x64xf32> to vector<2x64xf32>
      %126 = arith.addf %117, %125 : vector<2x64xf32>
      %cst_99 = arith.constant 0.000000e+00 : f32
      %127 = vector.broadcast %cst_99 : f32 to vector<2x64xf32>
      %128 = arith.maximumf %126, %127 : vector<2x64xf32>
      %c0_100 = arith.constant 0 : index
      %c0_101 = arith.constant 0 : index
      %129 = vector.load %arg14[%c0_100, %c0_101] : memref<64x128xf32, #tpu.memory_space<vmem>>, vector<64x128xf32>
      %cst_102 = arith.constant dense<0.000000e+00> : vector<2x128xf32>
      %130 = tpu.matmul %128, %129, %cst_102 {dimension_numbers = #tpu.dot_dimension_numbers<[1], [0], [0], [1], [0, 0, 1, 1], [], []>} : vector<2x64xf32>, vector<64x128xf32>, vector<2x128xf32> -> vector<2x128xf32>
      %c0_103 = arith.constant 0 : index
      %c0_104 = arith.constant 0 : index
      %131 = vector.load %arg15[%c0_103, %c0_104] : memref<1x128xf32, #tpu.memory_space<vmem>>, vector<1x128xf32>
      %132 = vector.broadcast %131 : vector<1x128xf32> to vector<2x128xf32>
      %133 = arith.addf %130, %132 : vector<2x128xf32>
      %134 = math.tanh %133 : vector<2x128xf32>
      %c0_105 = arith.constant 0 : index
      %c0_106 = arith.constant 0 : index
      %c0_107 = arith.constant 0 : index
      %135 = vector.load %arg17[%c0_105, %c0_106, %c0_107] : memref<1x2x128xf32, #tpu.memory_space<vmem>>, vector<1x2x128xf32>
      %136 = vector.shape_cast %135 : vector<1x2x128xf32> to vector<2x128xf32>
      %137 = vector.shape_cast %134 : vector<2x128xf32> to vector<1x2x128xf32>
      tpu.vector_store %arg17[%c0_105, %c0_106, %c0_107], %137 {strides = array<i32>} : memref<1x2x128xf32, #tpu.memory_space<vmem>>, vector<1x2x128xf32>,
    } else {
    }
    return
  }
  func.func @transform_0(%arg0: i32, %arg1: i32) -> (i32, i32, i32) {
    %c0_i32 = arith.constant 0 : i32
    %c0_i32_0 = arith.constant 0 : i32
    %c0_i32_1 = arith.constant 0 : i32
    return %arg0, %c0_i32, %c0_i32_0 : i32, i32, i32
  }
  func.func @transform_1(%arg0: i32, %arg1: i32) -> (i32, i32, i32) {
    %c0_i32 = arith.constant 0 : i32
    %c0_i32_0 = arith.constant 0 : i32
    %c0_i32_1 = arith.constant 0 : i32
    %c0_i32_2 = arith.constant 0 : i32
    return %c0_i32, %c0_i32_0, %c0_i32_1 : i32, i32, i32
  }
  func.func @transform_2(%arg0: i32, %arg1: i32) -> (i32, i32) {
    %c0_i32 = arith.constant 0 : i32
    %c0_i32_0 = arith.constant 0 : i32
    %c0_i32_1 = arith.constant 0 : i32
    return %c0_i32, %c0_i32_0 : i32, i32
  }
  func.func @transform_3(%arg0: i32, %arg1: i32) -> (i32, i32, i32, i32) {
    %c1_i32 = arith.constant 1 : i32
    %0 = arith.subi %arg1, %c1_i32 : i32
    %c0_i32 = arith.constant 0 : i32
    %1 = arith.maxsi %0, %c0_i32 : i32
    %c0_i32_0 = arith.constant 0 : i32
    %c0_i32_1 = arith.constant 0 : i32
    %c0_i32_2 = arith.constant 0 : i32
    %c0_i32_3 = arith.constant 0 : i32
    return %1, %c0_i32_0, %c0_i32_1, %c0_i32_2 : i32, i32, i32, i32
  }
  func.func @transform_4(%arg0: i32, %arg1: i32) -> (i32, i32, i32, i32) {
    %c1_i32 = arith.constant 1 : i32
    %0 = arith.subi %arg1, %c1_i32 : i32
    %c0_i32 = arith.constant 0 : i32
    %1 = arith.maxsi %0, %c0_i32 : i32
    %c0_i32_0 = arith.constant 0 : i32
    %c0_i32_1 = arith.constant 0 : i32
    %c0_i32_2 = arith.constant 0 : i32
    %c0_i32_3 = arith.constant 0 : i32
    return %1, %c0_i32_0, %c0_i32_1, %c0_i32_2 : i32, i32, i32, i32
  }
  func.func @transform_5(%arg0: i32, %arg1: i32) -> (i32, i32, i32) {
    %c1_i32 = arith.constant 1 : i32
    %0 = arith.subi %arg1, %c1_i32 : i32
    %c0_i32 = arith.constant 0 : i32
    %1 = arith.maxsi %0, %c0_i32 : i32
    %c0_i32_0 = arith.constant 0 : i32
    %c0_i32_1 = arith.constant 0 : i32
    %c0_i32_2 = arith.constant 0 : i32
    return %1, %c0_i32_0, %c0_i32_1 : i32, i32, i32
  }
  func.func @transform_6(%arg0: i32, %arg1: i32) -> (i32, i32) {
    %c0_i32 = arith.constant 0 : i32
    %c0_i32_0 = arith.constant 0 : i32
    %c0_i32_1 = arith.constant 0 : i32
    return %c0_i32, %c0_i32_0 : i32, i32
  }
  func.func @transform_7(%arg0: i32, %arg1: i32) -> (i32, i32) {
    %c0_i32 = arith.constant 0 : i32
    %c0_i32_0 = arith.constant 0 : i32
    %c0_i32_1 = arith.constant 0 : i32
    return %c0_i32, %c0_i32_0 : i32, i32
  }
  func.func @transform_8(%arg0: i32, %arg1: i32) -> (i32, i32, i32) {
    %c0_i32 = arith.constant 0 : i32
    %c0_i32_0 = arith.constant 0 : i32
    %c0_i32_1 = arith.constant 0 : i32
    %c0_i32_2 = arith.constant 0 : i32
    return %c0_i32, %c0_i32_0, %c0_i32_1 : i32, i32, i32
  }
  func.func @transform_9(%arg0: i32, %arg1: i32) -> (i32, i32) {
    %c0_i32 = arith.constant 0 : i32
    %c0_i32_0 = arith.constant 0 : i32
    %c0_i32_1 = arith.constant 0 : i32
    return %c0_i32, %c0_i32_0 : i32, i32
  }
  func.func @transform_10(%arg0: i32, %arg1: i32) -> (i32, i32, i32) {
    %c0_i32 = arith.constant 0 : i32
    %c0_i32_0 = arith.constant 0 : i32
    %c0_i32_1 = arith.constant 0 : i32
    %c0_i32_2 = arith.constant 0 : i32
    return %c0_i32, %c0_i32_0, %c0_i32_1 : i32, i32, i32
  }
  func.func @transform_11(%arg0: i32, %arg1: i32) -> (i32, i32) {
    %c0_i32 = arith.constant 0 : i32
    %c0_i32_0 = arith.constant 0 : i32
    %c0_i32_1 = arith.constant 0 : i32
    return %c0_i32, %c0_i32_0 : i32, i32
  }
  func.func @transform_12(%arg0: i32, %arg1: i32) -> (i32, i32) {
    %c0_i32 = arith.constant 0 : i32
    %c0_i32_0 = arith.constant 0 : i32
    %c0_i32_1 = arith.constant 0 : i32
    return %c0_i32, %c0_i32_0 : i32, i32
  }
  func.func @transform_13(%arg0: i32, %arg1: i32) -> (i32, i32) {
    %c0_i32 = arith.constant 0 : i32
    %c0_i32_0 = arith.constant 0 : i32
    %c0_i32_1 = arith.constant 0 : i32
    return %c0_i32, %c0_i32_0 : i32, i32
  }
  func.func @transform_14(%arg0: i32, %arg1: i32) -> (i32, i32, i32) {
    %c0_i32 = arith.constant 0 : i32
    %c0_i32_0 = arith.constant 0 : i32
    %c0_i32_1 = arith.constant 0 : i32
    return %arg0, %c0_i32, %c0_i32_0 : i32, i32, i32
  }
  func.func @transform_15(%arg0: i32, %arg1: i32) -> (i32, i32, i32) {
    %c0_i32 = arith.constant 0 : i32
    %c0_i32_0 = arith.constant 0 : i32
    %c0_i32_1 = arith.constant 0 : i32
    return %arg0, %c0_i32, %c0_i32_0 : i32, i32, i32
  }
}

</mosaic_0001>

<bundles_post_ra>
// kernel: alphazero_forward.1
= control target key start
LH: loop header
LB: loop body
LE: loop exit
PB: predicated region body
PF: predicated region fallthrough
CT: control target
= control target key end

     0   :  { %s7393_s0 = inlined_call_operand.vmem [shape: bf16[2,16,32], index: 0, kind: input, shape index: {}]   ;;  %s7394_s1 = inlined_call_operand.vmem [shape: bf16[3,32,256], index: 1, kind: input, shape index: {}]   ;;  %s7395_s2 = inlined_call_operand.vmem [shape: f32[2,256], index: 2, kind: input, shape index: {}]   ;;  %s7396_s3 = inlined_call_operand.vmem [shape: bf16[2,3,256,256], index: 3, kind: input, shape index: {}]   ;;  %s7397_s4 = inlined_call_operand.hbm [shape: bf16[2,3,256,256], index: 4, kind: input, shape index: {}]   ;;  %s7398_s5 = inlined_call_operand.vmem [shape: f32[2,4,256], index: 5, kind: input, shape index: {}]   ;;  %s7399_s6 = inlined_call_operand.hbm [shape: f32[256,128], index: 6, kind: input, shape index: {}]   ;;  %s7400_s7 = inlined_call_operand.vmem [shape: f32[2,128], index: 7, kind: input, shape index: {}]   ;;  %s7401_s8 = inlined_call_operand.hbm [shape: f32[8,128,128], index: 8, kind: input, shape index: {}]   ;;  %s7402_s9 = inlined_call_operand.vmem [shape: f32[1,128], index: 9, kind: input, shape index: {}]   ;;  %s7403_s10 = inlined_call_operand.vmem [shape: f32[8,128,64], index: 10, kind: input, shape index: {}]   ;;  %s7404_s11 = inlined_call_operand.vmem [shape: f32[1,64], index: 11, kind: input, shape index: {}]   ;;  %s7405_s12 = inlined_call_operand.vmem [shape: f32[64,128], index: 12, kind: input, shape index: {}]   ;;  %s7406_s13 = inlined_call_operand.vmem [shape: f32[1,128], index: 13, kind: input, shape index: {}]   ;;  %s7407_s14 = inlined_call_operand.hbm [shape: f32[1,2,128], index: 14, kind: output, shape index: {0}]   ;;  %s7408_s15 = inlined_call_operand.vmem [shape: f32[1,2,128], index: 15, kind: output, shape index: {1}]  }
   0x1   :  { %7417 = sst [smem:[#allocation18_spill]] %s7399_s6 }
   0x2   :  { %7418 = sst [smem:[#allocation19_spill]] %s7400_s7 }
   0x3   :  { %7419 = sst [smem:[#allocation20_spill]] %s7401_s8 }
   0x4   :  { %7420 = sst [smem:[#allocation21_spill]] %s7402_s9 }
   0x5   :  { %7421 = sst [smem:[#allocation22_spill]] %s7403_s10 }
   0x6   :  { %7422 = sst [smem:[#allocation23_spill]] %s7404_s11 }
   0x7   :  { %7423 = sst [smem:[#allocation24_spill]] %s7405_s12 }
   0x8   :  { %7424 = sst [smem:[#allocation25_spill]] %s7406_s13 }
   0x9   :  { %7425 = sst [smem:[#allocation26_spill]] %s7407_s14 }
   0xa   :  { %7426 = sst [smem:[#allocation27_spill]] %s7408_s15 }
   0xb   :  { %21 = vsyncpa [#allocation7], 0 }
   0xc   :  { %23 = vsyncpa [#allocation7 + $0x1], 0 }
   0xd   :  { %24 = vsyncpa [#allocation10], 0 }
   0xe   :  { %25 = vsyncpa [#allocation8], 0  ;;  %s5947_s18 = smov 0   ;;  %s5949_s19 = smov 0  }
   0xf   :  { %s5951_s20 = smov 0   ;;  %s5953_s21 = smov 0  }
  0x10   :  { %s5955_s22 = smov 0   ;;  %s5957_s23 = smov 0  }
  0x11 LB: > { %7427 = sst [smem:[#allocation16_spill]] %s5855_s22  ;;  %s7409_s24 = sadd.s32 4294967295, %s5859_s23   ;;  %s5859_s23 = sphi %s5957_s23, %s31_s23   ;;  %s5855_s22 = sphi %s5955_s22, %s7457_s22   ;;  %s5851_s21 = sphi %s5953_s21, %s7456_s21   ;;  %s5847_s20 = sphi %s5951_s20, %s7460_s20   ;;  %s5843_s19 = sphi %s5949_s19, %s7459_s19   ;;  %s5839_s18 = sphi %s5947_s18, %s7458_s18  }
  0x12   : > { %p169_p0 = scmp.ne.s32.totalorder %s5843_s19, %s5839_s18  ;;  %p5979_p1 = scmp.eq.s32.totalorder %s7409_s24, 0 }
  0x13   : > { %p4185_p2 = scmp.ge.s32.totalorder %s5859_s23, 1  ;;  %p432_p3 = scmp.lt.s32.totalorder %s5859_s23, 4 }
  0x14   : > { %p5987_p4 = por %p5979_p1, %p169_p0  ;;  %s7430_s6 = sld [smem:[#allocation18_spill]] }
  0x15   : > { %p5994_p5 = pnand %p4185_p2, %p432_p3  ;;  %s5861_s16 = smov [#allocation9]  }
  0x16   : > { %s461_s17 = sshll.u32 %s5861_s16, 4  ;;  %s7432_s8 = sld [smem:[#allocation20_spill]]  ;;  %s462_s17 = int_to_ptr.vmem [resolvable:$true] %s461_s17 }
  0x17   : > { %p5604_p6 = pneg %p5994_p5  ;;  %s7410_s24 = smov 128  }
  0x18   : > { %s5864_s16 = smov [#allocation11]   ;;  %s40_s15 = sadd.s32 1, %s5855_s22 }
  0x19   : > { %p5605_p7 = pnand %p5604_p6, %p5979_p1  ;;  %s478_s14 = sshll.u32 %s5864_s16, 4  ;;  %s479_s14 = int_to_ptr.vmem [resolvable:$true] %s478_s14 }
  0x1a   : > { %s459_s29 = sshll.u32 %s7430_s6, 4  ;;  %s7411_s6 = smov 8   ;;  %s460_s29 = int_to_ptr.hbm [resolvable:$true] %s459_s29 }
  0x1b   : > { %5607 = dma.hbm_to_vmem [thread:$0]  (!%p5605_p7), %s460_s29, 4096, %s462_s17, [#allocation10], %s7410_s24, %s7410_s24, %s7411_s6  }
  0x1c   : > { %s476_s28 = sshll.u32 %s7432_s8, 4  ;;  %s4181_s18 = sadd.s32 4294967295, %s5855_s22  ;;  %s477_s28 = int_to_ptr.hbm [resolvable:$true] %s476_s28 }
  0x1d   : > { %5610 = dma.hbm_to_vmem [thread:$0]  (!%p5605_p7), %s477_s28, 16384, %s479_s14, [#allocation10], %s7410_s24, %s7410_s24, %s7411_s6  }
  0x1e   : > { %p41_p8 = scmp.ge.s32.totalorder %s40_s15, 3  ;;  %p148_p9 = scmp.gt.s32.totalorder %s4181_s18, 0 }
  0x1f   : > { %s156_s27 = sadd.s32 1, %s5847_s20  ;;  %p163_p10 = scmp.ne.s32.totalorder %s5847_s20, %s5843_s19 }
  0x20   : > { %s7462_s15 = smov (%p41_p8, %s40_s15), 0  ;;  %s7464_s18 = smov (!%p148_p9, %s4181_s18), 0 }
  0x21   : > { %7433 = sst [smem:[#allocation17_spill]] %s7462_s15  ;;  %s4182_s29 = sadd.s32 4294967295, %s7462_s15 }
  0x22   : > { %p164_p11 = scmp.eq.s32.totalorder %s5859_s23, 0  ;;  %p151_p12 = scmp.gt.s32.totalorder %s4182_s29, 0 }
  0x23   : > { %p5617_p13 = scmp.lt.s32.totalorder %s5859_s23, 3  ;;  %s521_s14 = sand.u32 1, %s5847_s20  }
  0x24   : > { %p6021_p0 = por %p164_p11, %p163_p10  ;;  %s7466_s29 = smov (!%p151_p12, %s4182_s29), 0 }
  0x25   : > { %s5586_s28 = smul.u32 768, %s521_s14  ;;  %s153_s16 = ssub.s32 %s7464_s18, %s7466_s29 }
  0x26   : > { %s5587_s24 = smul.u32 768, %s7464_s18  ;;  %p154_p2 = scmp.eq.s32.totalorder %s153_s16, 0 }
  0x27   : > { %s525_s15 = scalar_lea.vmem [#allocation6], %s5586_s28  ;;  %p5612_p3 = pnand %p5617_p13, %p6021_p0 }
  0x28   : > { %s533_s22 = scalar_lea.hbm %s7397_s4, %s5587_s24  ;;  %s536_s13 = sshll.u32 %s525_s15, 4  ;;  %s537_s13 = int_to_ptr.vmem [resolvable:$true] %s536_s13 }
  0x29   : > { %s6030_s11 = scalar_select %p154_p2, %s5847_s20, %s156_s27  }
  0x2a   : > { %s534_s9 = sshll.u32 %s533_s22, 4  ;;  %s522_s12 = scalar_lea.sflag [#allocation7], %s521_s14  ;;  %s535_s9 = int_to_ptr.hbm [resolvable:$true] %s534_s9 }
  0x2b   : > { %s7435_s7 = smov 8   ;;  %s7436_s10 = smov 128  }
  0x2c   : > { %5614 = dma.hbm_to_vmem [thread:$0]  (!%p5612_p3), %s535_s9, 12288, %s537_s13, %s522_s12, %s7436_s10, %s7436_s10, %s7435_s7  }
  0x2d   : > { %562 = sbr.rel (%p5994_p5) target bundleno = 1334 (0x536), region = 76  ;;  %s564_s6 = sand.u32 (!%p5994_p5), 1, %s5843_s19  }
  0x2e   : > { %s5588_s8 = smul.u32 (!%p5994_p5), 768, %s564_s6  ;;  %s565_s15 = scalar_lea.sflag (!%p5994_p5), [#allocation7], %s564_s6 }
  0x30   : > { %s6042_s24 = scalar_lea.vmem (!%p5994_p5), [#allocation6], %s5588_s8 }
  0x32   : > { %5826 = dma.done.wait (%p5987_p4), %s565_s15, 12288  }
  0x33   : > { %5828 = vsyncadd (%p5987_p4), %s565_s15, 4294955008 }
  0x34   : > { %5830 = dma.done.wait (%p5979_p1), [#allocation10], 20480  }
  0x35   : > { %5832 = vsyncadd (%p5979_p1), [#allocation10], 4294946816  ;;  %s4195_s7 = sadd.s32 4294967295, %s5851_s21  ;;  %v684_v0 = vlaneseq  ;;  %p4210_p1 = scmp.ne.s32.totalorder %s5851_s21, 0 }
  0x36   : > { %p655_p5 = scmp.gt.s32.totalorder %s4195_s7, 0  ;;  %p4196_p6 = scmp.lt.s32.totalorder %s4195_s7, 1 }
  0x37   : > { %v685_v1 = vshrl.u32 %v684_v0, 7 }
  0x38   : > { %s7468_s7 = smov (!%p655_p5, %s4195_s7), 0 }
  0x39   : > { %v686_v2 = vadd.s32 8, %v685_v1  ;;  %v687_v3 = vadd.s32 16, %v685_v1  ;;  %v688_v4 = vadd.s32 24, %v685_v1  ;;  %v693_v5 = vand.u32 15, %v685_v1  ;;  %s7470_s7 = smov (!%p4196_p6, %s7468_s7), 1  ;;  %752 = sbr.rel (%p4210_p1) target bundleno = 271 (0x10f), region = 92 }
  0x3a   : > { %s5589_s9 = smul.u32 768, %s7470_s7  ;;  %s5345_s10 = sshll.u32 %s7470_s7, 3 }
  0x3b   : > { %v700_v6 = vand.u32 15, %v686_v2  ;;  %v707_v7 = vand.u32 15, %v687_v3  ;;  %v714_v8 = vand.u32 15, %v688_v4  ;;  %vm6053_vm0 = vcmp.ge.s32.totalorder %v693_v5, 1  ;;  %s6060_s22 = scalar_lea.vmem %s7398_s5, %s5345_s10 }
  0x3c   : > { %s6077_s30 = scalar_lea.vmem %s7396_s3, %s5589_s9 }
  0x3d   : > { %vm6062_vm1 = vcmp.ge.s32.totalorder %v707_v7, 1  ;;  %vm6066_vm2 = vcmp.le.s32.totalorder %v700_v6, 8  ;;  %vm6070_vm3 = vcmp.le.s32.totalorder %v714_v8, 8 }
  0x3e   : > { %v4227_v13 = vld [vmem:[%s7394_s1 + $0x30] sm:$0xf]  ;;  %v5353_v14 = vld [vmem:[%s7394_s1 + $0x34] sm:$0xf0]  ;;  %v5352_v15 = vld [vmem:[%s7394_s1 + $0x34] sm:$0xf] }
  0x3f   : > { %v4228_v16 = vor.u32 %v5353_v14, %v4227_v13  ;;  %v4229_v17 = vld [vmem:[%s7394_s1 + $0x38] sm:$0xf0]  ;;  %v4219_v18 = vld [vmem:[%s7394_s1 + $0x20] sm:$0xf]  ;;  %v5351_v19 = vld [vmem:[%s7394_s1 + $0x24] sm:$0xf0] }
  0x40   : > { %v4232_v20 = vor.u32 %v5352_v15, %v4229_v17  ;;  %v5350_v21 = vld [vmem:[%s7394_s1 + $0x24] sm:$0xf]  ;;  %v4221_v22 = vld [vmem:[%s7394_s1 + $0x28] sm:$0xf0]  ;;  %vm753_vm4 = vcmask 257024   ;;  %v4220_v23 = vor.u32 %v5351_v19, %v4219_v18  ;;  %v5865_v26 = vmov 0  }
  0x41   : > { %832 = vmatpush.bf16.msra.mxu0 %v4228_v16  ;;  %5582 = vmatpush.bf16.msra.mxu2 %v4228_v16  ;;  %v4224_v24 = vor.u32 %v5350_v21, %v4221_v22  ;;  %v4247_v25 = vld [vmem:[%s7394_s1 + $0x10] sm:$0xf]  ;;  %759 = vst [vmem:[#allocation3 + $0x8] sm:$0xff] %v5865_v26  ;;  %v5349_v27 = vld [vmem:[%s7394_s1 + $0x14] sm:$0xf0]  ;;  %vm819_vm5 = vcmask 261120  }
  0x42   : > { %851 = vmatpush.bf16.msra.mxu1 %v4232_v20  ;;  %5584 = vmatpush.bf16.msra.mxu3 %v4232_v20  ;;  %v5348_v28 = vld [vmem:[%s7394_s1 + $0x14] sm:$0xf]  ;;  %760 = vst [vmem:[#allocation3 + $0x30] sm:$0xff] %v5865_v26  ;;  %v4248_v29 = vor.u32 %v5349_v27, %v4247_v25  ;;  %v4249_v30 = vld [vmem:[%s7394_s1 + $0x18] sm:$0xf0] }
  0x43   : > { %v4239_v31 = vld [vmem:[%s7394_s1] sm:$0xf]  ;;  %v4252_v33 = vor.u32 %v5348_v28, %v4249_v30  ;;  %v5347_v34 = vld [vmem:[%s7394_s1 + $0x4] sm:$0xf0]  ;;  %v5346_v35 = vld [vmem:[%s7394_s1 + $0x4] sm:$0xf] }
  0x44   : > { %v766_v32 = vld [vmem:[%s7393_s0] sm:$0xf]  ;;  %v767_v36 = vld [vmem:[%s7393_s0 + $0x4] sm:$0xf]  ;;  %v4240_v37 = vor.u32 %v5347_v34, %v4239_v31  ;;  %v4241_v38 = vld [vmem:[%s7394_s1 + $0x8] sm:$0xf0] }
  0x45   : > { %833 = vmatpush.bf16.msra.mxu0 %v4220_v23  ;;  %5583 = vmatpush.bf16.msra.mxu2 %v4220_v23  ;;  %v4279_v39 = vld [vmem:[%s7394_s1 + $0x50] sm:$0xf]  ;;  %763 = vst [vmem:[#allocation4 + $0x8] sm:$0xff] %v5865_v26  ;;  %v4244_v40 = vor.u32 %v5346_v35, %v4241_v38  ;;  %v5359_v41 = vld [vmem:[%s7394_s1 + $0x54] sm:$0xf0] }
  0x46   : > { %852 = vmatpush.bf16.msra.mxu1 %v4224_v24  ;;  %5585 = vmatpush.bf16.msra.mxu3 %v4224_v24  ;;  %v5358_v42 = vld [vmem:[%s7394_s1 + $0x54] sm:$0xf]  ;;  %764 = vst [vmem:[#allocation4 + $0x30] sm:$0xff] %v5865_v26  ;;  %v4280_v43 = vor.u32 %v5359_v41, %v4279_v39  ;;  %v4281_v44 = vld [vmem:[%s7394_s1 + $0x58] sm:$0xf0] }
  0x47   : > { %v4271_v45 = vld [vmem:[%s7394_s1 + $0x40] sm:$0xf]  ;;  %v4284_v46 = vor.u32 %v5358_v42, %v4281_v44  ;;  %v5357_v47 = vld [vmem:[%s7394_s1 + $0x44] sm:$0xf0]  ;;  %v5356_v48 = vld [vmem:[%s7394_s1 + $0x44] sm:$0xf] }
  0x48   : > { %768 = vst.msk [vmem:[#allocation2 + $0x8] sm:$0xf] %vm753_vm4, %v766_v32  ;;  %v4272_v49 = vor.u32 %v5357_v47, %v4271_v45  ;;  %v4273_v50 = vld [vmem:[%s7394_s1 + $0x48] sm:$0xf0]  ;;  %v4211_v51 = vld [vmem:[%s7393_s0 + $0x8] sm:$0xf] }
  0x49   : > { %928 = vmatpush.bf16.msrb.mxu2 %v4248_v29  ;;  %1036 = vmatpush.bf16.msrb.mxu0 %v4280_v43  ;;  %769 = vst.msk [vmem:[#allocation2 + $0xc] sm:$0xf] %vm753_vm4, %v767_v36  ;;  %v4276_v52 = vor.u32 %v5356_v48, %v4273_v50  ;;  %v4212_v53 = vld [vmem:[%s7393_s0 + $0xc] sm:$0xf]  ;;  %vm983_vm6 = vsmask.f32 7424 }
  0x4a   : > { %947 = vmatpush.bf16.msrb.mxu3 %v4252_v33  ;;  %1055 = vmatpush.bf16.msrb.mxu1 %v4284_v46  ;;  %755 = vst.msk [vmem:[#allocation2 + $0x4] sm:$0xf] %vm753_vm4, %v5865_v26  ;;  %vm869_vm7 = vsmask.f32 4352 }
  0x4b   : > { %756 = vst.msk [vmem:[#allocation2 + $0x18] sm:$0xf] %vm753_vm4, %v5865_v26  ;;  %v1076_v46 = vld [vmem:[%s7395_s2] ss:$2 sm:$0x3] }
  0x4c   : > { %773 = vst.msk [vmem:[#allocation2 + $0x10] sm:$0xf] %vm753_vm4, %v4211_v51  ;;  %v4289_v48 = vld [vmem:[%s7395_s2 + $0x1] ss:$2 sm:$0x3]  ;;  %v1078_v51 = vperm.slane %v1076_v46, 0 }
  0x4d   : > { %929 = vmatpush.bf16.msrb.mxu2 %v4240_v37  ;;  %1037 = vmatpush.bf16.msrb.mxu0 %v4272_v49  ;;  %774 = vst.msk [vmem:[#allocation2 + $0x14] sm:$0xf] %vm753_vm4, %v4212_v53  ;;  %v1079_v53 = vperm.slane %v1076_v46, 1 }
  0x4e   : > { %948 = vmatpush.bf16.msrb.mxu3 %v4244_v40  ;;  %1056 = vmatpush.bf16.msrb.mxu1 %v4276_v52 }
  0x4f   : > { %v5580_v54 = vld [vmem:[#allocation2 + $0x4] sm:$0xf0]  }
  0x50   : > { %v5568_v55 = vld [vmem:[#allocation2 + $0x8] sm:$0xff]  }
  0x51   : > { %v5354_v56 = vld [vmem:[#allocation2 + $0x8] sm:$0xff]  ;;  %4233 = vmatmul.msk.bf16.vlgmr.msra.gmra.mxu0 %vm819_vm5, %v5568_v55  ;;  %4235 = vmatmul.msk.bf16.vlgmr.msra.gmra.mxu1 %vm819_vm5, %v5568_v55  ;;  %v5572_v57 = vld [vmem:[#allocation2 + $0x4] sm:$0x8]  ;;  %v1093_v55 = vperm.slane %v4289_v48, 0 }
  0x52   : > { %v5573_v58 = vor.u32 %v5580_v54, %v5572_v57  ;;  %v987_v59 = vshll.u32 %v5354_v56, 16  ;;  %v985_v1 = vshrl.u32 %v5354_v56, 16  ;;  %v964_v16 = vld [vmem:[#allocation2 + $0x18] sm:$0x1]  ;;  %v1094_v57 = vperm.slane %v4289_v48, 1 }
  0x53   : > { %v5581_v60 = vld [vmem:[#allocation2 + $0xc] sm:$0xff]   ;;  %v979_v17 = vunpack.c.l.b16 %v964_v16 }
  0x54   : > { %v5569_v61 = vld [vmem:[#allocation2 + $0x10] sm:$0xff]   ;;  %v871_v63 = vshrl.u32 %v5573_v58, 16  ;;  %v874_v0 = vshll.u32 %v5573_v58, 16  ;;  %v879_v2 = vshrl.u32 %v5581_v60, 16  ;;  %v882_v3 = vshll.u32 %v5581_v60, 16 }
  0x55   : > { %v5355_v62 = vld [vmem:[#allocation2 + $0x10] sm:$0xff]  ;;  %4234 = vmatmul.msk.bf16.vlgmr.msra.gmra.mxu2 %vm819_vm5, %v5569_v61  ;;  %4236 = vmatmul.msk.bf16.vlgmr.msra.gmra.mxu3 %vm819_vm5, %v5569_v61  ;;  %v989_v4 = vrot.slane %v987_v59, 1  ;;  %v5567_v18 = vunpack.c.h.b16 %v5569_v61  ;;  %v982_v24 = vpack.c.b16 %v979_v17, %v979_v17 }
  0x56   : > { %v992_v5 = vshll.u32 %v5355_v62, 16  ;;  %v873_v6 = vrot.slane %v871_v63, 3  ;;  %v876_v7 = vrot.slane %v874_v0, 4  ;;  %v881_v8 = vrot.slane %v879_v2, 3 }
  0x57   : > { %v884_v13 = vrot.slane %v882_v3, 4  ;;  %v990_v14 = vor.u32 %v989_v4, %v985_v1  ;;  %v868_v22 = vpack.c.b16 %v5567_v18, %v5567_v18  ;;  %v996_v27 = vshrl.u32 %v5355_v62, 16 }
  0x58   : > { %v994_v15 = vrot.slane %v992_v5, 1  ;;  %v877_v19 = vor.u32 %v876_v7, %v873_v6  ;;  %v1000_v28 = vshll.u32 %v982_v24, 16 }
  0x59   : > { %v885_v20 = vor.u32 %v884_v13, %v881_v8  ;;  %v888_v25 = vshrl.u32 %v868_v22, 16  ;;  %v891_v26 = vshll.u32 %v868_v22, 16 }
  0x5a   : > { %v995_v21 = vsel %vm983_vm6, %v990_v14, %v994_v15  ;;  %v998_v31 = vor.u32 %v996_v27, %v994_v15  ;;  %v1002_v32 = vrot.slane %v1000_v28, 1 }
  0x5b   : > { %v886_v23 = vsel %vm869_vm7, %v877_v19, %v885_v20  ;;  %v890_v29 = vrot.slane %v888_v25, 3  ;;  %v893_v30 = vrot.slane %v891_v26, 4 }
  0x5c   : > { %v1003_v34 = vsel %vm983_vm6, %v998_v31, %v1002_v32 }
  0x5d   : > { %v894_v33 = vor.u32 %v893_v30, %v890_v29 }
  0x5f   : > { %v895_v35 = vsel %vm869_vm7, %v885_v20, %v894_v33 }
  0x61   : > { %4285 = vmatmul.msk.bf16.vlgmr.msrb.gmra.mxu0 %vm819_vm5, %v995_v21  ;;  %4287 = vmatmul.msk.bf16.vlgmr.msrb.gmra.mxu1 %vm819_vm5, %v995_v21 }
  0x65   : > { %4253 = vmatmul.msk.bf16.vlgmr.msrb.gmra.mxu2 %vm819_vm5, %v886_v23  ;;  %4255 = vmatmul.msk.bf16.vlgmr.msrb.gmra.mxu3 %vm819_vm5, %v886_v23 }
  0x71   : > { %4286 = vmatmul.msk.bf16.gmra.mxu0 %vm819_vm5, %v1003_v34  ;;  %4288 = vmatmul.msk.bf16.gmra.mxu1 %vm819_vm5, %v1003_v34 }
  0x75   : > { %4254 = vmatmul.msk.bf16.gmra.mxu2 %vm819_vm5, %v895_v35  ;;  %4256 = vmatmul.msk.bf16.gmra.mxu3 %vm819_vm5, %v895_v35 }
  0xce   : > { %v835_v36 = vpop.f32.mrf.mxu0  ;;  %v854_v37 = vpop.f32.mrf.mxu1 }
  0xd6   : > { %v837_v40 = vpop.f32.mrf.mxu0  ;;  %v856_v41 = vpop.f32.mrf.mxu1 }
  0xd8   : > { %v840_v38 = vpop.f32.mrf.mxu2  ;;  %v859_v39 = vpop.f32.mrf.mxu3 }
  0xde   : > { %v1039_v44 = vpop.f32.mrf.mxu0  ;;  %v1058_v45 = vpop.f32.mrf.mxu1 }
  0xe0   : > { %v842_v42 = vpop.f32.mrf.mxu2  ;;  %v861_v43 = vpop.f32.mrf.mxu3 }
  0xe6   : > { %v1041_v60 = vpop.f32.mrf.mxu0  ;;  %v1060_v61 = vpop.f32.mrf.mxu1 }
  0xe8   : > { %v931_v47 = vpop.f32.mrf.mxu2  ;;  %v950_v49 = vpop.f32.mrf.mxu3 }
  0xe9   : > { %v932_v50 = vadd.f32 %v931_v47, %v835_v36  ;;  %v951_v52 = vadd.f32 %v950_v49, %v854_v37 }
  0xeb   : > { %v1068_v54 = vadd.f32 %v1039_v44, %v932_v50  ;;  %v1069_v56 = vadd.f32 %v1058_v45, %v951_v52 }
  0xed   : > { %v1082_v58 = vmul.f32 %v1078_v51, %v1068_v54  ;;  %v1083_v59 = vmul.f32 %v1079_v53, %v1069_v56 }
  0xee   : > { %v1044_v19 = vpop.f32.mrf.mxu0  ;;  %v1063_v20 = vpop.f32.mrf.mxu1 }
  0xef   : > { %v1097_v62 = vadd.f32 %v1093_v55, %v1082_v58  ;;  %v1098_v63 = vadd.f32 %v1094_v57, %v1083_v59 }
  0xf0   : > { %v933_v0 = vpop.f32.mrf.mxu2  ;;  %v952_v1 = vpop.f32.mrf.mxu3 }
  0xf1   : > { %v1105_v2 = vmax.f32 %v1097_v62, 0.0  ;;  %v1106_v3 = vmax.f32 %v1098_v63, 0.0  ;;  %v934_v4 = vadd.f32 %v933_v0, %v837_v40  ;;  %v953_v5 = vadd.f32 %v952_v1, %v856_v41 }
  0xf3   : > { %v1121_v6 = vsel %vm6053_vm0, %v1105_v2, 0.0  ;;  %v1122_v7 = vsel %vm6053_vm0, %v1106_v3, 0.0  ;;  %v1070_v8 = vadd.f32 %v1041_v60, %v934_v4  ;;  %v1071_v13 = vadd.f32 %v1060_v61, %v953_v5 }
  0xf4   : > { %v1129_v14 = vpack.c.bf16 %v1122_v7, %v1121_v6 }
  0xf5   : > { %v1084_v15 = vmul.f32 %v1078_v51, %v1070_v8  ;;  %v1085_v16 = vmul.f32 %v1079_v53, %v1071_v13 }
  0xf6   : > { %1133 = vst [vmem:[#allocation3 + $0x10] sm:$0xff] %v1129_v14  ;;  %v1046_v44 = vpop.f32.mrf.mxu0  ;;  %v1065_v45 = vpop.f32.mrf.mxu1 }
  0xf7   : > { %v1099_v17 = vadd.f32 %v1093_v55, %v1084_v15  ;;  %v1100_v18 = vadd.f32 %v1094_v57, %v1085_v16 }
  0xf8   : > { %v936_v21 = vpop.f32.mrf.mxu2  ;;  %v955_v22 = vpop.f32.mrf.mxu3 }
  0xf9   : > { %v1107_v23 = vmax.f32 %v1099_v17, 0.0  ;;  %v1108_v24 = vmax.f32 %v1100_v18, 0.0  ;;  %v937_v25 = vadd.f32 %v936_v21, %v840_v38  ;;  %v956_v26 = vadd.f32 %v955_v22, %v859_v39 }
  0xfb   : > { %v1123_v27 = vsel %vm6066_vm2, %v1107_v23, 0.0  ;;  %v1124_v28 = vsel %vm6066_vm2, %v1108_v24, 0.0  ;;  %v1072_v29 = vadd.f32 %v1044_v19, %v937_v25  ;;  %v1073_v30 = vadd.f32 %v1063_v20, %v956_v26 }
  0xfc   : > { %v1130_v31 = vpack.c.bf16 %v1124_v28, %v1123_v27 }
  0xfd   : > { %v1086_v32 = vmul.f32 %v1078_v51, %v1072_v29  ;;  %v1087_v33 = vmul.f32 %v1079_v53, %v1073_v30 }
  0xfe   : > { %1134 = vst [vmem:[#allocation3 + $0x18] sm:$0xff] %v1130_v31 }
  0xff   : > { %v1101_v34 = vadd.f32 %v1093_v55, %v1086_v32  ;;  %v1102_v35 = vadd.f32 %v1094_v57, %v1087_v33 }
 0x100   : > { %v938_v36 = vpop.f32.mrf.mxu2  ;;  %v957_v37 = vpop.f32.mrf.mxu3 }
 0x101   : > { %v1109_v40 = vmax.f32 %v1101_v34, 0.0  ;;  %v1110_v41 = vmax.f32 %v1102_v35, 0.0  ;;  %v939_v38 = vadd.f32 %v938_v36, %v842_v42  ;;  %v958_v39 = vadd.f32 %v957_v37, %v861_v43 }
 0x103   : > { %v1125_v46 = vsel %vm6062_vm1, %v1109_v40, 0.0  ;;  %v1126_v47 = vsel %vm6062_vm1, %v1110_v41, 0.0  ;;  %v1074_v48 = vadd.f32 %v1046_v44, %v939_v38  ;;  %v1075_v49 = vadd.f32 %v1065_v45, %v958_v39 }
 0x104   : > { %v1131_v50 = vpack.c.bf16 %v1126_v47, %v1125_v46 }
 0x105   : > { %v1088_v52 = vmul.f32 %v1078_v51, %v1074_v48  ;;  %v1089_v54 = vmul.f32 %v1079_v53, %v1075_v49 }
 0x106   : > { %1135 = vst [vmem:[#allocation3 + $0x20] sm:$0xff] %v1131_v50 }
 0x107   : > { %v1103_v56 = vadd.f32 %v1093_v55, %v1088_v52  ;;  %v1104_v58 = vadd.f32 %v1094_v57, %v1089_v54 }
 0x109   : > { %v1111_v59 = vmax.f32 %v1103_v56, 0.0  ;;  %v1112_v60 = vmax.f32 %v1104_v58, 0.0 }
 0x10b   : > { %v1127_v42 = vsel %vm6070_vm3, %v1111_v59, 0.0  ;;  %v1128_v43 = vsel %vm6070_vm3, %v1112_v60, 0.0 }
 0x10c   : > { %v1132_v61 = vpack.c.bf16 %v1128_v43, %v1127_v42 }
 0x10e   : > { %1136 = vst [vmem:[#allocation3 + $0x28] sm:$0xff] %v1132_v61 }
 0x10f PF: > { %p4290_p4 = scmp.le.s32.totalorder %s5851_s21, 0 }
 0x111   : > { %1140 = sbr.rel (%p4290_p4) target bundleno = 774 (0x306), region = 96 }
 0x116   : > { %v4381_v51 = vld [vmem:[%s6077_s30 + $0x170] sm:$0xf]  ;;  %v5407_v53 = vld [vmem:[%s6077_s30 + $0x174] sm:$0xf0]  ;;  %v5406_v63 = vld [vmem:[%s6077_s30 + $0x174] sm:$0xf] }
 0x117   : > { %v4445_v55 = vld [vmem:[%s6077_s30 + $0x1f0] sm:$0xf]  ;;  %v4382_v57 = vor.u32 %v5407_v53, %v4381_v51  ;;  %v5423_v62 = vld [vmem:[%s6077_s30 + $0x1f4] sm:$0xf0]  ;;  %v4383_v0 = vld [vmem:[%s6077_s30 + $0x178] sm:$0xf0] }
 0x118   : > { %v4446_v1 = vor.u32 %v5423_v62, %v4445_v55  ;;  %v4386_v2 = vor.u32 %v5406_v63, %v4383_v0  ;;  %v5422_v3 = vld [vmem:[%s6077_s30 + $0x1f4] sm:$0xf]  ;;  %v4447_v4 = vld [vmem:[%s6077_s30 + $0x1f8] sm:$0xf0]  ;;  %v4373_v5 = vld [vmem:[%s6077_s30 + $0x160] sm:$0xf] }
 0x119   : > { %1391 = vmatpush.bf16.msra.mxu0 %v4382_v57  ;;  %v4450_v6 = vor.u32 %v5422_v3, %v4447_v4  ;;  %v5405_v7 = vld [vmem:[%s6077_s30 + $0x164] sm:$0xf0]  ;;  %v4437_v8 = vld [vmem:[%s6077_s30 + $0x1e0] sm:$0xf]  ;;  %v5404_v16 = vld [vmem:[%s6077_s30 + $0x164] sm:$0xf] }
 0x11a   : > { %v5421_v13 = vld [vmem:[%s6077_s30 + $0x1e4] sm:$0xf0]  ;;  %1410 = vmatpush.bf16.msra.mxu1 %v4446_v1  ;;  %1429 = vmatpush.bf16.msra.mxu2 %v4386_v2  ;;  %v4374_v14 = vor.u32 %v5405_v7, %v4373_v5  ;;  %v4375_v17 = vld [vmem:[%s6077_s30 + $0x168] sm:$0xf0]  ;;  %v5420_v18 = vld [vmem:[%s6077_s30 + $0x1e4] sm:$0xf] }
 0x11b   : > { %v4438_v15 = vor.u32 %v5421_v13, %v4437_v8  ;;  %1448 = vmatpush.bf16.msra.mxu3 %v4450_v6  ;;  %v4378_v19 = vor.u32 %v5404_v16, %v4375_v17  ;;  %v4439_v20 = vld [vmem:[%s6077_s30 + $0x1e8] sm:$0xf0]  ;;  %v4365_v21 = vld [vmem:[%s6077_s30 + $0x150] sm:$0xf]  ;;  %v5403_v22 = vld [vmem:[%s6077_s30 + $0x154] sm:$0xf0] }
 0x11c   : > { %v4442_v23 = vor.u32 %v5420_v18, %v4439_v20  ;;  %v4429_v24 = vld [vmem:[%s6077_s30 + $0x1d0] sm:$0xf]  ;;  %v5419_v25 = vld [vmem:[%s6077_s30 + $0x1d4] sm:$0xf0]  ;;  %v5402_v26 = vld [vmem:[%s6077_s30 + $0x154] sm:$0xf]  ;;  %v4366_v27 = vor.u32 %v5403_v22, %v4365_v21 }
 0x11d   : > { %1392 = vmatpush.bf16.msra.mxu0 %v4374_v14  ;;  %v4367_v28 = vld [vmem:[%s6077_s30 + $0x158] sm:$0xf0]  ;;  %v5418_v29 = vld [vmem:[%s6077_s30 + $0x1d4] sm:$0xf]  ;;  %v4430_v31 = vor.u32 %v5419_v25, %v4429_v24  ;;  %v4357_v33 = vld [vmem:[%s6077_s30 + $0x140] sm:$0xf] }
 0x11e   : > { %v4431_v30 = vld [vmem:[%s6077_s30 + $0x1d8] sm:$0xf0]  ;;  %1411 = vmatpush.bf16.msra.mxu1 %v4438_v15  ;;  %1430 = vmatpush.bf16.msra.mxu2 %v4378_v19  ;;  %v4370_v32 = vor.u32 %v5402_v26, %v4367_v28  ;;  %v5401_v34 = vld [vmem:[%s6077_s30 + $0x144] sm:$0xf0]  ;;  %v4421_v35 = vld [vmem:[%s6077_s30 + $0x1c0] sm:$0xf] }
 0x11f   : > { %1449 = vmatpush.bf16.msra.mxu3 %v4442_v23  ;;  %v4434_v36 = vor.u32 %v5418_v29, %v4431_v30  ;;  %v5417_v37 = vld [vmem:[%s6077_s30 + $0x1c4] sm:$0xf0]  ;;  %v5400_v40 = vld [vmem:[%s6077_s30 + $0x144] sm:$0xf]  ;;  %v4359_v41 = vld [vmem:[%s6077_s30 + $0x148] sm:$0xf0]  ;;  %v4358_v44 = vor.u32 %v5401_v34, %v4357_v33 }
 0x120   : > { %v5416_v38 = vld [vmem:[%s6077_s30 + $0x1c4] sm:$0xf]  ;;  %v4423_v39 = vld [vmem:[%s6077_s30 + $0x1c8] sm:$0xf0]  ;;  %v4422_v45 = vor.u32 %v5417_v37, %v4421_v35  ;;  %v4362_v46 = vor.u32 %v5400_v40, %v4359_v41  ;;  %v4349_v47 = vld [vmem:[%s6077_s30 + $0x130] sm:$0xf] }
 0x121   : > { %1393 = vmatpush.bf16.msra.mxu0 %v4366_v27  ;;  %v5399_v48 = vld [vmem:[%s6077_s30 + $0x134] sm:$0xf0]  ;;  %v4413_v49 = vld [vmem:[%s6077_s30 + $0x1b0] sm:$0xf]  ;;  %v4426_v50 = vor.u32 %v5416_v38, %v4423_v39  ;;  %v5398_v54 = vld [vmem:[%s6077_s30 + $0x134] sm:$0xf] }
 0x122   : > { %1412 = vmatpush.bf16.msra.mxu1 %v4430_v31  ;;  %1431 = vmatpush.bf16.msra.mxu2 %v4370_v32  ;;  %v5415_v52 = vld [vmem:[%s6077_s30 + $0x1b4] sm:$0xf0]  ;;  %v4351_v56 = vld [vmem:[%s6077_s30 + $0x138] sm:$0xf0]  ;;  %v5414_v58 = vld [vmem:[%s6077_s30 + $0x1b4] sm:$0xf]  ;;  %v4350_v60 = vor.u32 %v5399_v48, %v4349_v47 }
 0x123   : > { %1450 = vmatpush.bf16.msra.mxu3 %v4434_v36  ;;  %v4415_v59 = vld [vmem:[%s6077_s30 + $0x1b8] sm:$0xf0]  ;;  %v4414_v42 = vor.u32 %v5415_v52, %v4413_v49  ;;  %v4354_v43 = vor.u32 %v5398_v54, %v4351_v56  ;;  %v4341_v61 = vld [vmem:[%s6077_s30 + $0x120] sm:$0xf]  ;;  %v5397_v51 = vld [vmem:[%s6077_s30 + $0x124] sm:$0xf0] }
 0x124   : > { %v4405_v53 = vld [vmem:[%s6077_s30 + $0x1a0] sm:$0xf]  ;;  %v4418_v55 = vor.u32 %v5414_v58, %v4415_v59  ;;  %v5413_v57 = vld [vmem:[%s6077_s30 + $0x1a4] sm:$0xf0]  ;;  %v5396_v62 = vld [vmem:[%s6077_s30 + $0x124] sm:$0xf]  ;;  %v4342_v2 = vor.u32 %v5397_v51, %v4341_v61 }
 0x125   : > { %1394 = vmatpush.bf16.msra.mxu0 %v4358_v44  ;;  %v4343_v63 = vld [vmem:[%s6077_s30 + $0x128] sm:$0xf0]  ;;  %v5412_v0 = vld [vmem:[%s6077_s30 + $0x1a4] sm:$0xf]  ;;  %v4406_v3 = vor.u32 %v5413_v57, %v4405_v53  ;;  %v4333_v5 = vld [vmem:[%s6077_s30 + $0x110] sm:$0xf] }
 0x126   : > { %1413 = vmatpush.bf16.msra.mxu1 %v4422_v45  ;;  %1432 = vmatpush.bf16.msra.mxu2 %v4362_v46  ;;  %v4407_v1 = vld [vmem:[%s6077_s30 + $0x1a8] sm:$0xf0]  ;;  %v4346_v4 = vor.u32 %v5396_v62, %v4343_v63  ;;  %v5395_v6 = vld [vmem:[%s6077_s30 + $0x114] sm:$0xf0]  ;;  %v4397_v7 = vld [vmem:[%s6077_s30 + $0x190] sm:$0xf] }
 0x127   : > { %1451 = vmatpush.bf16.msra.mxu3 %v4426_v50  ;;  %v4410_v8 = vor.u32 %v5412_v0, %v4407_v1  ;;  %v5411_v13 = vld [vmem:[%s6077_s30 + $0x194] sm:$0xf0]  ;;  %v5394_v14 = vld [vmem:[%s6077_s30 + $0x114] sm:$0xf]  ;;  %v4335_v15 = vld [vmem:[%s6077_s30 + $0x118] sm:$0xf0]  ;;  %v4334_v18 = vor.u32 %v5395_v6, %v4333_v5 }
 0x128   : > { %v5410_v16 = vld [vmem:[%s6077_s30 + $0x194] sm:$0xf]  ;;  %v4399_v17 = vld [vmem:[%s6077_s30 + $0x198] sm:$0xf0]  ;;  %v4325_v19 = vld [vmem:[%s6077_s30 + $0x100] sm:$0xf]  ;;  %v4398_v22 = vor.u32 %v5411_v13, %v4397_v7  ;;  %v4338_v23 = vor.u32 %v5394_v14, %v4335_v15 }
 0x129   : > { %1395 = vmatpush.bf16.msra.mxu0 %v4350_v60  ;;  %v6266_v20 = vld [vmem:[#allocation3 + $0x10] sm:$0xff]  ;;  %v6268_v21 = vld [vmem:[#allocation3 + $0x18] sm:$0xff]  ;;  %v5393_v24 = vld [vmem:[%s6077_s30 + $0x104] sm:$0xf0]  ;;  %v4402_v27 = vor.u32 %v5410_v16, %v4399_v17  ;;  %vm1476_vm8 = vsmask.f32 4352 }
 0x12a   : > { %1414 = vmatpush.bf16.msra.mxu1 %v4414_v42  ;;  %1433 = vmatpush.bf16.msra.mxu2 %v4354_v43  ;;  %v4389_v25 = vld [vmem:[%s6077_s30 + $0x180] sm:$0xf]  ;;  %v5409_v26 = vld [vmem:[%s6077_s30 + $0x184] sm:$0xf0]  ;;  %v5392_v28 = vld [vmem:[%s6077_s30 + $0x104] sm:$0xf]  ;;  %v1215_v32 = vunpack.c.l.b16 %v6266_v20  ;;  %v1217_v33 = vunpack.c.l.b16 %v6268_v21  ;;  %v4326_v36 = vor.u32 %v5393_v24, %v4325_v19  ;;  %v1216_v37 = vunpack.c.h.b16 %v6266_v20 }
 0x12b   : > { %1452 = vmatpush.bf16.msra.mxu3 %v4418_v55  ;;  %v4327_v29 = vld [vmem:[%s6077_s30 + $0x108] sm:$0xf0]  ;;  %v5408_v30 = vld [vmem:[%s6077_s30 + $0x184] sm:$0xf]  ;;  %v5374_v34 = vld [vmem:[%s6077_s30 + $0x74] sm:$0xf]  ;;  %v1218_v40 = vunpack.c.h.b16 %v6268_v21  ;;  %v4390_v39 = vor.u32 %v5409_v26, %v4389_v25 }
 0x12c   : > { %v4391_v31 = vld [vmem:[%s6077_s30 + $0x188] sm:$0xf0]  ;;  %v4511_v35 = vld [vmem:[%s6077_s30 + $0x78] sm:$0xf0]  ;;  %v5390_v41 = vld [vmem:[%s6077_s30 + $0xf4] sm:$0xf]  ;;  %v4330_v44 = vor.u32 %v5392_v28, %v4327_v29  ;;  %v1223_v52 = vpack.c.b16 %v1217_v33, %v1215_v32 }
 0x12d   : > { %1396 = vmatpush.bf16.msra.mxu0 %v4342_v2  ;;  %v4575_v38 = vld [vmem:[%s6077_s30 + $0xf8] sm:$0xf0]  ;;  %v1141_v45 = vld [vmem:[#allocation3 + $0x8] sm:$0x88]  ;;  %v4394_v46 = vor.u32 %v5408_v30, %v4391_v31  ;;  %v4514_v47 = vor.u32 %v5374_v34, %v4511_v35  ;;  %v4509_v48 = vld [vmem:[%s6077_s30 + $0x70] sm:$0xf]  ;;  %v1224_v60 = vpack.c.b16 %v1218_v40, %v1216_v37 }
 0x12e   : > { %1415 = vmatpush.bf16.msra.mxu1 %v4406_v3  ;;  %1434 = vmatpush.bf16.msra.mxu2 %v4346_v4  ;;  %v5375_v49 = vld [vmem:[%s6077_s30 + $0x74] sm:$0xf0]  ;;  %v4573_v50 = vld [vmem:[%s6077_s30 + $0xf0] sm:$0xf]  ;;  %v4578_v54 = vor.u32 %v5390_v41, %v4575_v38  ;;  %v5372_v58 = vld [vmem:[%s6077_s30 + $0x64] sm:$0xf]  ;;  %v1468_v61 = vunpack.c.l.b16 %v1141_v45  ;;  %v1469_v4 = vunpack.c.h.b16 %v1141_v45 }
 0x12f   : > { %1453 = vmatpush.bf16.msra.mxu3 %v4410_v8  ;;  %v5391_v56 = vld [vmem:[%s6077_s30 + $0xf4] sm:$0xf0]  ;;  %v4503_v59 = vld [vmem:[%s6077_s30 + $0x68] sm:$0xf0]  ;;  %v5388_v42 = vld [vmem:[%s6077_s30 + $0xe4] sm:$0xf]  ;;  %v4510_v51 = vor.u32 %v5375_v49, %v4509_v48 }
 0x130   : > { %v4567_v43 = vld [vmem:[%s6077_s30 + $0xe8] sm:$0xf0]  ;;  %v4574_v53 = vor.u32 %v5391_v56, %v4573_v50  ;;  %v4506_v55 = vor.u32 %v5372_v58, %v4503_v59  ;;  %v4501_v57 = vld [vmem:[%s6077_s30 + $0x60] sm:$0xf]  ;;  %v5373_v62 = vld [vmem:[%s6077_s30 + $0x64] sm:$0xf0]  ;;  %v1470_v7 = vpack.c.b16 %v1215_v32, %v1468_v61  ;;  %v6315_v25 = vpack.c.b16 %v1216_v37, %v1469_v4 }
 0x131   : > { %1397 = vmatpush.bf16.msra.mxu0 %v4334_v18  ;;  %v4565_v63 = vld [vmem:[%s6077_s30 + $0xe0] sm:$0xf]  ;;  %v4570_v0 = vor.u32 %v5388_v42, %v4567_v43  ;;  %v5389_v1 = vld [vmem:[%s6077_s30 + $0xe4] sm:$0xf0]  ;;  %v5370_v2 = vld [vmem:[%s6077_s30 + $0x54] sm:$0xf]  ;;  %v4502_v8 = vor.u32 %v5373_v62, %v4501_v57 }
 0x132   : > { %1416 = vmatpush.bf16.msra.mxu1 %v4398_v22  ;;  %1435 = vmatpush.bf16.msra.mxu2 %v4338_v23  ;;  %v4495_v3 = vld [vmem:[%s6077_s30 + $0x58] sm:$0xf0]  ;;  %v5386_v5 = vld [vmem:[%s6077_s30 + $0xd4] sm:$0xf]  ;;  %v4493_v13 = vld [vmem:[%s6077_s30 + $0x50] sm:$0xf]  ;;  %v4566_v14 = vor.u32 %v5389_v1, %v4565_v63 }
 0x133   : > { %1454 = vmatpush.bf16.msra.mxu3 %v4402_v27  ;;  %v4559_v6 = vld [vmem:[%s6077_s30 + $0xd8] sm:$0xf0]  ;;  %v4498_v15 = vor.u32 %v5370_v2, %v4495_v3  ;;  %v5371_v16 = vld [vmem:[%s6077_s30 + $0x54] sm:$0xf0]  ;;  %v4557_v17 = vld [vmem:[%s6077_s30 + $0xd0] sm:$0xf] }
 0x134   : > { %v5387_v18 = vld [vmem:[%s6077_s30 + $0xd4] sm:$0xf0]  ;;  %v4562_v19 = vor.u32 %v5386_v5, %v4559_v6  ;;  %v5368_v22 = vld [vmem:[%s6077_s30 + $0x44] sm:$0xf]  ;;  %v4487_v23 = vld [vmem:[%s6077_s30 + $0x48] sm:$0xf0]  ;;  %v4494_v31 = vor.u32 %v5371_v16, %v4493_v13 }
 0x135   : > { %1398 = vmatpush.bf16.msra.mxu0 %v4326_v36  ;;  %v1144_v24 = vld [vmem:[#allocation3 + $0x20] sm:$0xff]  ;;  %v4551_v27 = vld [vmem:[%s6077_s30 + $0xc8] sm:$0xf0]  ;;  %v1478_v29 = vshrl.u32 %v1470_v7, 16  ;;  %v1481_v30 = vshll.u32 %v1470_v7, 16  ;;  %v4558_v32 = vor.u32 %v5387_v18, %v4557_v17  ;;  %v4490_v34 = vor.u32 %v5368_v22, %v4487_v23 }
 0x136   : > { %1417 = vmatpush.bf16.msra.mxu1 %v4390_v39  ;;  %1436 = vmatpush.bf16.msra.mxu2 %v4330_v44  ;;  %v5384_v26 = vld [vmem:[%s6077_s30 + $0xc4] sm:$0xf]  ;;  %v1145_v28 = vld [vmem:[#allocation3 + $0x28] sm:$0xff]  ;;  %v4485_v35 = vld [vmem:[%s6077_s30 + $0x40] sm:$0xf]  ;;  %v1219_v37 = vunpack.c.l.b16 %v1144_v24  ;;  %v1220_v44 = vunpack.c.h.b16 %v1144_v24  ;;  %v1498_v48 = vshll.u32 %v6315_v25, 16 }
 0x137   : > { %1455 = vmatpush.bf16.msra.mxu3 %v4394_v46  ;;  %v5369_v20 = vld [vmem:[%s6077_s30 + $0x44] sm:$0xf0]  ;;  %v4549_v36 = vld [vmem:[%s6077_s30 + $0xc0] sm:$0xf]  ;;  %v4554_v41 = vor.u32 %v5384_v26, %v4551_v27  ;;  %v6323_v39 = vunpack.c.l.b16 %v1145_v28  ;;  %v5366_v45 = vld [vmem:[%s6077_s30 + $0x34] sm:$0xf]  ;;  %v6331_v50 = vunpack.c.h.b16 %v1145_v28 }
 0x138   : > { %1399 = vmatmul.bf16.vlgmr.msra.gmra.mxu0 %v1223_v52  ;;  %v5385_v38 = vld [vmem:[%s6077_s30 + $0xc4] sm:$0xf0]  ;;  %v4479_v46 = vld [vmem:[%s6077_s30 + $0x38] sm:$0xf0]  ;;  %v1472_v49 = vpack.c.b16 %v1219_v37, %v1217_v33  ;;  %v6335_v56 = vrot.slane %v1478_v29, 3  ;;  %v6337_v58 = vrot.slane %v1481_v30, 4  ;;  %v4486_v59 = vor.u32 %v5369_v20, %v4485_v35 }
 0x139   : > { %1418 = vmatmul.bf16.vlgmr.msra.gmra.mxu1 %v1224_v60  ;;  %1437 = vmatmul.bf16.vlgmr.msra.gmra.mxu2 %v1223_v52  ;;  %v5382_v52 = vld [vmem:[%s6077_s30 + $0xb4] sm:$0xf]  ;;  %v4550_v33 = vor.u32 %v5385_v38, %v4549_v36  ;;  %v4482_v42 = vor.u32 %v5366_v45, %v4479_v46  ;;  %v4477_v43 = vld [vmem:[%s6077_s30 + $0x30] sm:$0xf]  ;;  %v5367_v61 = vld [vmem:[%s6077_s30 + $0x34] sm:$0xf0] }
 0x13a   : > { %1731 = vmatpush.bf16.msrb.mxu2 %v4514_v47  ;;  %1456 = vmatmul.bf16.vlgmr.msra.gmra.mxu3 %v1224_v60  ;;  %v1495_v47 = vshrl.u32 %v6315_v25, 16  ;;  %v1473_v60 = vpack.c.b16 %v1220_v44, %v1218_v40  ;;  %v5383_v57 = vld [vmem:[%s6077_s30 + $0xb4] sm:$0xf0]  ;;  %v5364_v62 = vld [vmem:[%s6077_s30 + $0x24] sm:$0xf]  ;;  %v1486_v40 = vshrl.u32 %v1472_v49, 16  ;;  %v4478_v6 = vor.u32 %v5367_v61, %v4477_v43 }
 0x13b   : > { %1750 = vmatpush.bf16.msrb.mxu3 %v4578_v54  ;;  %1693 = vmatpush.bf16.msrb.mxu0 %v4510_v51  ;;  %v4543_v54 = vld [vmem:[%s6077_s30 + $0xb8] sm:$0xf0]  ;;  %v4541_v51 = vld [vmem:[%s6077_s30 + $0xb0] sm:$0xf]  ;;  %v4471_v63 = vld [vmem:[%s6077_s30 + $0x28] sm:$0xf0] }
 0x13c   : > { %1712 = vmatpush.bf16.msrb.mxu1 %v4574_v53  ;;  %v1225_v53 = vpack.c.b16 %v6323_v39, %v1219_v37  ;;  %v6348_v21 = vrot.slane %v1495_v47, 3  ;;  %v5380_v1 = vld [vmem:[%s6077_s30 + $0xa4] sm:$0xf]  ;;  %v4535_v2 = vld [vmem:[%s6077_s30 + $0xa8] sm:$0xf0]  ;;  %v1489_v3 = vshll.u32 %v1472_v49, 16  ;;  %v4542_v7 = vor.u32 %v5383_v57, %v4541_v51 }
 0x13d   : > { %v1503_v4 = vshrl.u32 %v1473_v60, 16  ;;  %v1506_v5 = vshll.u32 %v1473_v60, 16  ;;  %v4469_v13 = vld [vmem:[%s6077_s30 + $0x20] sm:$0xf]  ;;  %v4538_v16 = vor.u32 %v5380_v1, %v4535_v2  ;;  %v5381_v17 = vld [vmem:[%s6077_s30 + $0xa4] sm:$0xf0]  ;;  %v1484_v1 = vor.u32 %v6337_v58, %v6335_v56 }
 0x13e   : > { %1732 = vmatpush.bf16.msrb.mxu2 %v4506_v55  ;;  %v4546_v55 = vor.u32 %v5382_v52, %v4543_v54  ;;  %v5362_v18 = vld [vmem:[%s6077_s30 + $0x14] sm:$0xf]  ;;  %v6359_v22 = vrot.slane %v1498_v48, 4  ;;  %v1488_v23 = vrot.slane %v1486_v40, 3  ;;  %v4527_v25 = vld [vmem:[%s6077_s30 + $0x98] sm:$0xf0] }
 0x13f   : > { %1751 = vmatpush.bf16.msrb.mxu3 %v4570_v0  ;;  %1694 = vmatpush.bf16.msrb.mxu0 %v4502_v8  ;;  %v1226_v0 = vpack.c.b16 %v6331_v50, %v1220_v44  ;;  %v4474_v8 = vor.u32 %v5364_v62, %v4471_v63  ;;  %v5378_v24 = vld [vmem:[%s6077_s30 + $0x94] sm:$0xf]  ;;  %v1491_v26 = vrot.slane %v1489_v3, 4  ;;  %v1505_v27 = vrot.slane %v1503_v4, 3  ;;  %v4461_v30 = vld [vmem:[%s6077_s30 + $0x10] sm:$0xf] }
 0x140   : > { %1713 = vmatpush.bf16.msrb.mxu1 %v4566_v14  ;;  %v5365_v14 = vld [vmem:[%s6077_s30 + $0x24] sm:$0xf0]  ;;  %v1508_v28 = vrot.slane %v1506_v5, 4  ;;  %v4525_v35 = vld [vmem:[%s6077_s30 + $0x90] sm:$0xf]  ;;  %v4530_v36 = vor.u32 %v5378_v24, %v4527_v25  ;;  %v1501_v3 = vor.u32 %v6359_v22, %v6348_v21 }
 0x141   : > { %v4470_v29 = vor.u32 %v5365_v14, %v4469_v13  ;;  %v5379_v20 = vld [vmem:[%s6077_s30 + $0x94] sm:$0xf0]  ;;  %v5360_v37 = vld [vmem:[%s6077_s30 + $0x4] sm:$0xf]  ;;  %v4519_v44 = vld [vmem:[%s6077_s30 + $0x88] sm:$0xf0]  ;;  %v6387_v2 = vor.u32 %v1491_v26, %v1488_v23 }
 0x142   : > { %1733 = vmatpush.bf16.msrb.mxu2 %v4498_v15  ;;  %v4533_v15 = vld [vmem:[%s6077_s30 + $0xa0] sm:$0xf]  ;;  %v5376_v38 = vld [vmem:[%s6077_s30 + $0x84] sm:$0xf]  ;;  %v5442_v45 = vld [vmem:[%s6077_s30 + $0x274] sm:$0xf]  ;;  %v4526_v54 = vor.u32 %v5379_v20, %v4525_v35  ;;  %v6391_v5 = vor.u32 %v1508_v28, %v1505_v27 }
 0x143   : > { %1752 = vmatpush.bf16.msrb.mxu3 %v4562_v19  ;;  %1695 = vmatpush.bf16.msrb.mxu0 %v4494_v31  ;;  %v4463_v19 = vld [vmem:[%s6077_s30 + $0x18] sm:$0xf0]  ;;  %v4534_v31 = vor.u32 %v5381_v17, %v4533_v15  ;;  %v4453_v48 = vld [vmem:[%s6077_s30] sm:$0xf]  ;;  %v5458_v49 = vld [vmem:[%s6077_s30 + $0x2f4] sm:$0xf]  ;;  %v4522_v43 = vor.u32 %v5376_v38, %v4519_v44  ;;  %v1493_v22 = vsel %vm1476_vm8, %v1484_v1, %v6387_v2 }
 0x144   : > { %1714 = vmatpush.bf16.msrb.mxu1 %v4558_v32  ;;  %v4466_v32 = vor.u32 %v5362_v18, %v4463_v19  ;;  %v4687_v46 = vld [vmem:[%s6077_s30 + $0x278] sm:$0xf0]  ;;  %v5361_v60 = vld [vmem:[%s6077_s30 + $0x4] sm:$0xf0]  ;;  %v4685_v51 = vld [vmem:[%s6077_s30 + $0x270] sm:$0xf]  ;;  %v1474_v18 = vpack.c.b16 %v6323_v39, %v6323_v39  ;;  %v1475_v19 = vpack.c.b16 %v6331_v50, %v6331_v50  ;;  %v1510_v23 = vsel %vm1476_vm8, %v1501_v3, %v6391_v5 }
 0x145   : > { %v4751_v52 = vld [vmem:[%s6077_s30 + $0x2f8] sm:$0xf0]  ;;  %v4690_v61 = vor.u32 %v5442_v45, %v4687_v46  ;;  %v5459_v62 = vld [vmem:[%s6077_s30 + $0x2f4] sm:$0xf0]  ;;  %v5440_v63 = vld [vmem:[%s6077_s30 + $0x264] sm:$0xf] }
 0x146   : > { %1734 = vmatpush.bf16.msrb.mxu2 %v4490_v34  ;;  %v5363_v34 = vld [vmem:[%s6077_s30 + $0x14] sm:$0xf0]  ;;  %v4754_v57 = vor.u32 %v5458_v49, %v4751_v52  ;;  %v4679_v40 = vld [vmem:[%s6077_s30 + $0x268] sm:$0xf0]  ;;  %v4677_v13 = vld [vmem:[%s6077_s30 + $0x260] sm:$0xf] }
 0x147   : > { %1753 = vmatpush.bf16.msrb.mxu3 %v4554_v41  ;;  %1696 = vmatpush.bf16.msrb.mxu0 %v4486_v59  ;;  %v4455_v41 = vld [vmem:[%s6077_s30 + $0x8] sm:$0xf0]  ;;  %v4462_v47 = vor.u32 %v5363_v34, %v4461_v30  ;;  %v4682_v58 = vor.u32 %v5440_v63, %v4679_v40  ;;  %v5441_v14 = vld [vmem:[%s6077_s30 + $0x264] sm:$0xf0]  ;;  %v4741_v21 = vld [vmem:[%s6077_s30 + $0x2e0] sm:$0xf] }
 0x148   : > { %1715 = vmatpush.bf16.msrb.mxu1 %v4550_v33  ;;  %1404 = vmatmul.bf16.gmra.mxu0 %v1225_v53  ;;  %v4458_v59 = vor.u32 %v5360_v37, %v4455_v41  ;;  %v4517_v33 = vld [vmem:[%s6077_s30 + $0x80] sm:$0xf]  ;;  %v5457_v15 = vld [vmem:[%s6077_s30 + $0x2e4] sm:$0xf0]  ;;  %v4671_v17 = vld [vmem:[%s6077_s30 + $0x258] sm:$0xf0]  ;;  %v4678_v25 = vor.u32 %v5441_v14, %v4677_v13 }
 0x149   : > { %1423 = vmatmul.bf16.gmra.mxu1 %v1226_v0  ;;  %1442 = vmatmul.bf16.gmra.mxu2 %v1225_v53  ;;  %v5443_v53 = vld [vmem:[%s6077_s30 + $0x274] sm:$0xf0]  ;;  %v5454_v39 = vld [vmem:[%s6077_s30 + $0x2d4] sm:$0xf]  ;;  %v4735_v26 = vld [vmem:[%s6077_s30 + $0x2d8] sm:$0xf0]  ;;  %v4742_v50 = vor.u32 %v5457_v15, %v4741_v21 }
 0x14a   : > { %1735 = vmatpush.bf16.msrb.mxu2 %v4482_v42  ;;  %1461 = vmatmul.bf16.gmra.mxu3 %v1226_v0  ;;  %v5377_v42 = vld [vmem:[%s6077_s30 + $0x84] sm:$0xf0]  ;;  %v4454_v0 = vor.u32 %v5361_v60, %v4453_v48  ;;  %v4669_v28 = vld [vmem:[%s6077_s30 + $0x250] sm:$0xf]  ;;  %v4663_v34 = vld [vmem:[%s6077_s30 + $0x248] sm:$0xf0] }
 0x14b   : > { %1754 = vmatpush.bf16.msrb.mxu3 %v4546_v55  ;;  %1697 = vmatpush.bf16.msrb.mxu0 %v4478_v6  ;;  %v4749_v55 = vld [vmem:[%s6077_s30 + $0x2f0] sm:$0xf]  ;;  %v4518_v4 = vor.u32 %v5377_v42, %v4517_v33  ;;  %v4686_v6 = vor.u32 %v5443_v53, %v4685_v51  ;;  %v1512_v35 = vshrl.u32 %v1474_v18, 16  ;;  %v1515_v20 = vshll.u32 %v1474_v18, 16  ;;  %v5452_v41 = vld [vmem:[%s6077_s30 + $0x2c4] sm:$0xf] }
 0x14c   : > { %1716 = vmatpush.bf16.msrb.mxu1 %v4542_v7  ;;  %v5456_v7 = vld [vmem:[%s6077_s30 + $0x2e4] sm:$0xf]  ;;  %v4750_v56 = vor.u32 %v5459_v62, %v4749_v55  ;;  %v4733_v30 = vld [vmem:[%s6077_s30 + $0x2d0] sm:$0xf]  ;;  %v4727_v38 = vld [vmem:[%s6077_s30 + $0x2c8] sm:$0xf0] }
 0x14d   : > { %v1521_v44 = vshrl.u32 %v1475_v19, 16  ;;  %v1524_v45 = vshll.u32 %v1475_v19, 16  ;;  %v4661_v48 = vld [vmem:[%s6077_s30 + $0x240] sm:$0xf]  ;;  %v5437_v49 = vld [vmem:[%s6077_s30 + $0x244] sm:$0xf0] }
 0x14e   : > { %1736 = vmatpush.bf16.msrb.mxu2 %v4474_v8  ;;  %v4743_v8 = vld [vmem:[%s6077_s30 + $0x2e8] sm:$0xf0]  ;;  %v4725_v52 = vld [vmem:[%s6077_s30 + $0x2c0] sm:$0xf]  ;;  %v4655_v60 = vld [vmem:[%s6077_s30 + $0x238] sm:$0xf0] }
 0x14f   : > { %1755 = vmatpush.bf16.msrb.mxu3 %v4538_v16  ;;  %1698 = vmatpush.bf16.msrb.mxu0 %v4470_v29  ;;  %v5438_v16 = vld [vmem:[%s6077_s30 + $0x254] sm:$0xf]  ;;  %v4746_v24 = vor.u32 %v5456_v7, %v4743_v8  ;;  %v5439_v29 = vld [vmem:[%s6077_s30 + $0x254] sm:$0xf0]  ;;  %v1514_v33 = vrot.slane %v1512_v35, 3  ;;  %v1517_v42 = vrot.slane %v1515_v20, 4 }
 0x150   : > { %1717 = vmatpush.bf16.msrb.mxu1 %v4534_v31  ;;  %v4674_v27 = vor.u32 %v5438_v16, %v4671_v17  ;;  %v5455_v31 = vld [vmem:[%s6077_s30 + $0x2d4] sm:$0xf0]  ;;  %v4670_v37 = vor.u32 %v5439_v29, %v4669_v28  ;;  %v1523_v51 = vrot.slane %v1521_v44, 3  ;;  %v1526_v53 = vrot.slane %v1524_v45, 4  ;;  %v5450_v55 = vld [vmem:[%s6077_s30 + $0x2b4] sm:$0xf] }
 0x151   : > { %v4734_v46 = vor.u32 %v5455_v31, %v4733_v30  ;;  %v4653_v40 = vld [vmem:[%s6077_s30 + $0x230] sm:$0xf]  ;;  %v5451_v3 = vld [vmem:[%s6077_s30 + $0x2b4] sm:$0xf0]  ;;  %v1518_v7 = vor.u32 %v1517_v42, %v1514_v33  ;;  %v5448_v8 = vld [vmem:[%s6077_s30 + $0x2a4] sm:$0xf] }
 0x152   : > { %1737 = vmatpush.bf16.msrb.mxu2 %v4466_v32  ;;  %v5436_v32 = vld [vmem:[%s6077_s30 + $0x244] sm:$0xf]  ;;  %v4717_v1 = vld [vmem:[%s6077_s30 + $0x2b0] sm:$0xf]  ;;  %v1527_v13 = vor.u32 %v1526_v53, %v1523_v51  ;;  %v5433_v15 = vld [vmem:[%s6077_s30 + $0x224] sm:$0xf0] }
 0x153   : > { %1756 = vmatpush.bf16.msrb.mxu3 %v4530_v36  ;;  %1699 = vmatpush.bf16.msrb.mxu0 %v4462_v47  ;;  %v4738_v36 = vor.u32 %v5454_v39, %v4735_v26  ;;  %v4666_v47 = vor.u32 %v5436_v32, %v4663_v34  ;;  %v4613_v16 = vld [vmem:[#allocation3 + $0x10] sm:$0xf]  ;;  %v5425_v17 = vld [vmem:[#allocation3 + $0x14] sm:$0xf0]  ;;  %v4718_v18 = vor.u32 %v5451_v3, %v4717_v1  ;;  %v5430_v39 = vld [vmem:[%s6077_s30 + $0x214] sm:$0xf] }
 0x154   : > { %1718 = vmatpush.bf16.msrb.mxu1 %v4526_v54  ;;  %v5453_v54 = vld [vmem:[%s6077_s30 + $0x2c4] sm:$0xf0]  ;;  %v4639_v26 = vld [vmem:[%s6077_s30 + $0x218] sm:$0xf0]  ;;  %v5446_v28 = vld [vmem:[%s6077_s30 + $0x294] sm:$0xf]  ;;  %v4614_v31 = vor.u32 %v5425_v17, %v4613_v16  ;;  %v1528_v32 = vsel %vm1476_vm8, %v6391_v5, %v1527_v13 }
 0x155   : > { %v4726_v62 = vor.u32 %v5453_v54, %v4725_v52  ;;  %v4703_v29 = vld [vmem:[%s6077_s30 + $0x298] sm:$0xf0]  ;;  %v4637_v30 = vld [vmem:[%s6077_s30 + $0x210] sm:$0xf]  ;;  %v5431_v35 = vld [vmem:[%s6077_s30 + $0x214] sm:$0xf0] }
 0x156   : > { %1738 = vmatpush.bf16.msrb.mxu2 %v4458_v59  ;;  %v5434_v59 = vld [vmem:[%s6077_s30 + $0x234] sm:$0xf]  ;;  %v4621_v20 = vld [vmem:[#allocation3 + $0x20] sm:$0xf]  ;;  %v5426_v44 = vld [vmem:[#allocation3 + $0x24] sm:$0xf]  ;;  %v4706_v52 = vor.u32 %v5446_v28, %v4703_v29  ;;  %v4638_v54 = vor.u32 %v5431_v35, %v4637_v30 }
 0x157   : > { %1757 = vmatpush.bf16.msrb.mxu3 %v4522_v43  ;;  %1700 = vmatpush.bf16.msrb.mxu0 %v4454_v0  ;;  %v4730_v43 = vor.u32 %v5452_v41, %v4727_v38  ;;  %v4658_v63 = vor.u32 %v5434_v59, %v4655_v60  ;;  %v5435_v0 = vld [vmem:[%s6077_s30 + $0x234] sm:$0xf0]  ;;  %v4642_v41 = vor.u32 %v5430_v39, %v4639_v26  ;;  %v4701_v38 = vld [vmem:[%s6077_s30 + $0x290] sm:$0xf]  ;;  %v4623_v45 = vld [vmem:[#allocation3 + $0x28] sm:$0xf0] }
 0x158   : > { %1719 = vmatpush.bf16.msrb.mxu1 %v4518_v4  ;;  %v5432_v4 = vld [vmem:[%s6077_s30 + $0x224] sm:$0xf]  ;;  %v4654_v21 = vor.u32 %v5435_v0, %v4653_v40  ;;  %v5447_v5 = vld [vmem:[%s6077_s30 + $0x294] sm:$0xf0]  ;;  %v4695_v60 = vld [vmem:[%s6077_s30 + $0x288] sm:$0xf0]  ;;  %v4626_v33 = vor.u32 %v5426_v44, %v4623_v45 }
 0x159   : > { %1739 = vmatmul.bf16.vlgmr.msrb.gmra.mxu2 %v1493_v22  ;;  %v5444_v59 = vld [vmem:[%s6077_s30 + $0x284] sm:$0xf]  ;;  %v4629_v51 = vld [vmem:[%s6077_s30 + $0x200] sm:$0xf]  ;;  %v5429_v53 = vld [vmem:[%s6077_s30 + $0x204] sm:$0xf0] }
 0x15a   : > { %2071 = vmatpush.bf16.msra.mxu2 %v4690_v61  ;;  %1701 = vmatmul.bf16.vlgmr.msrb.gmra.mxu0 %v1493_v22  ;;  %v4662_v61 = vor.u32 %v5437_v49, %v4661_v48  ;;  %v4709_v22 = vld [vmem:[%s6077_s30 + $0x2a0] sm:$0xf]  ;;  %v1832_v49 = vshll.u32 %v4614_v31, 16  ;;  %v4630_v1 = vor.u32 %v5429_v53, %v4629_v51  ;;  %vm1828_vm9 = vsmask.f32 7424 }
 0x15b   : > { %2090 = vmatpush.bf16.msra.mxu3 %v4754_v57  ;;  %2033 = vmatpush.bf16.msra.mxu0 %v4686_v6  ;;  %v4719_v57 = vld [vmem:[%s6077_s30 + $0x2b8] sm:$0xf0]  ;;  %v4647_v6 = vld [vmem:[%s6077_s30 + $0x228] sm:$0xf0]  ;;  %v4910_v53 = vld [vmem:[%s6042_s24 + $0x1f0] sm:$0xf] }
 0x15c   : > { %2052 = vmatpush.bf16.msra.mxu1 %v4750_v56  ;;  %1758 = vmatmul.bf16.vlgmr.msrb.gmra.mxu3 %v1510_v23  ;;  %v4711_v56 = vld [vmem:[%s6077_s30 + $0x2a8] sm:$0xf0]  ;;  %v4722_v14 = vor.u32 %v5450_v55, %v4719_v57  ;;  %v4650_v19 = vor.u32 %v5432_v4, %v4647_v6  ;;  %v4693_v55 = vld [vmem:[%s6077_s30 + $0x280] sm:$0xf]  ;;  %v5445_v57 = vld [vmem:[%s6077_s30 + $0x284] sm:$0xf0] }
 0x15d   : > { %1720 = vmatmul.bf16.vlgmr.msrb.gmra.mxu1 %v1510_v23  ;;  %v5424_v23 = vld [vmem:[#allocation3 + $0x14] sm:$0xf]  ;;  %v1834_v40 = vrot.slane %v1832_v49, 1  ;;  %v1849_v6 = vshll.u32 %v4626_v33, 16  ;;  %v4848_v49 = vld [vmem:[%s6042_s24 + $0x178] sm:$0xf0] }
 0x15e   : > { %2072 = vmatpush.bf16.msra.mxu2 %v4682_v58  ;;  %v4645_v58 = vld [vmem:[%s6077_s30 + $0x220] sm:$0xf] }
 0x15f   : > { %2091 = vmatpush.bf16.msra.mxu3 %v4746_v24  ;;  %2034 = vmatpush.bf16.msra.mxu0 %v4678_v25  ;;  %v4615_v24 = vld [vmem:[#allocation3 + $0x18] sm:$0xf0]  ;;  %v5449_v25 = vld [vmem:[%s6077_s30 + $0x2a4] sm:$0xf0]  ;;  %v4646_v34 = vor.u32 %v5433_v15, %v4645_v58  ;;  %v1851_v13 = vrot.slane %v1849_v6, 1 }
 0x160   : > { %2053 = vmatpush.bf16.msra.mxu1 %v4742_v50  ;;  %v1519_v50 = vsel %vm1476_vm8, %v6387_v2, %v1518_v7  ;;  %v4710_v2 = vor.u32 %v5449_v25, %v4709_v22  ;;  %v4694_v7 = vor.u32 %v5445_v57, %v4693_v55  ;;  %v5523_v55 = vld [vmem:[%s6042_s24 + $0x1f4] sm:$0xf0]  ;;  %v4838_v6 = vld [vmem:[%s6042_s24 + $0x160] sm:$0xf] }
 0x161   : > { %v4911_v57 = vor.u32 %v5523_v55, %v4910_v53 }
 0x162   : > { %2073 = vmatpush.bf16.msra.mxu2 %v4674_v27  ;;  %v4714_v27 = vor.u32 %v5448_v8, %v4711_v56 }
 0x163   : > { %2092 = vmatpush.bf16.msra.mxu3 %v4738_v36  ;;  %2035 = vmatpush.bf16.msra.mxu0 %v4670_v37  ;;  %v5427_v36 = vld [vmem:[#allocation3 + $0x24] sm:$0xf0]  ;;  %v4618_v37 = vor.u32 %v5424_v23, %v4615_v24  ;;  %v1861_v24 = vshrl.u32 %v4626_v33, 16  ;;  %v4846_v33 = vld [vmem:[%s6042_s24 + $0x170] sm:$0xf] }
 0x164   : > { %2054 = vmatpush.bf16.msra.mxu1 %v4734_v46  ;;  %v5428_v46 = vld [vmem:[%s6077_s30 + $0x204] sm:$0xf]  ;;  %v4622_v48 = vor.u32 %v5427_v36, %v4621_v20 }
 0x165   : > { %v1844_v42 = vshll.u32 %v4618_v37, 16  ;;  %v1842_v3 = vshrl.u32 %v4618_v37, 16 }
 0x166   : > { %2074 = vmatpush.bf16.msra.mxu2 %v4666_v47  ;;  %v4631_v47 = vld [vmem:[%s6077_s30 + $0x208] sm:$0xf0]  ;;  %v1837_v0 = vshll.u32 %v4622_v48, 16  ;;  %v1853_v22 = vshrl.u32 %v4622_v48, 16  ;;  %v5506_v48 = vld [vmem:[%s6042_s24 + $0x174] sm:$0xf] }
 0x167   : > { %2093 = vmatpush.bf16.msra.mxu3 %v4730_v43  ;;  %2036 = vmatpush.bf16.msra.mxu0 %v4662_v61  ;;  %v4702_v43 = vor.u32 %v5447_v5, %v4701_v38  ;;  %v4634_v61 = vor.u32 %v5428_v46, %v4631_v47  ;;  %v1846_v4 = vrot.slane %v1844_v42, 1  ;;  %v5507_v42 = vld [vmem:[%s6042_s24 + $0x174] sm:$0xf0] }
 0x168   : > { %2055 = vmatpush.bf16.msra.mxu1 %v4726_v62  ;;  %v4698_v62 = vor.u32 %v5444_v59, %v4695_v60  ;;  %v1839_v56 = vrot.slane %v1837_v0, 1  ;;  %v4851_v59 = vor.u32 %v5506_v48, %v4848_v49  ;;  %v4912_v60 = vld [vmem:[%s6042_s24 + $0x1f8] sm:$0xf0]  ;;  %v4847_v51 = vor.u32 %v5507_v42, %v4846_v33  ;;  %v5516_v48 = vld [vmem:[%s6042_s24 + $0x1c4] sm:$0xf] }
 0x169   : > { %1744 = vmatmul.bf16.gmra.mxu2 %v1519_v50  ;;  %v1847_v58 = vor.u32 %v1846_v4, %v1842_v3  ;;  %v5501_v33 = vld [vmem:[%s6042_s24 + $0x144] sm:$0xf0]  ;;  %v4886_v42 = vld [vmem:[%s6042_s24 + $0x1c0] sm:$0xf] }
 0x16a   : > { %2075 = vmatpush.bf16.msra.mxu2 %v4658_v63  ;;  %1706 = vmatmul.bf16.gmra.mxu0 %v1519_v50  ;;  %v1830_v63 = vshrl.u32 %v4614_v31, 16  ;;  %v1855_v39 = vor.u32 %v1853_v22, %v1839_v56  ;;  %v1863_v50 = vor.u32 %v1861_v24, %v1851_v13  ;;  %v4830_v24 = vld [vmem:[%s6042_s24 + $0x150] sm:$0xf] }
 0x16b   : > { %2094 = vmatpush.bf16.msra.mxu3 %v4722_v14  ;;  %2037 = vmatpush.bf16.msra.mxu0 %v4654_v21  ;;  %v1773_v14 = vld [vmem:[#allocation3 + $0x30] sm:$0x11]  ;;  %v1852_v16 = vsel %vm1828_vm9, %v1847_v58, %v1851_v13  ;;  %v4902_v58 = vld [vmem:[%s6042_s24 + $0x1e0] sm:$0xf]  ;;  %v5521_v13 = vld [vmem:[%s6042_s24 + $0x1e4] sm:$0xf0] }
 0x16c   : > { %2056 = vmatpush.bf16.msra.mxu1 %v4718_v18  ;;  %1763 = vmatmul.bf16.gmra.mxu3 %v1528_v32  ;;  %v1835_v8 = vor.u32 %v1834_v40, %v1830_v63  ;;  %v1820_v15 = vunpack.c.l.b16 %v1773_v14  ;;  %v1821_v17 = vunpack.c.h.b16 %v1773_v14  ;;  %v4840_v63 = vld [vmem:[%s6042_s24 + $0x168] sm:$0xf0]  ;;  %v5520_v40 = vld [vmem:[%s6042_s24 + $0x1e4] sm:$0xf]  ;;  %v5502_v14 = vld [vmem:[%s6042_s24 + $0x154] sm:$0xf] }
 0x16d   : > { %1725 = vmatmul.bf16.gmra.mxu1 %v1528_v32 }
 0x16e   : > { %2076 = vmatpush.bf16.msra.mxu2 %v4650_v19  ;;  %v1840_v21 = vsel %vm1828_vm9, %v1835_v8, %v1839_v56  ;;  %v1826_v18 = vpack.c.b16 %v1820_v15, %v1820_v15  ;;  %v1827_v19 = vpack.c.b16 %v1821_v17, %v1821_v17  ;;  %v4903_v15 = vor.u32 %v5521_v13, %v4902_v58  ;;  %v5518_v17 = vld [vmem:[%s6042_s24 + $0x1d4] sm:$0xf] }
 0x16f   : > { %2095 = vmatpush.bf16.msra.mxu3 %v4714_v27  ;;  %2038 = vmatpush.bf16.msra.mxu0 %v4646_v34 }
 0x170   : > { %2057 = vmatpush.bf16.msra.mxu1 %v4710_v2  ;;  %v1857_v23 = vshll.u32 %v1826_v18, 16  ;;  %v1865_v25 = vshll.u32 %v1827_v19, 16  ;;  %v4896_v18 = vld [vmem:[%s6042_s24 + $0x1d8] sm:$0xf0] }
 0x172   : > { %2077 = vmatpush.bf16.msra.mxu2 %v4642_v41  ;;  %v1859_v26 = vrot.slane %v1857_v23, 1  ;;  %v1867_v27 = vrot.slane %v1865_v25, 1  ;;  %v4899_v23 = vor.u32 %v5518_v17, %v4896_v18  ;;  %v5503_v25 = vld [vmem:[%s6042_s24 + $0x154] sm:$0xf0]  ;;  %v5496_v17 = vld [vmem:[%s6042_s24 + $0x124] sm:$0xf] }
 0x173   : > { %2096 = vmatpush.bf16.msra.mxu3 %v4706_v52  ;;  %2039 = vmatpush.bf16.msra.mxu0 %v4638_v54  ;;  %v5522_v52 = vld [vmem:[%s6042_s24 + $0x1f4] sm:$0xf]  ;;  %v4808_v18 = vld [vmem:[%s6042_s24 + $0x128] sm:$0xf0] }
 0x174   : > { %2058 = vmatpush.bf16.msra.mxu1 %v4702_v43  ;;  %v1860_v28 = vsel %vm1828_vm9, %v1855_v39, %v1859_v26  ;;  %v1868_v29 = vsel %vm1828_vm9, %v1863_v50, %v1867_v27  ;;  %v4894_v39 = vld [vmem:[%s6042_s24 + $0x1d0] sm:$0xf]  ;;  %v4831_v26 = vor.u32 %v5503_v25, %v4830_v24  ;;  %v5519_v50 = vld [vmem:[%s6042_s24 + $0x1d4] sm:$0xf0]  ;;  %v4872_v24 = vld [vmem:[%s6042_s24 + $0x1a8] sm:$0xf0] }
 0x175   : > { %v4895_v27 = vor.u32 %v5519_v50, %v4894_v39  ;;  %v4806_v25 = vld [vmem:[%s6042_s24 + $0x120] sm:$0xf]  ;;  %v5497_v39 = vld [vmem:[%s6042_s24 + $0x124] sm:$0xf0] }
 0x176   : > { %2078 = vmatpush.bf16.msra.mxu2 %v4634_v61  ;;  %v4915_v61 = vor.u32 %v5522_v52, %v4912_v60  ;;  %v4888_v52 = vld [vmem:[%s6042_s24 + $0x1c8] sm:$0xf0]  ;;  %v4807_v50 = vor.u32 %v5497_v39, %v4806_v25 }
 0x177   : > { %2097 = vmatpush.bf16.msra.mxu3 %v4698_v62  ;;  %2040 = vmatpush.bf16.msra.mxu0 %v4630_v1  ;;  %v5504_v62 = vld [vmem:[%s6042_s24 + $0x164] sm:$0xf]  ;;  %v4904_v1 = vld [vmem:[%s6042_s24 + $0x1e8] sm:$0xf0]  ;;  %v4891_v60 = vor.u32 %v5516_v48, %v4888_v52  ;;  %v5494_v52 = vld [vmem:[%s6042_s24 + $0x114] sm:$0xf] }
 0x178   : > { %2059 = vmatpush.bf16.msra.mxu1 %v4694_v7  ;;  %v4843_v0 = vor.u32 %v5504_v62, %v4840_v63  ;;  %v4907_v4 = vor.u32 %v5520_v40, %v4904_v1  ;;  %v5505_v7 = vld [vmem:[%s6042_s24 + $0x164] sm:$0xf0]  ;;  %v5498_v62 = vld [vmem:[%s6042_s24 + $0x134] sm:$0xf]  ;;  %v4816_v63 = vld [vmem:[%s6042_s24 + $0x138] sm:$0xf0] }
 0x179   : > { %2079 = vmatmul.bf16.vlgmr.msra.gmra.mxu2 %v1840_v21  ;;  %v4839_v56 = vor.u32 %v5505_v7, %v4838_v6  ;;  %v5514_v40 = vld [vmem:[%s6042_s24 + $0x1b4] sm:$0xf]  ;;  %v4819_v1 = vor.u32 %v5498_v62, %v4816_v63  ;;  %v4814_v6 = vld [vmem:[%s6042_s24 + $0x130] sm:$0xf]  ;;  %v5499_v7 = vld [vmem:[%s6042_s24 + $0x134] sm:$0xf0] }
 0x17a   : > { %2041 = vmatmul.bf16.vlgmr.msra.gmra.mxu0 %v1840_v21  ;;  %2466 = vmatpush.bf16.msrb.mxu2 %v4851_v59  ;;  %v4822_v59 = vld [vmem:[%s6042_s24 + $0x140] sm:$0xf]  ;;  %v4815_v13 = vor.u32 %v5499_v7, %v4814_v6 }
 0x17b   : > { %2485 = vmatpush.bf16.msrb.mxu3 %v4915_v61  ;;  %2428 = vmatpush.bf16.msrb.mxu0 %v4847_v51  ;;  %v5517_v61 = vld [vmem:[%s6042_s24 + $0x1c4] sm:$0xf0]  ;;  %v4823_v53 = vor.u32 %v5501_v33, %v4822_v59  ;;  %v4800_v59 = vld [vmem:[%s6042_s24 + $0x118] sm:$0xf0] }
 0x17c   : > { %2098 = vmatmul.bf16.vlgmr.msra.gmra.mxu3 %v1852_v16  ;;  %2447 = vmatpush.bf16.msrb.mxu1 %v4911_v57  ;;  %v4887_v55 = vor.u32 %v5517_v61, %v4886_v42  ;;  %v4803_v42 = vor.u32 %v5494_v52, %v4800_v59  ;;  %v4864_v61 = vld [vmem:[%s6042_s24 + $0x198] sm:$0xf0]  ;;  %v5490_v52 = vld [vmem:[%s6042_s24 + $0xf4] sm:$0xf] }
 0x17d   : > { %2060 = vmatmul.bf16.vlgmr.msra.gmra.mxu1 %v1852_v16  ;;  %v4832_v16 = vld [vmem:[%s6042_s24 + $0x158] sm:$0xf0] }
 0x17e   : > { %2467 = vmatpush.bf16.msrb.mxu2 %v4843_v0  ;;  %v4835_v22 = vor.u32 %v5502_v14, %v4832_v16  ;;  %v4878_v14 = vld [vmem:[%s6042_s24 + $0x1b0] sm:$0xf] }
 0x17f   : > { %2486 = vmatpush.bf16.msrb.mxu3 %v4907_v4  ;;  %2429 = vmatpush.bf16.msrb.mxu0 %v4839_v56  ;;  %v4880_v4 = vld [vmem:[%s6042_s24 + $0x1b8] sm:$0xf0] }
 0x180   : > { %2448 = vmatpush.bf16.msrb.mxu1 %v4903_v15  ;;  %v4883_v58 = vor.u32 %v5514_v40, %v4880_v4  ;;  %v5515_v15 = vld [vmem:[%s6042_s24 + $0x1b4] sm:$0xf0] }
 0x181   : > { %v4879_v16 = vor.u32 %v5515_v15, %v4878_v14  ;;  %v5511_v4 = vld [vmem:[%s6042_s24 + $0x194] sm:$0xf0]  ;;  %v5508_v14 = vld [vmem:[%s6042_s24 + $0x184] sm:$0xf] }
 0x182   : > { %2468 = vmatpush.bf16.msrb.mxu2 %v4835_v22  ;;  %v5512_v22 = vld [vmem:[%s6042_s24 + $0x1a4] sm:$0xf] }
 0x183   : > { %2487 = vmatpush.bf16.msrb.mxu3 %v4899_v23  ;;  %2430 = vmatpush.bf16.msrb.mxu0 %v4831_v26  ;;  %v4811_v23 = vor.u32 %v5496_v17, %v4808_v18  ;;  %v4875_v26 = vor.u32 %v5512_v22, %v4872_v24  ;;  %v4790_v17 = vld [vmem:[%s6042_s24 + $0x100] sm:$0xf]  ;;  %v5493_v18 = vld [vmem:[%s6042_s24 + $0x104] sm:$0xf0] }
 0x184   : > { %2449 = vmatpush.bf16.msrb.mxu1 %v4895_v27  ;;  %v4870_v27 = vld [vmem:[%s6042_s24 + $0x1a0] sm:$0xf]  ;;  %v4791_v24 = vor.u32 %v5493_v18, %v4790_v17  ;;  %v5488_v17 = vld [vmem:[%s6042_s24 + $0xe4] sm:$0xf] }
 0x187   : > { %2488 = vmatpush.bf16.msrb.mxu3 %v4891_v60  ;;  %2431 = vmatpush.bf16.msrb.mxu0 %v4823_v53  ;;  %v5510_v60 = vld [vmem:[%s6042_s24 + $0x194] sm:$0xf]  ;;  %v4798_v53 = vld [vmem:[%s6042_s24 + $0x110] sm:$0xf] }
 0x188   : > { %2450 = vmatpush.bf16.msrb.mxu1 %v4887_v55  ;;  %v5495_v55 = vld [vmem:[%s6042_s24 + $0x114] sm:$0xf0]  ;;  %v4867_v63 = vor.u32 %v5510_v60, %v4864_v61 }
 0x189   : > { %2084 = vmatmul.bf16.gmra.mxu2 %v1860_v28  ;;  %v4799_v40 = vor.u32 %v5495_v55, %v4798_v53  ;;  %v5040_v53 = vld [vmem:[%s6042_s24 + $0xf8] sm:$0xf0]  ;;  %v4974_v55 = vld [vmem:[%s6042_s24 + $0x70] sm:$0xf] }
 0x18a   : > { %2046 = vmatmul.bf16.gmra.mxu0 %v1860_v28  ;;  %v5500_v28 = vld [vmem:[%s6042_s24 + $0x144] sm:$0xf] }
 0x18b   : > { %2489 = vmatpush.bf16.msrb.mxu3 %v4883_v58  ;;  %2432 = vmatpush.bf16.msrb.mxu0 %v4815_v13  ;;  %v5492_v58 = vld [vmem:[%s6042_s24 + $0x104] sm:$0xf]  ;;  %v4792_v13 = vld [vmem:[%s6042_s24 + $0x108] sm:$0xf0] }
 0x18c   : > { %2103 = vmatmul.bf16.gmra.mxu3 %v1868_v29  ;;  %2451 = vmatpush.bf16.msrb.mxu1 %v4879_v16  ;;  %v4795_v15 = vor.u32 %v5492_v58, %v4792_v13  ;;  %v4856_v16 = vld [vmem:[%s6042_s24 + $0x188] sm:$0xf0] }
 0x18d   : > { %2065 = vmatmul.bf16.gmra.mxu1 %v1868_v29  ;;  %v4824_v29 = vld [vmem:[%s6042_s24 + $0x148] sm:$0xf0] }
 0x18e   : > { %v4827_v49 = vor.u32 %v5500_v28, %v4824_v29  ;;  %v5513_v28 = vld [vmem:[%s6042_s24 + $0x1a4] sm:$0xf0] }
 0x18f   : > { %v4871_v48 = vor.u32 %v5513_v28, %v4870_v27  ;;  %2490 = vmatpush.bf16.msrb.mxu3 %v4875_v26  ;;  %2433 = vmatpush.bf16.msrb.mxu0 %v4807_v50  ;;  %v2117_v50 = vld [vmem:[%s6060_s22] ss:$4 sm:$0x3]  ;;  %v6596_v27 = vld [vmem:[%s6060_s22 + $0x1] ss:$4 sm:$0x3] }
 0x190   : > { %2469 = vmatpush.bf16.msrb.mxu2 %v4827_v49  ;;  %v5474_v28 = vld [vmem:[%s6042_s24 + $0x74] sm:$0xf] }
 0x191   : > { %2452 = vmatpush.bf16.msrb.mxu1 %v4871_v48  ;;  %v4976_v48 = vld [vmem:[%s6042_s24 + $0x78] sm:$0xf0] }
 0x192   : > { %v4979_v61 = vor.u32 %v5474_v28, %v4976_v48  ;;  %v6627_v48 = vperm.slane %v2117_v50, 1 }
 0x193   : > { %2491 = vmatpush.bf16.msrb.mxu3 %v4867_v63  ;;  %2434 = vmatpush.bf16.msrb.mxu0 %v4799_v40  ;;  %v5475_v63 = vld [vmem:[%s6042_s24 + $0x74] sm:$0xf0] }
 0x194   : > { %2470 = vmatpush.bf16.msrb.mxu2 %v4819_v1  ;;  %v4862_v1 = vld [vmem:[%s6042_s24 + $0x190] sm:$0xf] }
 0x195   : > { %v4863_v6 = vor.u32 %v5511_v4, %v4862_v1  ;;  %v6607_v1 = vperm.slane %v2117_v50, 0  ;;  %v5043_v4 = vor.u32 %v5490_v52, %v5040_v53  ;;  %v4960_v53 = vld [vmem:[%s6042_s24 + $0x58] sm:$0xf0]  ;;  %v5486_v50 = vld [vmem:[%s6042_s24 + $0xd4] sm:$0xf] }
 0x197   : > { %2453 = vmatpush.bf16.msrb.mxu1 %v4863_v6  ;;  %2435 = vmatpush.bf16.msrb.mxu0 %v4791_v24  ;;  %v4975_v6 = vor.u32 %v5475_v63, %v4974_v55 }
 0x198   : > { %2471 = vmatpush.bf16.msrb.mxu2 %v4811_v23  ;;  %v4859_v23 = vor.u32 %v5508_v14, %v4856_v16  ;;  %v4968_v16 = vld [vmem:[%s6042_s24 + $0x68] sm:$0xf0] }
 0x19a   : > { %2492 = vmatpush.bf16.msrb.mxu3 %v4859_v23  ;;  %v5473_v23 = vld [vmem:[%s6042_s24 + $0x64] sm:$0xf0] }
 0x19b   : > { %2729 = vmatpush.bf16.msra.mxu0 %v4975_v6  ;;  %v4958_v6 = vld [vmem:[%s6042_s24 + $0x50] sm:$0xf] }
 0x19c   : > { %2472 = vmatpush.bf16.msrb.mxu2 %v4803_v42 }
 0x19e   : > { %2786 = vmatpush.bf16.msra.mxu3 %v5043_v4  ;;  %v5024_v4 = vld [vmem:[%s6042_s24 + $0xd8] sm:$0xf0] }
 0x1a0   : > { %2473 = vmatpush.bf16.msrb.mxu2 %v4795_v15  ;;  %v5472_v15 = vld [vmem:[%s6042_s24 + $0x64] sm:$0xf] }
 0x1a4   : > { %2767 = vmatpush.bf16.msra.mxu2 %v4979_v61  ;;  %v5470_v61 = vld [vmem:[%s6042_s24 + $0x54] sm:$0xf] }
 0x1b5   : > { %v6463_v30 = vpop.f32.mrf.mxu0 }
 0x1b6   : > { %v6465_v31 = vpop.f32.mrf.mxu1 }
 0x1b7   : > { %v1420_v7 = vadd.f32 %v6465_v31, %v6463_v30  ;;  %v4854_v30 = vld [vmem:[%s6042_s24 + $0x180] sm:$0xf]  ;;  %v5509_v31 = vld [vmem:[%s6042_s24 + $0x184] sm:$0xf0] }
 0x1b8   : > { %v4855_v39 = vor.u32 %v5509_v31, %v4854_v30 }
 0x1ba   : > { %2454 = vmatpush.bf16.msrb.mxu1 %v4855_v39  ;;  %v5030_v39 = vld [vmem:[%s6042_s24 + $0xe0] sm:$0xf] }
 0x1bc   : > { %v6467_v32 = vpop.f32.mrf.mxu2 }
 0x1bd   : > { %v6469_v34 = vpop.f32.mrf.mxu3  ;;  %v6471_v35 = vpop.f32.mrf.mxu0 }
 0x1be   : > { %v6473_v20 = vpop.f32.mrf.mxu1  ;;  %v1458_v59 = vadd.f32 %v6469_v34, %v6467_v32  ;;  %v5491_v32 = vld [vmem:[%s6042_s24 + $0xf4] sm:$0xf0] }
 0x1bf   : > { %v1422_v34 = vadd.f32 %v6473_v20, %v6471_v35  ;;  %v4971_v35 = vor.u32 %v5472_v15, %v4968_v16  ;;  %v5032_v20 = vld [vmem:[%s6042_s24 + $0xe8] sm:$0xf0]  ;;  %v5487_v15 = vld [vmem:[%s6042_s24 + $0xd4] sm:$0xf0] }
 0x1c1   : > { %2768 = vmatpush.bf16.msra.mxu2 %v4971_v35  ;;  %v5468_v35 = vld [vmem:[%s6042_s24 + $0x44] sm:$0xf] }
 0x1c4   : > { %v6475_v36 = vpop.f32.mrf.mxu2 }
 0x1c5   : > { %v6477_v37 = vpop.f32.mrf.mxu3  ;;  %v6479_v2 = vpop.f32.mrf.mxu0 }
 0x1c6   : > { %v6481_v41 = vpop.f32.mrf.mxu1  ;;  %v1460_v55 = vadd.f32 %v6477_v37, %v6475_v36 }
 0x1c7   : > { %v1425_v36 = vadd.f32 %v6481_v41, %v6479_v2 }
 0x1cc   : > { %v6483_v38 = vpop.f32.mrf.mxu2 }
 0x1cd   : > { %v6485_v44 = vpop.f32.mrf.mxu3  ;;  %v6487_v45 = vpop.f32.mrf.mxu0 }
 0x1ce   : > { %v6489_v5 = vpop.f32.mrf.mxu1 }
 0x1d4   : > { %v6491_v46 = vpop.f32.mrf.mxu2 }
 0x1d5   : > { %v6493_v47 = vpop.f32.mrf.mxu3 }
 0x1d7   : > { %v6498_v54 = vpop.f32.mrf.mxu0 }
 0x1d8   : > { %v1703_v22 = vadd.f32 %v6498_v54, %v1420_v7  ;;  %v5038_v7 = vld [vmem:[%s6042_s24 + $0xf0] sm:$0xf] }
 0x1d9   : > { %v5039_v58 = vor.u32 %v5491_v32, %v5038_v7  ;;  %v5471_v7 = vld [vmem:[%s6042_s24 + $0x54] sm:$0xf0] }
 0x1da   : > { %v6503_v43 = vpop.f32.mrf.mxu1  ;;  %v4959_v37 = vor.u32 %v5471_v7, %v4958_v6  ;;  %v4942_v6 = vld [vmem:[%s6042_s24 + $0x30] sm:$0xf] }
 0x1db   : > { %v1722_v60 = vadd.f32 %v6503_v43, %v1703_v22  ;;  %v6614_v43 = vperm.slane %v6596_v27, 0  ;;  %2748 = vmatpush.bf16.msra.mxu1 %v5039_v58  ;;  %v4966_v22 = vld [vmem:[%s6042_s24 + $0x60] sm:$0xf] }
 0x1dc   : > { %v6511_v3 = vpop.f32.mrf.mxu2  ;;  %v4967_v31 = vor.u32 %v5473_v23, %v4966_v22  ;;  %v5484_v22 = vld [vmem:[%s6042_s24 + $0xc4] sm:$0xf]  ;;  %v5016_v23 = vld [vmem:[%s6042_s24 + $0xc8] sm:$0xf0] }
 0x1dd   : > { %v1741_v13 = vadd.f32 %v6511_v3, %v1458_v59  ;;  %v5035_v3 = vor.u32 %v5488_v17, %v5032_v20  ;;  %v4952_v20 = vld [vmem:[%s6042_s24 + $0x48] sm:$0xf0] }
 0x1de   : > { %2730 = vmatpush.bf16.msra.mxu0 %v4967_v31  ;;  %v4955_v41 = vor.u32 %v5468_v35, %v4952_v20  ;;  %v5019_v31 = vor.u32 %v5484_v22, %v5016_v23  ;;  %v5480_v20 = vld [vmem:[%s6042_s24 + $0xa4] sm:$0xf]  ;;  %v4934_v23 = vld [vmem:[%s6042_s24 + $0x20] sm:$0xf] }
 0x1df   : > { %v6515_v8 = vpop.f32.mrf.mxu3  ;;  %v6520_v21 = vpop.f32.mrf.mxu0  ;;  %2787 = vmatpush.bf16.msra.mxu3 %v5035_v3 }
 0x1e0   : > { %v1705_v18 = vadd.f32 %v6520_v21, %v1422_v34  ;;  %v1760_v52 = vadd.f32 %v6515_v8, %v1741_v13  ;;  %v4963_v8 = vor.u32 %v5470_v61, %v4960_v53  ;;  %v6643_v34 = vperm.slane %v6596_v27, 1 }
 0x1e1   : > { %v5027_v13 = vor.u32 %v5486_v50, %v5024_v4  ;;  %v5008_v4 = vld [vmem:[%s6042_s24 + $0xb8] sm:$0xf0] }
 0x1e2   : > { %v6525_v19 = vpop.f32.mrf.mxu1  ;;  %2769 = vmatpush.bf16.msra.mxu2 %v4963_v8  ;;  %2731 = vmatpush.bf16.msra.mxu0 %v4959_v37  ;;  %v5482_v8 = vld [vmem:[%s6042_s24 + $0xb4] sm:$0xf]  ;;  %v5483_v37 = vld [vmem:[%s6042_s24 + $0xb4] sm:$0xf0] }
 0x1e3   : > { %v1724_v63 = vadd.f32 %v6525_v19, %v1705_v18  ;;  %2788 = vmatpush.bf16.msra.mxu3 %v5027_v13 }
 0x1e4   : > { %v6539_v51 = vpop.f32.mrf.mxu2 }
 0x1e5   : > { %v1743_v16 = vadd.f32 %v6539_v51, %v1460_v55  ;;  %v5466_v55 = vld [vmem:[%s6042_s24 + $0x34] sm:$0xf] }
 0x1e6   : > { %2770 = vmatpush.bf16.msra.mxu2 %v4955_v41 }
 0x1e7   : > { %v6541_v57 = vpop.f32.mrf.mxu3  ;;  %v6546_v0 = vpop.f32.mrf.mxu0  ;;  %2789 = vmatpush.bf16.msra.mxu3 %v5019_v31 }
 0x1e8   : > { %v1708_v2 = vadd.f32 %v6546_v0, %v1425_v36  ;;  %v1463_v0 = vadd.f32 %v6485_v44, %v6483_v38  ;;  %v1427_v38 = vadd.f32 %v6489_v5, %v6487_v45  ;;  %v5467_v5 = vld [vmem:[%s6042_s24 + $0x34] sm:$0xf0] }
 0x1e9   : > { %v4943_v36 = vor.u32 %v5467_v5, %v4942_v6 }
 0x1ea   : > { %v6551_v56 = vpop.f32.mrf.mxu1 }
 0x1eb   : > { %v1727_v44 = vadd.f32 %v6551_v56, %v1708_v2  ;;  %v5006_v56 = vld [vmem:[%s6042_s24 + $0xb0] sm:$0xf]  ;;  %v5000_v2 = vld [vmem:[%s6042_s24 + $0xa8] sm:$0xf0] }
 0x1ec   : > { %v6563_v29 = vpop.f32.mrf.mxu2  ;;  %v5007_v35 = vor.u32 %v5483_v37, %v5006_v56  ;;  %v5003_v22 = vor.u32 %v5480_v20, %v5000_v2  ;;  %v4982_v2 = vld [vmem:[%s6042_s24 + $0x80] sm:$0xf] }
 0x1ed   : > { %v1746_v13 = vadd.f32 %v6563_v29, %v1463_v0 }
 0x1ef   : > { %v6565_v49 = vpop.f32.mrf.mxu3  ;;  %v6570_v33 = vpop.f32.mrf.mxu0 }
 0x1f0   : > { %v1710_v29 = vadd.f32 %v6570_v33, %v1427_v38  ;;  %v5481_v33 = vld [vmem:[%s6042_s24 + $0xa4] sm:$0xf0]  ;;  %v1765_v0 = vadd.f32 %v6565_v49, %v1746_v13  ;;  %v4926_v38 = vld [vmem:[%s6042_s24 + $0x10] sm:$0xf]  ;;  %v5476_v13 = vld [vmem:[%s6042_s24 + $0x84] sm:$0xf] }
 0x1f2   : > { %v6575_v62 = vpop.f32.mrf.mxu1 }
 0x1f4   : > { %v6590_v25 = vpop.f32.mrf.mxu2 }
 0x1f7   : > { %v6592_v26 = vpop.f32.mrf.mxu3  ;;  %v2042_v54 = vpop.f32.mrf.mxu0 }
 0x1fa   : > { %v2061_v42 = vpop.f32.mrf.mxu1 }
 0x1fb   : > { %v2062_v40 = vadd.f32 %v2061_v42, %v2042_v54  ;;  %v5489_v54 = vld [vmem:[%s6042_s24 + $0xe4] sm:$0xf0] }
 0x1fc   : > { %v2080_v30 = vpop.f32.mrf.mxu2  ;;  %v5031_v21 = vor.u32 %v5489_v54, %v5030_v39  ;;  %v5469_v39 = vld [vmem:[%s6042_s24 + $0x44] sm:$0xf0]  ;;  %v5014_v54 = vld [vmem:[%s6042_s24 + $0xc0] sm:$0xf] }
 0x1fd   : > { %v2109_v14 = vadd.f32 %v2062_v40, %v1722_v60 }
 0x1fe   : > { %2749 = vmatpush.bf16.msra.mxu1 %v5031_v21 }
 0x1ff   : > { %v2123_v24 = vmul.f32 %v6607_v1, %v2109_v14  ;;  %v2099_v28 = vpop.f32.mrf.mxu3  ;;  %v2044_v42 = vpop.f32.mrf.mxu0  ;;  %v5022_v14 = vld [vmem:[%s6042_s24 + $0xd0] sm:$0xf] }
 0x200   : > { %v2100_v60 = vadd.f32 %v2099_v28, %v2080_v30  ;;  %v5023_v19 = vor.u32 %v5487_v15, %v5022_v14  ;;  %v5485_v28 = vld [vmem:[%s6042_s24 + $0xc4] sm:$0xf0]  ;;  %v5011_v15 = vor.u32 %v5482_v8, %v5008_v4  ;;  %v5479_v8 = vld [vmem:[%s6042_s24 + $0x94] sm:$0xf0]  ;;  %v5460_v4 = vld [vmem:[%s6042_s24 + $0x4] sm:$0xf] }
 0x201   : > { %v6631_v59 = vadd.f32 %v6614_v43, %v2123_v24  ;;  %v4950_v24 = vld [vmem:[%s6042_s24 + $0x40] sm:$0xf] }
 0x202   : > { %v2063_v40 = vpop.f32.mrf.mxu1  ;;  %v2110_v32 = vadd.f32 %v2100_v60, %v1760_v52  ;;  %2750 = vmatpush.bf16.msra.mxu1 %v5023_v19  ;;  %v4951_v52 = vor.u32 %v5469_v39, %v4950_v24  ;;  %v1762_v60 = vadd.f32 %v6541_v57, %v1743_v16  ;;  %v5464_v19 = vld [vmem:[%s6042_s24 + $0x24] sm:$0xf]  ;;  %v4936_v16 = vld [vmem:[%s6042_s24 + $0x28] sm:$0xf0]  ;;  %2790 = vmatpush.bf16.msra.mxu3 %v5011_v15  ;;  %v5465_v24 = vld [vmem:[%s6042_s24 + $0x24] sm:$0xf0] }
 0x203   : > { %v2064_v58 = vadd.f32 %v2063_v40, %v2044_v42  ;;  %v2146_v17 = vmax.f32 %v6631_v59, 0.0  ;;  %v5015_v59 = vor.u32 %v5485_v28, %v5014_v54  ;;  %v4939_v41 = vor.u32 %v5464_v19, %v4936_v16  ;;  %v4998_v39 = vld [vmem:[%s6042_s24 + $0xa0] sm:$0xf]  ;;  %v5462_v54 = vld [vmem:[%s6042_s24 + $0x14] sm:$0xf] }
 0x204   : > { %v2124_v27 = vmul.f32 %v6627_v48, %v2110_v32  ;;  %v2082_v3 = vpop.f32.mrf.mxu2  ;;  %2732 = vmatpush.bf16.msra.mxu0 %v4951_v52  ;;  %v4935_v31 = vor.u32 %v5465_v24, %v4934_v23  ;;  %v1465_v28 = vadd.f32 %v6493_v47, %v6491_v46  ;;  %v4999_v52 = vor.u32 %v5481_v33, %v4998_v39  ;;  %v5463_v46 = vld [vmem:[%s6042_s24 + $0x14] sm:$0xf0]  ;;  %v4984_v19 = vld [vmem:[%s6042_s24 + $0x88] sm:$0xf0]  ;;  %v4918_v16 = vld [vmem:[%s6042_s24] sm:$0xf] }
 0x205   : > { %v2111_v18 = vadd.f32 %v2064_v58, %v1724_v63  ;;  %v4944_v63 = vld [vmem:[%s6042_s24 + $0x38] sm:$0xf0]  ;;  %v2162_v7 = vsel %vm6053_vm0, %v2146_v17, 0.0  ;;  %v1729_v47 = vadd.f32 %v6575_v62, %v1710_v29  ;;  %v4920_v62 = vld [vmem:[%s6042_s24 + $0x8] sm:$0xf0] }
 0x206   : > { %v2139_v51 = vadd.f32 %v6643_v34, %v2124_v27  ;;  %2751 = vmatpush.bf16.msra.mxu1 %v5015_v59  ;;  %v4947_v57 = vor.u32 %v5466_v55, %v4944_v63  ;;  %v4928_v59 = vld [vmem:[%s6042_s24 + $0x18] sm:$0xf0]  ;;  %2791 = vmatpush.bf16.msra.mxu3 %v5003_v22  ;;  %v4923_v56 = vor.u32 %v5460_v4, %v4920_v62 }
 0x207   : > { %v2125_v30 = vmul.f32 %v6607_v1, %v2111_v18  ;;  %v2101_v21 = vpop.f32.mrf.mxu3  ;;  %v2047_v50 = vpop.f32.mrf.mxu0  ;;  %v4931_v63 = vor.u32 %v5462_v54, %v4928_v59  ;;  %v1748_v15 = vadd.f32 %v6590_v25, %v1465_v28  ;;  %v5477_v25 = vld [vmem:[%s6042_s24 + $0x84] sm:$0xf0]  ;;  %v5152_v59 = vld [vmem:[%s6042_s24 + $0x278] sm:$0xf0] }
 0x208   : > { %v2147_v42 = vmax.f32 %v2139_v51, 0.0  ;;  %v2102_v53 = vadd.f32 %v2101_v21, %v2082_v3  ;;  %2771 = vmatpush.bf16.msra.mxu2 %v4947_v57  ;;  %2733 = vmatpush.bf16.msra.mxu0 %v4943_v36  ;;  %v4990_v57 = vld [vmem:[%s6042_s24 + $0x90] sm:$0xf]  ;;  %v2178_v54 = vld [vmem:[#allocation4 + $0x8] sm:$0x88] }
 0x209   : > { %v2140_v61 = vadd.f32 %v6614_v43, %v2125_v30  ;;  %v4991_v5 = vor.u32 %v5479_v8, %v4990_v57  ;;  %v5559_v57 = vld [vmem:[%s6042_s24 + $0x2f4] sm:$0xf0]  ;;  %v5540_v8 = vld [vmem:[%s6042_s24 + $0x264] sm:$0xf] }
 0x20a   : > { %v2066_v40 = vpop.f32.mrf.mxu1  ;;  %v2163_v32 = vsel %vm6053_vm0, %v2147_v42, 0.0  ;;  %v2112_v58 = vadd.f32 %v2102_v53, %v1762_v60  ;;  %2752 = vmatpush.bf16.msra.mxu1 %v5007_v35  ;;  %v5478_v60 = vld [vmem:[%s6042_s24 + $0x94] sm:$0xf]  ;;  %v4992_v42 = vld [vmem:[%s6042_s24 + $0x98] sm:$0xf0] }
 0x20b   : > { %v2067_v45 = vadd.f32 %v2066_v40, %v2047_v50  ;;  %v6682_v14 = vpack.c.bf16 %v2163_v32, %v2162_v7  ;;  %v2148_v17 = vmax.f32 %v2140_v61, 0.0  ;;  %v4927_v40 = vor.u32 %v5463_v46, %v4926_v38  ;;  %v5543_v46 = vld [vmem:[%s6042_s24 + $0x274] sm:$0xf0] }
 0x20c   : > { %v2126_v27 = vmul.f32 %v6627_v48, %v2112_v58  ;;  %v2085_v3 = vpop.f32.mrf.mxu2  ;;  %2772 = vmatpush.bf16.msra.mxu2 %v4939_v41  ;;  %2734 = vmatpush.bf16.msra.mxu0 %v4935_v31  ;;  %v1767_v31 = vadd.f32 %v6592_v26, %v1748_v15  ;;  %v5542_v26 = vld [vmem:[%s6042_s24 + $0x274] sm:$0xf]  ;;  %v5541_v15 = vld [vmem:[%s6042_s24 + $0x264] sm:$0xf0] }
 0x20d   : > { %v2113_v18 = vadd.f32 %v2067_v45, %v1727_v44  ;;  %2174 = vst [vmem:[#allocation4 + $0x10] sm:$0xff] %v6682_v14  ;;  %v2164_v61 = vsel %vm6066_vm2, %v2148_v17, 0.0  ;;  %v4995_v44 = vor.u32 %v5478_v60, %v4992_v42  ;;  %v5461_v17 = vld [vmem:[%s6042_s24 + $0x4] sm:$0xf0]  ;;  %v2253_v35 = vunpack.c.h.b16 %v6682_v14 }
 0x20e   : > { %v2141_v51 = vadd.f32 %v6643_v34, %v2126_v27  ;;  %2753 = vmatpush.bf16.msra.mxu1 %v4999_v52  ;;  %v2252_v27 = vunpack.c.l.b16 %v6682_v14  ;;  %v2506_v42 = vunpack.c.h.b16 %v2178_v54 }
 0x20f   : > { %v2127_v30 = vmul.f32 %v6607_v1, %v2113_v18  ;;  %v2104_v21 = vpop.f32.mrf.mxu3  ;;  %v2049_v55 = vpop.f32.mrf.mxu0  ;;  %2792 = vmatpush.bf16.msra.mxu3 %v4995_v44 }
 0x210   : > { %v2149_v53 = vmax.f32 %v2141_v51, 0.0  ;;  %v2105_v50 = vadd.f32 %v2104_v21, %v2085_v3  ;;  %2773 = vmatpush.bf16.msra.mxu2 %v4931_v63  ;;  %2735 = vmatpush.bf16.msra.mxu0 %v4927_v40  ;;  %v4919_v3 = vor.u32 %v5461_v17, %v4918_v16  ;;  %v5155_v63 = vor.u32 %v5542_v26, %v5152_v59  ;;  %v5557_v17 = vld [vmem:[%s6042_s24 + $0x2e4] sm:$0xf0]  ;;  %v5128_v59 = vld [vmem:[%s6042_s24 + $0x248] sm:$0xf0] }
 0x211   : > { %v2142_v7 = vadd.f32 %v6614_v43, %v2127_v30  ;;  %v4987_v30 = vor.u32 %v5476_v13, %v4984_v19  ;;  %v6764_v62 = vpack.c.b16 %v2253_v35, %v2506_v42  ;;  %v5142_v13 = vld [vmem:[%s6042_s24 + $0x260] sm:$0xf] }
 0x212   : > { %v2068_v49 = vpop.f32.mrf.mxu1  ;;  %v2165_v6 = vsel %vm6066_vm2, %v2149_v53, 0.0  ;;  %v2114_v32 = vadd.f32 %v2105_v50, %v1765_v0  ;;  %2754 = vmatpush.bf16.msra.mxu1 %v4991_v5  ;;  %v5216_v53 = vld [vmem:[%s6042_s24 + $0x2f8] sm:$0xf0]  ;;  %v5150_v50 = vld [vmem:[%s6042_s24 + $0x270] sm:$0xf]  ;;  %v5143_v16 = vor.u32 %v5541_v15, %v5142_v13 }
 0x213   : > { %v2069_v58 = vadd.f32 %v2068_v49, %v2049_v55  ;;  %v6717_v45 = vpack.c.bf16 %v2165_v6, %v2164_v61  ;;  %v2150_v29 = vmax.f32 %v2142_v7, 0.0  ;;  %2793 = vmatpush.bf16.msra.mxu3 %v4987_v30  ;;  %v5558_v61 = vld [vmem:[%s6042_s24 + $0x2f4] sm:$0xf]  ;;  %v5151_v40 = vor.u32 %v5543_v46, %v5150_v50  ;;  %v5144_v6 = vld [vmem:[%s6042_s24 + $0x268] sm:$0xf0] }
 0x214   : > { %v2128_v36 = vmul.f32 %v6627_v48, %v2114_v32  ;;  %v2087_v23 = vpop.f32.mrf.mxu2  ;;  %2774 = vmatpush.bf16.msra.mxu2 %v4923_v56  ;;  %2736 = vmatpush.bf16.msra.mxu0 %v4919_v3  ;;  %v5219_v38 = vor.u32 %v5558_v61, %v5216_v53  ;;  %v5556_v7 = vld [vmem:[%s6042_s24 + $0x2e4] sm:$0xf]  ;;  %v5208_v32 = vld [vmem:[%s6042_s24 + $0x2e8] sm:$0xf0]  ;;  %v5147_v5 = vor.u32 %v5540_v8, %v5144_v6  ;;  %v5134_v30 = vld [vmem:[%s6042_s24 + $0x250] sm:$0xf] }
 0x215   : > { %v2115_v37 = vadd.f32 %v2069_v58, %v1729_v47  ;;  %2175 = vst [vmem:[#allocation4 + $0x18] sm:$0xff] %v6717_v45  ;;  %v2254_v18 = vunpack.c.l.b16 %v6717_v45  ;;  %v2255_v20 = vunpack.c.h.b16 %v6717_v45  ;;  %v2166_v0 = vsel %vm6062_vm1, %v2150_v29, 0.0  ;;  %v5214_v47 = vld [vmem:[%s6042_s24 + $0x2f0] sm:$0xf]  ;;  %v5126_v53 = vld [vmem:[%s6042_s24 + $0x240] sm:$0xf] }
 0x216   : > { %v2143_v41 = vadd.f32 %v6643_v34, %v2128_v36  ;;  %v5215_v4 = vor.u32 %v5559_v57, %v5214_v47  ;;  %v5211_v56 = vor.u32 %v5556_v7, %v5208_v32  ;;  %v5537_v50 = vld [vmem:[%s6042_s24 + $0x244] sm:$0xf0]  ;;  %v5534_v6 = vld [vmem:[%s6042_s24 + $0x234] sm:$0xf]  ;;  %v5120_v7 = vld [vmem:[%s6042_s24 + $0x238] sm:$0xf0] }
 0x217   : > { %v2129_v22 = vmul.f32 %v6607_v1, %v2115_v37  ;;  %v2106_v24 = vpop.f32.mrf.mxu3  ;;  %v2260_v51 = vpack.c.b16 %v2254_v18, %v2252_v27  ;;  %v2261_v14 = vpack.c.b16 %v2255_v20, %v2253_v35  ;;  %v4983_v1 = vor.u32 %v5477_v25, %v4982_v2  ;;  %v5136_v35 = vld [vmem:[%s6042_s24 + $0x258] sm:$0xf0] }
 0x218   : > { %v2151_v39 = vmax.f32 %v2143_v41, 0.0  ;;  %v2107_v33 = vadd.f32 %v2106_v24, %v2087_v23  ;;  %v5554_v41 = vld [vmem:[%s6042_s24 + $0x2d4] sm:$0xf]  ;;  %v5127_v57 = vor.u32 %v5537_v50, %v5126_v53  ;;  %v5544_v53 = vld [vmem:[%s6042_s24 + $0x284] sm:$0xf] }
 0x219   : > { %v2144_v28 = vadd.f32 %v6614_v43, %v2129_v22  ;;  %2436 = vmatmul.bf16.vlgmr.msrb.gmra.mxu0 %v2260_v51  ;;  %2455 = vmatmul.bf16.vlgmr.msrb.gmra.mxu1 %v2261_v14  ;;  %v2505_v43 = vunpack.c.l.b16 %v2178_v54  ;;  %v5200_v22 = vld [vmem:[%s6042_s24 + $0x2d8] sm:$0xf0]  ;;  %v5539_v54 = vld [vmem:[%s6042_s24 + $0x254] sm:$0xf0]  ;;  %v5160_v50 = vld [vmem:[%s6042_s24 + $0x288] sm:$0xf0] }
 0x21a   : > { %v2167_v21 = vsel %vm6062_vm1, %v2151_v39, 0.0  ;;  %v2116_v52 = vadd.f32 %v2107_v33, %v1767_v31  ;;  %2474 = vmatmul.bf16.vlgmr.msrb.gmra.mxu2 %v2260_v51  ;;  %2493 = vmatmul.bf16.vlgmr.msrb.gmra.mxu3 %v2261_v14  ;;  %v2531_v14 = vshrl.u32 %v6764_v62, 16  ;;  %v2534_v39 = vshll.u32 %v6764_v62, 16 }
 0x21b   : > { %v6746_v60 = vpack.c.bf16 %v2167_v21, %v2166_v0  ;;  %2755 = vmatpush.bf16.msra.mxu1 %v4983_v1  ;;  %v2152_v49 = vmax.f32 %v2144_v28, 0.0  ;;  %3106 = vmatpush.bf16.msrb.mxu2 %v5155_v63  ;;  %v6762_v58 = vpack.c.b16 %v2252_v27, %v2505_v43  ;;  %v5538_v27 = vld [vmem:[%s6042_s24 + $0x254] sm:$0xf]  ;;  %v5203_v33 = vor.u32 %v5554_v41, %v5200_v22  ;;  %v5198_v1 = vld [vmem:[%s6042_s24 + $0x2d0] sm:$0xf] }
 0x21c   : > { %v2130_v55 = vmul.f32 %v6627_v48, %v2116_v52  ;;  %3125 = vmatpush.bf16.msrb.mxu3 %v5219_v38  ;;  %3068 = vmatpush.bf16.msrb.mxu0 %v5151_v40  ;;  %v5135_v45 = vor.u32 %v5539_v54, %v5134_v30  ;;  %v5536_v52 = vld [vmem:[%s6042_s24 + $0x244] sm:$0xf]  ;;  %v5192_v43 = vld [vmem:[%s6042_s24 + $0x2c8] sm:$0xf0]  ;;  %v5123_v62 = vor.u32 %v5534_v6, %v5120_v7  ;;  %v5110_v22 = vld [vmem:[%s6042_s24 + $0x220] sm:$0xf] }
 0x21d   : > { %2176 = vst [vmem:[#allocation4 + $0x20] sm:$0xff] %v6746_v60  ;;  %v2256_v44 = vunpack.c.l.b16 %v6746_v60  ;;  %v2257_v19 = vunpack.c.h.b16 %v6746_v60  ;;  %v2168_v2 = vsel %vm6070_vm3, %v2152_v49, 0.0  ;;  %v2514_v24 = vshrl.u32 %v6762_v58, 16  ;;  %v5552_v60 = vld [vmem:[%s6042_s24 + $0x2c4] sm:$0xf] }
 0x21e   : > { %v2145_v48 = vadd.f32 %v6643_v34, %v2130_v55  ;;  %v5206_v34 = vld [vmem:[%s6042_s24 + $0x2e0] sm:$0xf]  ;;  %v2517_v51 = vshll.u32 %v6762_v58, 16  ;;  %v5131_v46 = vor.u32 %v5536_v52, %v5128_v59  ;;  %v5195_v47 = vor.u32 %v5552_v60, %v5192_v43  ;;  %v5553_v49 = vld [vmem:[%s6042_s24 + $0x2c4] sm:$0xf0] }
 0x21f   : > { %v6771_v37 = vpack.c.b16 %v2256_v44, %v2254_v18  ;;  %3087 = vmatpush.bf16.msrb.mxu1 %v5215_v4  ;;  %3107 = vmatpush.bf16.msrb.mxu2 %v5147_v5  ;;  %v5207_v29 = vor.u32 %v5557_v17, %v5206_v34  ;;  %v5139_v18 = vor.u32 %v5538_v27, %v5136_v35  ;;  %v5190_v55 = vld [vmem:[%s6042_s24 + $0x2c0] sm:$0xf]  ;;  %v6809_v40 = vrot.slane %v2514_v24, 3  ;;  %v5550_v5 = vld [vmem:[%s6042_s24 + $0x2b4] sm:$0xf] }
 0x220   : > { %v2153_v36 = vmax.f32 %v2145_v48, 0.0  ;;  %3126 = vmatpush.bf16.msrb.mxu3 %v5211_v56  ;;  %3069 = vmatpush.bf16.msrb.mxu0 %v5143_v16  ;;  %v2510_v31 = vpack.c.b16 %v2257_v19, %v2255_v20  ;;  %v5555_v20 = vld [vmem:[%s6042_s24 + $0x2d4] sm:$0xf0]  ;;  %v5191_v8 = vor.u32 %v5553_v49, %v5190_v55  ;;  %v6813_v48 = vrot.slane %v2531_v14, 3  ;;  %v5184_v56 = vld [vmem:[%s6042_s24 + $0x2b8] sm:$0xf0] }
 0x221   : > { %v2522_v3 = vshrl.u32 %v6771_v37, 16  ;;  %v2525_v0 = vshll.u32 %v6771_v37, 16  ;;  %v5199_v26 = vor.u32 %v5555_v20, %v5198_v1  ;;  %v6815_v4 = vrot.slane %v2534_v39, 4  ;;  %v5535_v37 = vld [vmem:[%s6042_s24 + $0x234] sm:$0xf0] }
 0x222   : > { %v2169_v25 = vsel %vm6070_vm3, %v2153_v36, 0.0  ;;  %v2539_v63 = vshrl.u32 %v2510_v31, 16  ;;  %v2542_v38 = vshll.u32 %v2510_v31, 16  ;;  %v5187_v34 = vor.u32 %v5550_v5, %v5184_v56  ;;  %v5118_v36 = vld [vmem:[%s6042_s24 + $0x230] sm:$0xf] }
 0x223   : > { %v2173_v23 = vpack.c.bf16 %v2169_v25, %v2168_v2  ;;  %3088 = vmatpush.bf16.msrb.mxu1 %v5207_v29  ;;  %3108 = vmatpush.bf16.msrb.mxu2 %v5139_v18  ;;  %v2524_v32 = vrot.slane %v2522_v3, 3  ;;  %v2527_v58 = vrot.slane %v2525_v0, 4  ;;  %v5182_v16 = vld [vmem:[%s6042_s24 + $0x2b0] sm:$0xf]  ;;  %v5551_v17 = vld [vmem:[%s6042_s24 + $0x2b4] sm:$0xf0] }
 0x224   : > { %3127 = vmatpush.bf16.msrb.mxu3 %v5203_v33  ;;  %3070 = vmatpush.bf16.msrb.mxu0 %v5135_v45  ;;  %v2541_v13 = vrot.slane %v2539_v63, 3  ;;  %v2544_v15 = vrot.slane %v2542_v38, 4  ;;  %v5532_v27 = vld [vmem:[%s6042_s24 + $0x224] sm:$0xf]  ;;  %v5183_v35 = vor.u32 %v5551_v17, %v5182_v16  ;;  %v5112_v2 = vld [vmem:[%s6042_s24 + $0x228] sm:$0xf0] }
 0x225   : > { %2177 = vst [vmem:[#allocation4 + $0x28] sm:$0xff] %v2173_v23  ;;  %v6793_v28 = vunpack.c.l.b16 %v2173_v23  ;;  %v6796_v21 = vunpack.c.h.b16 %v2173_v23  ;;  %v5548_v25 = vld [vmem:[%s6042_s24 + $0x2a4] sm:$0xf]  ;;  %v5176_v29 = vld [vmem:[%s6042_s24 + $0x2a8] sm:$0xf0]  ;;  %v5115_v18 = vor.u32 %v5532_v27, %v5112_v2  ;;  %v2528_v20 = vor.u32 %v2527_v58, %v2524_v32 }
 0x226   : > { %v5179_v41 = vor.u32 %v5548_v25, %v5176_v29  ;;  %v5533_v23 = vld [vmem:[%s6042_s24 + $0x224] sm:$0xf0]  ;;  %v5174_v24 = vld [vmem:[%s6042_s24 + $0x2a0] sm:$0xf]  ;;  %v5530_v30 = vld [vmem:[%s6042_s24 + $0x214] sm:$0xf]  ;;  %v2545_v43 = vor.u32 %v2544_v15, %v2541_v13  ;;  %v5163_v32 = vor.u32 %v5544_v53, %v5160_v50 }
 0x227   : > { %v2262_v42 = vpack.c.b16 %v6793_v28, %v2256_v44  ;;  %v2263_v61 = vpack.c.b16 %v6796_v21, %v2257_v19  ;;  %3089 = vmatpush.bf16.msrb.mxu1 %v5199_v26  ;;  %v6811_v44 = vrot.slane %v2517_v51, 4  ;;  %3109 = vmatpush.bf16.msrb.mxu2 %v5131_v46  ;;  %v5119_v19 = vor.u32 %v5535_v37, %v5118_v36  ;;  %v5549_v14 = vld [vmem:[%s6042_s24 + $0x2a4] sm:$0xf0]  ;;  %v5104_v3 = vld [vmem:[%s6042_s24 + $0x218] sm:$0xf0] }
 0x228   : > { %3128 = vmatpush.bf16.msrb.mxu3 %v5195_v47  ;;  %3071 = vmatpush.bf16.msrb.mxu0 %v5127_v57  ;;  %v5111_v51 = vor.u32 %v5533_v23, %v5110_v22  ;;  %v5175_v31 = vor.u32 %v5549_v14, %v5174_v24  ;;  %v5546_v39 = vld [vmem:[%s6042_s24 + $0x294] sm:$0xf]  ;;  %v5168_v33 = vld [vmem:[%s6042_s24 + $0x298] sm:$0xf0]  ;;  %v5102_v54 = vld [vmem:[%s6042_s24 + $0x210] sm:$0xf]  ;;  %v5107_v52 = vor.u32 %v5530_v30, %v5104_v3 }
 0x229   : > { %2441 = vmatmul.bf16.gmra.mxu0 %v2262_v42  ;;  %2460 = vmatmul.bf16.gmra.mxu1 %v2263_v61  ;;  %v5531_v1 = vld [vmem:[%s6042_s24 + $0x214] sm:$0xf0]  ;;  %v5166_v0 = vld [vmem:[%s6042_s24 + $0x290] sm:$0xf]  ;;  %v5171_v26 = vor.u32 %v5546_v39, %v5168_v33  ;;  %v5528_v59 = vld [vmem:[%s6042_s24 + $0x204] sm:$0xf]  ;;  %v2520_v63 = vor.u32 %v6811_v44, %v6809_v40  ;;  %v2511_v49 = vpack.c.b16 %v6793_v28, %v6793_v28 }
 0x22a   : > { %2479 = vmatmul.bf16.gmra.mxu2 %v2262_v42  ;;  %2498 = vmatmul.bf16.gmra.mxu3 %v2263_v61  ;;  %v5547_v45 = vld [vmem:[%s6042_s24 + $0x294] sm:$0xf0]  ;;  %v5096_v60 = vld [vmem:[%s6042_s24 + $0x208] sm:$0xf0]  ;;  %v5103_v42 = vor.u32 %v5531_v1, %v5102_v54  ;;  %v5094_v55 = vld [vmem:[%s6042_s24 + $0x200] sm:$0xf]  ;;  %v2512_v57 = vpack.c.b16 %v6796_v21, %v6796_v21 }
 0x22b   : > { %3090 = vmatpush.bf16.msrb.mxu1 %v5191_v8  ;;  %3110 = vmatpush.bf16.msrb.mxu2 %v5123_v62  ;;  %v5167_v61 = vor.u32 %v5547_v45, %v5166_v0  ;;  %v5529_v38 = vld [vmem:[%s6042_s24 + $0x204] sm:$0xf0]  ;;  %v5158_v46 = vld [vmem:[%s6042_s24 + $0x280] sm:$0xf]  ;;  %v2537_v8 = vor.u32 %v6815_v4, %v6813_v48  ;;  %v2529_v6 = vsel %vm1476_vm8, %v2520_v63, %v2528_v20  ;;  %v2548_v28 = vshrl.u32 %v2511_v49, 16 }
 0x22c   : > { %3129 = vmatpush.bf16.msrb.mxu3 %v5187_v34  ;;  %3072 = vmatpush.bf16.msrb.mxu0 %v5119_v19  ;;  %v5545_v47 = vld [vmem:[%s6042_s24 + $0x284] sm:$0xf0]  ;;  %v5099_v7 = vor.u32 %v5528_v59, %v5096_v60  ;;  %v5095_v44 = vor.u32 %v5529_v38, %v5094_v55  ;;  %v2551_v21 = vshll.u32 %v2511_v49, 16  ;;  %v2557_v48 = vshrl.u32 %v2512_v57, 16  ;;  %v5525_v36 = vld [vmem:[#allocation4 + $0x14] sm:$0xf0] }
 0x22d   : > { %v2546_v40 = vsel %vm1476_vm8, %v2537_v8, %v2545_v43  ;;  %v5159_v58 = vor.u32 %v5545_v47, %v5158_v46  ;;  %v2560_v4 = vshll.u32 %v2512_v57, 16  ;;  %v2550_v62 = vrot.slane %v2548_v28, 3  ;;  %v5080_v37 = vld [vmem:[#allocation4 + $0x18] sm:$0xf0]  ;;  %v5078_v17 = vld [vmem:[#allocation4 + $0x10] sm:$0xf] }
 0x22e   : > { %v2553_v5 = vrot.slane %v2551_v21, 4  ;;  %v2559_v56 = vrot.slane %v2557_v48, 3  ;;  %v5527_v27 = vld [vmem:[#allocation4 + $0x24] sm:$0xf0]  ;;  %v5088_v2 = vld [vmem:[#allocation4 + $0x28] sm:$0xf0]  ;;  %v5079_v25 = vor.u32 %v5525_v36, %v5078_v17 }
 0x22f   : > { %3091 = vmatpush.bf16.msrb.mxu1 %v5183_v35  ;;  %3111 = vmatpush.bf16.msrb.mxu2 %v5115_v18  ;;  %v2562_v13 = vrot.slane %v2560_v4, 4  ;;  %v5524_v35 = vld [vmem:[#allocation4 + $0x14] sm:$0xf]  ;;  %v5086_v18 = vld [vmem:[#allocation4 + $0x20] sm:$0xf] }
 0x230   : > { %3130 = vmatpush.bf16.msrb.mxu3 %v5179_v41  ;;  %3073 = vmatpush.bf16.msrb.mxu0 %v5111_v51  ;;  %v2554_v15 = vor.u32 %v2553_v5, %v2550_v62  ;;  %v5083_v29 = vor.u32 %v5524_v35, %v5080_v37  ;;  %v5526_v41 = vld [vmem:[#allocation4 + $0x24] sm:$0xf]  ;;  %v5087_v22 = vor.u32 %v5527_v27, %v5086_v18  ;;  %v2867_v24 = vshll.u32 %v5079_v25, 16  ;;  %v2809_v0 = vld [vmem:[#allocation4 + $0x30] sm:$0x11] }
 0x231   : > { %v2563_v34 = vor.u32 %v2562_v13, %v2559_v56  ;;  %v5091_v23 = vor.u32 %v5526_v41, %v5088_v2  ;;  %v2865_v39 = vshrl.u32 %v5079_v25, 16  ;;  %v2856_v59 = vunpack.c.l.b16 %v2809_v0 }
 0x232   : > { %v2555_v19 = vsel %vm1476_vm8, %v2528_v20, %v2554_v15  ;;  %v2879_v51 = vshll.u32 %v5083_v29, 16  ;;  %v2872_v14 = vshll.u32 %v5087_v22, 16  ;;  %v2869_v3 = vrot.slane %v2867_v24, 1 }
 0x233   : > { %3092 = vmatpush.bf16.msrb.mxu1 %v5175_v31  ;;  %3112 = vmatpush.bf16.msrb.mxu2 %v5107_v52  ;;  %v2564_v16 = vsel %vm1476_vm8, %v2545_v43, %v2563_v34  ;;  %v2884_v30 = vshll.u32 %v5091_v23, 16  ;;  %v2877_v54 = vshrl.u32 %v5083_v29, 16  ;;  %v2857_v60 = vunpack.c.h.b16 %v2809_v0 }
 0x234   : > { %3131 = vmatpush.bf16.msrb.mxu3 %v5171_v26  ;;  %3074 = vmatpush.bf16.msrb.mxu0 %v5103_v42  ;;  %v2881_v31 = vrot.slane %v2879_v51, 1  ;;  %v2874_v33 = vrot.slane %v2872_v14, 1  ;;  %v2870_v45 = vor.u32 %v2869_v3, %v2865_v39  ;;  %v2862_v43 = vpack.c.b16 %v2856_v59, %v2856_v59  ;;  %v5220_v51 = vld [vmem:[%s6060_s22 + $0x2] ss:$4 sm:$0x3]  ;;  %v3182_v59 = vld [vmem:[#allocation3 + $0x10] sm:$0xff] }
 0x235   : > { %v2886_v1 = vrot.slane %v2884_v30, 1  ;;  %v2863_v42 = vpack.c.b16 %v2857_v60, %v2857_v60  ;;  %v2888_v50 = vshrl.u32 %v5087_v22, 16  ;;  %v2896_v55 = vshrl.u32 %v5091_v23, 16 }
 0x236   : > { %v2882_v20 = vor.u32 %v2881_v31, %v2877_v54  ;;  %v2875_v52 = vsel %vm1828_vm9, %v2870_v45, %v2874_v33  ;;  %v6890_v54 = vperm.slane %v5220_v51, 0 }
 0x237   : > { %3093 = vmatpush.bf16.msrb.mxu1 %v5167_v61  ;;  %3113 = vmatpush.bf16.msrb.mxu2 %v5099_v7  ;;  %v2892_v61 = vshll.u32 %v2862_v43, 16  ;;  %v2900_v53 = vshll.u32 %v2863_v42, 16  ;;  %v2890_v63 = vor.u32 %v2888_v50, %v2874_v33  ;;  %v2898_v46 = vor.u32 %v2896_v55, %v2886_v1 }
 0x238   : > { %3132 = vmatpush.bf16.msrb.mxu3 %v5163_v32  ;;  %3075 = vmatpush.bf16.msrb.mxu0 %v5095_v44  ;;  %v2887_v26 = vsel %vm1828_vm9, %v2882_v20, %v2886_v1  ;;  %v5221_v1 = vld [vmem:[%s6060_s22 + $0x3] ss:$4 sm:$0x3]  ;;  %v3186_v42 = vunpack.c.l.bf16 %v3182_v59 }
 0x239   : > { %2737 = vmatmul.bf16.vlgmr.msra.gmra.mxu0 %v2529_v6  ;;  %2756 = vmatmul.bf16.vlgmr.msra.gmra.mxu1 %v2546_v40  ;;  %v2894_v38 = vrot.slane %v2892_v61, 1  ;;  %v2902_v47 = vrot.slane %v2900_v53, 1 }
 0x23a   : > { %2775 = vmatmul.bf16.vlgmr.msra.gmra.mxu2 %v2529_v6  ;;  %2794 = vmatmul.bf16.vlgmr.msra.gmra.mxu3 %v2546_v40 }
 0x23b   : > { %3094 = vmatpush.bf16.msrb.mxu1 %v5159_v58  ;;  %v2895_v49 = vsel %vm1828_vm9, %v2890_v63, %v2894_v38  ;;  %v2903_v57 = vsel %vm1828_vm9, %v2898_v46, %v2902_v47  ;;  %v6897_v38 = vperm.slane %v5220_v51, 1 }
 0x249   : > { %2742 = vmatmul.bf16.gmra.mxu0 %v2555_v19  ;;  %2761 = vmatmul.bf16.gmra.mxu1 %v2564_v16 }
 0x24a   : > { %2780 = vmatmul.bf16.gmra.mxu2 %v2555_v19  ;;  %2799 = vmatmul.bf16.gmra.mxu3 %v2564_v16 }
 0x259   : > { %3076 = vmatmul.bf16.vlgmr.msrb.gmra.mxu0 %v2875_v52  ;;  %3095 = vmatmul.bf16.vlgmr.msrb.gmra.mxu1 %v2887_v26 }
 0x25a   : > { %3114 = vmatmul.bf16.vlgmr.msrb.gmra.mxu2 %v2875_v52  ;;  %3133 = vmatmul.bf16.vlgmr.msrb.gmra.mxu3 %v2887_v26  ;;  %v6893_v26 = vperm.slane %v5221_v1, 0 }
 0x269   : > { %3081 = vmatmul.bf16.gmra.mxu0 %v2895_v49  ;;  %3100 = vmatmul.bf16.gmra.mxu1 %v2903_v57 }
 0x26a   : > { %3119 = vmatmul.bf16.gmra.mxu2 %v2895_v49  ;;  %3138 = vmatmul.bf16.gmra.mxu3 %v2903_v57 }
 0x296   : > { %v2437_v8 = vpop.f32.mrf.mxu0  ;;  %v2456_v6 = vpop.f32.mrf.mxu1 }
 0x297   : > { %v2457_v23 = vadd.f32 %v2456_v6, %v2437_v8 }
 0x29d   : > { %v2475_v7 = vpop.f32.mrf.mxu2  ;;  %v2494_v32 = vpop.f32.mrf.mxu3 }
 0x29e   : > { %v2439_v40 = vpop.f32.mrf.mxu0  ;;  %v2458_v44 = vpop.f32.mrf.mxu1  ;;  %v2495_v0 = vadd.f32 %v2494_v32, %v2475_v7  ;;  %v6899_v7 = vperm.slane %v5221_v1, 1 }
 0x29f   : > { %v2459_v45 = vadd.f32 %v2458_v44, %v2439_v40 }
 0x2a5   : > { %v2477_v58 = vpop.f32.mrf.mxu2  ;;  %v2496_v28 = vpop.f32.mrf.mxu3 }
 0x2a6   : > { %v2442_v21 = vpop.f32.mrf.mxu0  ;;  %v2461_v48 = vpop.f32.mrf.mxu1  ;;  %v2497_v49 = vadd.f32 %v2496_v28, %v2477_v58 }
 0x2a7   : > { %v2462_v32 = vadd.f32 %v2461_v48, %v2442_v21 }
 0x2ad   : > { %v6865_v4 = vpop.f32.mrf.mxu2  ;;  %v6867_v62 = vpop.f32.mrf.mxu3 }
 0x2ae   : > { %v6869_v5 = vpop.f32.mrf.mxu0  ;;  %v6871_v56 = vpop.f32.mrf.mxu1 }
 0x2b5   : > { %v6873_v13 = vpop.f32.mrf.mxu2  ;;  %v6875_v15 = vpop.f32.mrf.mxu3 }
 0x2b6   : > { %v2738_v34 = vpop.f32.mrf.mxu0  ;;  %v2757_v36 = vpop.f32.mrf.mxu1 }
 0x2b7   : > { %v2739_v24 = vadd.f32 %v2738_v34, %v2457_v23 }
 0x2b9   : > { %v2758_v39 = vadd.f32 %v2757_v36, %v2739_v24 }
 0x2bd   : > { %v2776_v37 = vpop.f32.mrf.mxu2  ;;  %v2795_v19 = vpop.f32.mrf.mxu3 }
 0x2be   : > { %v2740_v16 = vpop.f32.mrf.mxu0  ;;  %v2759_v17 = vpop.f32.mrf.mxu1  ;;  %v2777_v52 = vadd.f32 %v2776_v37, %v2495_v0  ;;  %v3187_v37 = vunpack.c.h.bf16 %v3182_v59 }
 0x2bf   : > { %v2741_v60 = vadd.f32 %v2740_v16, %v2459_v45 }
 0x2c0   : > { %v2796_v50 = vadd.f32 %v2795_v19, %v2777_v52  ;;  %v3183_v19 = vld [vmem:[#allocation3 + $0x18] sm:$0xff] }
 0x2c1   : > { %v2760_v57 = vadd.f32 %v2759_v17, %v2741_v60  ;;  %v3188_v58 = vunpack.c.l.bf16 %v3183_v19  ;;  %v3189_v52 = vunpack.c.h.bf16 %v3183_v19 }
 0x2c5   : > { %v2778_v27 = vpop.f32.mrf.mxu2  ;;  %v2797_v35 = vpop.f32.mrf.mxu3 }
 0x2c6   : > { %v2743_v2 = vpop.f32.mrf.mxu0  ;;  %v2762_v25 = vpop.f32.mrf.mxu1  ;;  %v2779_v40 = vadd.f32 %v2778_v27, %v2497_v49 }
 0x2c7   : > { %v2744_v16 = vadd.f32 %v2743_v2, %v2462_v32 }
 0x2c8   : > { %v2798_v51 = vadd.f32 %v2797_v35, %v2779_v40  ;;  %v2464_v35 = vadd.f32 %v6871_v56, %v6869_v5 }
 0x2c9   : > { %v2763_v1 = vadd.f32 %v2762_v25, %v2744_v16 }
 0x2cd   : > { %v6877_v29 = vpop.f32.mrf.mxu2  ;;  %v6879_v18 = vpop.f32.mrf.mxu3 }
 0x2ce   : > { %v6881_v41 = vpop.f32.mrf.mxu0  ;;  %v6883_v22 = vpop.f32.mrf.mxu1 }
 0x2cf   : > { %v2746_v25 = vadd.f32 %v6881_v41, %v2464_v35  ;;  %v2502_v41 = vadd.f32 %v6875_v15, %v6873_v13 }
 0x2d5   : > { %v6886_v14 = vpop.f32.mrf.mxu2  ;;  %v6888_v30 = vpop.f32.mrf.mxu3 }
 0x2d6   : > { %v3077_v3 = vpop.f32.mrf.mxu0  ;;  %v3096_v31 = vpop.f32.mrf.mxu1 }
 0x2d7   : > { %v3097_v33 = vadd.f32 %v3096_v31, %v3077_v3 }
 0x2d9   : > { %v3144_v20 = vadd.f32 %v3097_v33, %v2758_v39  ;;  %v2500_v33 = vadd.f32 %v6867_v62, %v6865_v4  ;;  %v3184_v62 = vld [vmem:[#allocation3 + $0x20] sm:$0xff] }
 0x2db   : > { %v3159_v43 = vmul.f32 %v6890_v54, %v3144_v20  ;;  %v2782_v20 = vadd.f32 %v6877_v29, %v2500_v33  ;;  %v3190_v29 = vunpack.c.l.bf16 %v3184_v62 }
 0x2dd   : > { %v3115_v61 = vpop.f32.mrf.mxu2  ;;  %v3134_v53 = vpop.f32.mrf.mxu3  ;;  %v3174_v55 = vadd.f32 %v6893_v26, %v3159_v43  ;;  %v2801_v56 = vadd.f32 %v6879_v18, %v2782_v20  ;;  %v2784_v18 = vadd.f32 %v6886_v14, %v2502_v41 }
 0x2de   : > { %v3135_v63 = vadd.f32 %v3134_v53, %v3115_v61  ;;  %v3079_v46 = vpop.f32.mrf.mxu0  ;;  %v3098_v47 = vpop.f32.mrf.mxu1 }
 0x2df   : > { %v3099_v8 = vadd.f32 %v3098_v47, %v3079_v46  ;;  %v3194_v34 = vadd.f32 %v3186_v42, %v3174_v55 }
 0x2e0   : > { %v3145_v6 = vadd.f32 %v3135_v63, %v2796_v50 }
 0x2e1   : > { %v3146_v44 = vadd.f32 %v3099_v8, %v2760_v57  ;;  %v3202_v3 = vmax.f32 %v3194_v34, 0.0  ;;  %v2765_v8 = vadd.f32 %v6883_v22, %v2746_v25 }
 0x2e2   : > { %v3160_v36 = vmul.f32 %v6897_v38, %v3145_v6 }
 0x2e3   : > { %v3161_v23 = vmul.f32 %v6890_v54, %v3146_v44  ;;  %v3210_v60 = vsel %vm6053_vm0, %v3202_v3, 0.0  ;;  %v3191_v44 = vunpack.c.h.bf16 %v3184_v62 }
 0x2e4   : > { %v3175_v24 = vadd.f32 %v6899_v7, %v3160_v36 }
 0x2e5   : > { %v3117_v28 = vpop.f32.mrf.mxu2  ;;  %v3136_v17 = vpop.f32.mrf.mxu3  ;;  %v3176_v21 = vadd.f32 %v6893_v26, %v3161_v23  ;;  %v3185_v23 = vld [vmem:[#allocation3 + $0x28] sm:$0xff] }
 0x2e6   : > { %v3195_v31 = vadd.f32 %v3187_v37, %v3175_v24  ;;  %v3137_v48 = vadd.f32 %v3136_v17, %v3117_v28  ;;  %v3082_v27 = vpop.f32.mrf.mxu0  ;;  %v3101_v39 = vpop.f32.mrf.mxu1  ;;  %v2803_v24 = vadd.f32 %v6888_v30, %v2784_v18  ;;  %v3192_v14 = vunpack.c.l.bf16 %v3185_v23 }
 0x2e7   : > { %v3102_v2 = vadd.f32 %v3101_v39, %v3082_v27  ;;  %v3196_v42 = vadd.f32 %v3188_v58, %v3176_v21 }
 0x2e8   : > { %v3203_v0 = vmax.f32 %v3195_v31, 0.0  ;;  %v3147_v45 = vadd.f32 %v3137_v48, %v2798_v51  ;;  %v3193_v48 = vunpack.c.h.bf16 %v3185_v23 }
 0x2e9   : > { %v3148_v59 = vadd.f32 %v3102_v2, %v2763_v1  ;;  %v3204_v63 = vmax.f32 %v3196_v42, 0.0 }
 0x2ea   : > { %v3211_v43 = vsel %vm6053_vm0, %v3203_v0, 0.0  ;;  %v3162_v4 = vmul.f32 %v6897_v38, %v3147_v45 }
 0x2eb   : > { %v3218_v61 = vpack.c.bf16 %v3211_v43, %v3210_v60  ;;  %v3163_v53 = vmul.f32 %v6890_v54, %v3148_v59  ;;  %v3212_v36 = vsel %vm6066_vm2, %v3204_v63, 0.0 }
 0x2ec   : > { %v3177_v5 = vadd.f32 %v6899_v7, %v3162_v4 }
 0x2ed   : > { %3222 = vst [vmem:[#allocation3 + $0x10] sm:$0xff] %v3218_v61  ;;  %v3120_v50 = vpop.f32.mrf.mxu2  ;;  %v3139_v55 = vpop.f32.mrf.mxu3  ;;  %v3178_v46 = vadd.f32 %v6893_v26, %v3163_v53 }
 0x2ee   : > { %v3197_v9 = vadd.f32 %v3189_v52, %v3177_v5  ;;  %v3140_v47 = vadd.f32 %v3139_v55, %v3120_v50  ;;  %v3084_v49 = vpop.f32.mrf.mxu0  ;;  %v3103_v57 = vpop.f32.mrf.mxu1 }
 0x2ef   : > { %v3104_v6 = vadd.f32 %v3103_v57, %v3084_v49  ;;  %v3198_v19 = vadd.f32 %v3190_v29, %v3178_v46 }
 0x2f0   : > { %v3205_v32 = vmax.f32 %v3197_v9, 0.0  ;;  %v3149_v40 = vadd.f32 %v3140_v47, %v2801_v56 }
 0x2f1   : > { %v3150_v34 = vadd.f32 %v3104_v6, %v2765_v8  ;;  %v3206_v28 = vmax.f32 %v3198_v19, 0.0 }
 0x2f2   : > { %v3213_v37 = vsel %vm6066_vm2, %v3205_v32, 0.0  ;;  %v3164_v16 = vmul.f32 %v6897_v38, %v3149_v40 }
 0x2f3   : > { %v3219_v13 = vpack.c.bf16 %v3213_v37, %v3212_v36  ;;  %v3165_v15 = vmul.f32 %v6890_v54, %v3150_v34  ;;  %v3214_v27 = vsel %vm6062_vm1, %v3206_v28, 0.0 }
 0x2f4   : > { %v3179_v22 = vadd.f32 %v6899_v7, %v3164_v16 }
 0x2f5   : > { %3223 = vst [vmem:[#allocation3 + $0x18] sm:$0xff] %v3219_v13  ;;  %v3122_v51 = vpop.f32.mrf.mxu2  ;;  %v3141_v58 = vpop.f32.mrf.mxu3  ;;  %v3180_v11 = vadd.f32 %v6893_v26, %v3165_v15 }
 0x2f6   : > { %v3199_v17 = vadd.f32 %v3191_v44, %v3179_v22  ;;  %v3142_v3 = vadd.f32 %v3141_v58, %v3122_v51 }
 0x2f7   : > { %v3200_v39 = vadd.f32 %v3192_v14, %v3180_v11 }
 0x2f8   : > { %v3207_v31 = vmax.f32 %v3199_v17, 0.0  ;;  %v3151_v21 = vadd.f32 %v3142_v3, %v2803_v24 }
 0x2f9   : > { %v3208_v2 = vmax.f32 %v3200_v39, 0.0 }
 0x2fa   : > { %v3215_v54 = vsel %vm6062_vm1, %v3207_v31, 0.0  ;;  %v3166_v30 = vmul.f32 %v6897_v38, %v3151_v21 }
 0x2fb   : > { %v3220_v33 = vpack.c.bf16 %v3215_v54, %v3214_v27  ;;  %v3216_v45 = vsel %vm6070_vm3, %v3208_v2, 0.0 }
 0x2fc   : > { %v3181_v1 = vadd.f32 %v6899_v7, %v3166_v30 }
 0x2fd   : > { %3224 = vst [vmem:[#allocation3 + $0x20] sm:$0xff] %v3220_v33 }
 0x2fe   : > { %v3201_v0 = vadd.f32 %v3193_v48, %v3181_v1 }
 0x300   : > { %v3209_v26 = vmax.f32 %v3201_v0, 0.0 }
 0x302   : > { %v3217_v35 = vsel %vm6070_vm3, %v3209_v26, 0.0 }
 0x303   : > { %v3221_v20 = vpack.c.bf16 %v3217_v35, %v3216_v45 }
 0x305   : > { %3225 = vst [vmem:[#allocation3 + $0x28] sm:$0xff] %v3221_v20 }
 0x306 PF: > { %p5222_p7 = scmp.ne.s32.totalorder %s5851_s21, 2 }
 0x307   : > { %s7445_s22 = sld [smem:[#allocation22_spill]] (!%p5222_p7) }
 0x308   : > { %3229 = sbr.rel (%p5222_p7) target bundleno = 1324 (0x52c), region = 100  ;;  %s7447_s9 = sld [smem:[#allocation19_spill]] (!%p5222_p7) }
 0x309   : > { %s7448_s18 = sld [smem:[#allocation24_spill]] (!%p5222_p7) }
 0x30a   : > { %s7450_s26 = sld [smem:[#allocation21_spill]] (!%p5222_p7) }
 0x30b   : > { %s7451_s17 = sld [smem:[#allocation23_spill]] (!%p5222_p7) }
 0x30c   : > { %s7452_s16 = sld [smem:[#allocation25_spill]] (!%p5222_p7) }
 0x30d   : > { %v3257_v10 = vld [vmem:[#allocation9 + $0x78] sm:$0xff]  ;;  %v3256_v52 = vld [vmem:[#allocation9 + $0x70] sm:$0xff]  ;;  %v3255_v59 = vld [vmem:[#allocation9 + $0x68] sm:$0xff]  ;;  %s7446_s30 = smov %s7445_s22  ;;  %vm3994_vm10 = vcmask 523264   ;;  %s7453_s21 = sld [smem:[#allocation27_spill]] }
 0x30e   : > { %v3273_v38 = vld [vmem:[#allocation9 + $0xf8] sm:$0xff]  ;;  %3274 = vmatpush.msra.mxu0 %v3257_v10  ;;  %v3272_v7 = vld [vmem:[#allocation9 + $0xf0] sm:$0xff]  ;;  %v3271_v60 = vld [vmem:[#allocation9 + $0xe8] sm:$0xff] }
 0x30f   : > { %3303 = vmatpush.msra.mxu1 %v3273_v38  ;;  %v3254_v43 = vld [vmem:[#allocation9 + $0x60] sm:$0xff]  ;;  %v3253_v12 = vld [vmem:[#allocation9 + $0x58] sm:$0xff]  ;;  %v3252_v62 = vld [vmem:[#allocation9 + $0x50] sm:$0xff]  ;;  %s7449_s27 = smov %s7448_s18 }
 0x310   : > { %3275 = vmatpush.msra.mxu0 %v3256_v52  ;;  %v3270_v42 = vld [vmem:[#allocation9 + $0xe0] sm:$0xff]  ;;  %v3269_v4 = vld [vmem:[#allocation9 + $0xd8] sm:$0xff]  ;;  %v3268_v25 = vld [vmem:[#allocation9 + $0xd0] sm:$0xff] }
 0x311   : > { %3304 = vmatpush.msra.mxu1 %v3272_v7  ;;  %v3251_v61 = vld [vmem:[#allocation9 + $0x48] sm:$0xff]  ;;  %v3250_v5 = vld [vmem:[#allocation9 + $0x40] sm:$0xff]  ;;  %v3249_v29 = vld [vmem:[#allocation9 + $0x38] sm:$0xff] }
 0x312   : > { %3276 = vmatpush.msra.mxu0 %v3255_v59  ;;  %v3267_v53 = vld [vmem:[#allocation9 + $0xc8] sm:$0xff]  ;;  %v3266_v56 = vld [vmem:[#allocation9 + $0xc0] sm:$0xff]  ;;  %v3265_v50 = vld [vmem:[#allocation9 + $0xb8] sm:$0xff] }
 0x313   : > { %3305 = vmatpush.msra.mxu1 %v3271_v60  ;;  %v3248_v55 = vld [vmem:[#allocation9 + $0x30] sm:$0xff]  ;;  %v3247_v9 = vld [vmem:[#allocation9 + $0x28] sm:$0xff]  ;;  %v3246_v47 = vld [vmem:[#allocation9 + $0x20] sm:$0xff] }
 0x314   : > { %3277 = vmatpush.msra.mxu0 %v3254_v43  ;;  %v3264_v63 = vld [vmem:[#allocation9 + $0xb0] sm:$0xff]  ;;  %v3263_v46 = vld [vmem:[#allocation9 + $0xa8] sm:$0xff]  ;;  %v3262_v49 = vld [vmem:[#allocation9 + $0xa0] sm:$0xff] }
 0x315   : > { %3306 = vmatpush.msra.mxu1 %v3270_v42  ;;  %v3245_v57 = vld [vmem:[#allocation9 + $0x18] sm:$0xff]  ;;  %v3244_v8 = vld [vmem:[#allocation9 + $0x10] sm:$0xff]  ;;  %v3243_v36 = vld [vmem:[#allocation9 + $0x8] sm:$0xff] }
 0x316   : > { %3278 = vmatpush.msra.mxu0 %v3253_v12  ;;  %v3261_v41 = vld [vmem:[#allocation9 + $0x98] sm:$0xff]  ;;  %v3260_v6 = vld [vmem:[#allocation9 + $0x90] sm:$0xff]  ;;  %v3259_v37 = vld [vmem:[#allocation9 + $0x88] sm:$0xff] }
 0x317   : > { %3307 = vmatpush.msra.mxu1 %v3269_v4  ;;  %v3404_v32 = vld [vmem:[#allocation11 + $0xf8] sm:$0xff]  ;;  %v3230_v18 = vld [vmem:[#allocation3 + $0x10] sm:$0xff]  ;;  %v3402_v19 = vld [vmem:[#allocation11 + $0xe8] sm:$0xff] }
 0x318   : > { %3279 = vmatpush.msra.mxu0 %v3252_v62  ;;  %v3369_v40 = vld [vmem:[#allocation11 + $0x78] sm:$0xff]  ;;  %v3403_v44 = vld [vmem:[#allocation11 + $0xf0] sm:$0xff]  ;;  %3405 = vmatpush.msra.mxu2 %v3404_v32  ;;  %v3367_v16 = vld [vmem:[#allocation11 + $0x68] sm:$0xff]  ;;  %v3234_v15 = vunpack.c.l.bf16 %v3230_v18  ;;  %v3235_v22 = vunpack.c.h.bf16 %v3230_v18 }
 0x319   : > { %3308 = vmatpush.msra.mxu1 %v3268_v25  ;;  %v3368_v34 = vld [vmem:[#allocation11 + $0x70] sm:$0xff]  ;;  %3425 = vmatpush.msra.mxu3 %v3369_v40  ;;  %v3242_v23 = vld [vmem:[#allocation9] sm:$0xff]  ;;  %v5238_v24 = vld [vmem:[%s7445_s22 + $0xf8] sm:$0xff] }
 0x31a   : > { %3280 = vmatpush.msra.mxu0 %v3251_v61  ;;  %v3258_v13 = vld [vmem:[#allocation9 + $0x80] sm:$0xff]  ;;  %3406 = vmatpush.msra.mxu2 %v3403_v44  ;;  %v3385_v14 = vld [vmem:[%s7446_s30 + $0x78] sm:$0xff]  ;;  %v5237_v28 = vld [vmem:[%s7446_s30 + $0xf0] sm:$0xff] }
 0x31b   : > { %3309 = vmatpush.msra.mxu1 %v3267_v53  ;;  %3426 = vmatpush.msra.mxu3 %v3368_v34  ;;  %v3401_v51 = vld [vmem:[#allocation11 + $0xe0] sm:$0xff]  ;;  %v3384_v17 = vld [vmem:[%s7446_s30 + $0x70] sm:$0xff]  ;;  %v3231_v11 = vld [vmem:[#allocation3 + $0x18] sm:$0xff] }
 0x31c   : > { %3281 = vmatpush.msra.mxu0 %v3250_v5  ;;  %3407 = vmatpush.msra.mxu2 %v3402_v19  ;;  %v3366_v58 = vld [vmem:[#allocation11 + $0x60] sm:$0xff]  ;;  %v3400_v3 = vld [vmem:[#allocation11 + $0xd8] sm:$0xff]  ;;  %v5236_v21 = vld [vmem:[%s7446_s30 + $0xe8] sm:$0xff]  ;;  %v3236_v39 = vunpack.c.l.bf16 %v3231_v11  ;;  %v3237_v30 = vunpack.c.h.bf16 %v3231_v11 }
 0x31d   : > { %3310 = vmatpush.msra.mxu1 %v3266_v56  ;;  %3427 = vmatpush.msra.mxu3 %v3367_v16  ;;  %v3365_v31 = vld [vmem:[#allocation11 + $0x58] sm:$0xff]  ;;  %v3383_v48 = vld [vmem:[%s7446_s30 + $0x68] sm:$0xff]  ;;  %v3399_v27 = vld [vmem:[#allocation11 + $0xd0] sm:$0xff] }
 0x31e   : > { %3282 = vmatpush.msra.mxu0 %v3249_v29  ;;  %3408 = vmatpush.msra.mxu2 %v3401_v51  ;;  %v3364_v54 = vld [vmem:[#allocation11 + $0x50] sm:$0xff]  ;;  %v5235_v33 = vld [vmem:[%s7446_s30 + $0xe0] sm:$0xff]  ;;  %v5234_v2 = vld [vmem:[%s7446_s30 + $0xd8] sm:$0xff] }
 0x31f   : > { %3311 = vmatpush.msra.mxu1 %v3265_v50  ;;  %3428 = vmatpush.msra.mxu3 %v3366_v58  ;;  %v3382_v1 = vld [vmem:[%s7446_s30 + $0x60] sm:$0xff]  ;;  %v3381_v0 = vld [vmem:[%s7446_s30 + $0x58] sm:$0xff]  ;;  %v3398_v26 = vld [vmem:[#allocation11 + $0xc8] sm:$0xff] }
 0x320   : > { %3283 = vmatpush.msra.mxu0 %v3248_v55  ;;  %3409 = vmatpush.msra.mxu2 %v3400_v3  ;;  %v3363_v45 = vld [vmem:[#allocation11 + $0x48] sm:$0xff]  ;;  %v5233_v35 = vld [vmem:[%s7446_s30 + $0xd0] sm:$0xff]  ;;  %v3232_v10 = vld [vmem:[#allocation3 + $0x20] sm:$0xff] }
 0x321   : > { %3312 = vmatpush.msra.mxu1 %v3264_v63  ;;  %3429 = vmatpush.msra.mxu3 %v3365_v31  ;;  %v3380_v20 = vld [vmem:[%s7446_s30 + $0x50] sm:$0xff]  ;;  %v3397_v38 = vld [vmem:[#allocation11 + $0xc0] sm:$0xff]  ;;  %v5232_v7 = vld [vmem:[%s7446_s30 + $0xc8] sm:$0xff]  ;;  %v3238_v42 = vunpack.c.l.bf16 %v3232_v10  ;;  %v3239_v12 = vunpack.c.h.bf16 %v3232_v10 }
 0x322   : > { %3284 = vmatpush.msra.mxu0 %v3247_v9  ;;  %3410 = vmatpush.msra.mxu2 %v3399_v27  ;;  %v3362_v52 = vld [vmem:[#allocation11 + $0x40] sm:$0xff]  ;;  %v3379_v59 = vld [vmem:[%s7446_s30 + $0x48] sm:$0xff]  ;;  %v3396_v60 = vld [vmem:[#allocation11 + $0xb8] sm:$0xff] }
 0x323   : > { %3313 = vmatpush.msra.mxu1 %v3263_v46  ;;  %3430 = vmatpush.msra.mxu3 %v3364_v54  ;;  %v3361_v43 = vld [vmem:[#allocation11 + $0x38] sm:$0xff]  ;;  %v5231_v4 = vld [vmem:[%s7446_s30 + $0xc0] sm:$0xff]  ;;  %v3395_v53 = vld [vmem:[#allocation11 + $0xb0] sm:$0xff] }
 0x324   : > { %3285 = vmatpush.msra.mxu0 %v3246_v47  ;;  %3411 = vmatpush.msra.mxu2 %v3398_v26  ;;  %v3378_v62 = vld [vmem:[%s7446_s30 + $0x40] sm:$0xff]  ;;  %v5230_v25 = vld [vmem:[%s7446_s30 + $0xb8] sm:$0xff]  ;;  %v3360_v5 = vld [vmem:[#allocation11 + $0x30] sm:$0xff] }
 0x325   : > { %3314 = vmatpush.msra.mxu1 %v3262_v49  ;;  %3431 = vmatpush.msra.mxu3 %v3363_v45  ;;  %v3377_v61 = vld [vmem:[%s7446_s30 + $0x38] sm:$0xff]  ;;  %v5229_v56 = vld [vmem:[%s7446_s30 + $0xb0] sm:$0xff]  ;;  %v3233_v50 = vld [vmem:[#allocation3 + $0x28] sm:$0xff] }
 0x326   : > { %3286 = vmatpush.msra.mxu0 %v3245_v57  ;;  %3412 = vmatpush.msra.mxu2 %v3397_v38  ;;  %v3376_v29 = vld [vmem:[%s7446_s30 + $0x30] sm:$0xff]  ;;  %v3394_v55 = vld [vmem:[#allocation11 + $0xa8] sm:$0xff]  ;;  %v3393_v47 = vld [vmem:[#allocation11 + $0xa0] sm:$0xff]  ;;  %v3240_v57 = vunpack.c.l.bf16 %v3233_v50 }
 0x327   : > { %3315 = vmatpush.msra.mxu1 %v3261_v41  ;;  %3432 = vmatpush.msra.mxu3 %v3362_v52  ;;  %v3359_v63 = vld [vmem:[#allocation11 + $0x28] sm:$0xff]  ;;  %v3358_v49 = vld [vmem:[#allocation11 + $0x20] sm:$0xff]  ;;  %v3241_v41 = vunpack.c.h.bf16 %v3233_v50  ;;  %v3392_v32 = vld [vmem:[#allocation11 + $0x98] sm:$0xff] }
 0x328   : > { %3287 = vmatpush.msra.mxu0 %v3244_v8  ;;  %3413 = vmatpush.msra.mxu2 %v3396_v60  ;;  %v5228_v9 = vld [vmem:[%s7446_s30 + $0xa8] sm:$0xff]  ;;  %v5227_v8 = vld [vmem:[%s7446_s30 + $0xa0] sm:$0xff]  ;;  %v3357_v40 = vld [vmem:[#allocation11 + $0x18] sm:$0xff] }
 0x329   : > { %3316 = vmatpush.msra.mxu1 %v3260_v6  ;;  %3433 = vmatpush.msra.mxu3 %v3361_v43  ;;  %v3375_v46 = vld [vmem:[%s7446_s30 + $0x28] sm:$0xff]  ;;  %v3374_v6 = vld [vmem:[%s7446_s30 + $0x20] sm:$0xff]  ;;  %v5226_v18 = vld [vmem:[%s7446_s30 + $0x98] sm:$0xff] }
 0x32a   : > { %3288 = vmatpush.msra.mxu0 %v3243_v36  ;;  %3414 = vmatpush.msra.mxu2 %v3395_v53  ;;  %v3373_v44 = vld [vmem:[%s7446_s30 + $0x18] sm:$0xff]  ;;  %v3391_v34 = vld [vmem:[#allocation11 + $0x90] sm:$0xff]  ;;  %v3390_v16 = vld [vmem:[#allocation11 + $0x88] sm:$0xff] }
 0x32b   : > { %3317 = vmatpush.msra.mxu1 %v3259_v37  ;;  %3434 = vmatpush.msra.mxu3 %v3360_v5  ;;  %v3356_v36 = vld [vmem:[#allocation11 + $0x10] sm:$0xff]  ;;  %v3370_v51 = vld [vmem:[%s7446_s30] sm:$0xff]  ;;  %v3520_v58 = vld [vmem:[#allocation11 + $0x178] sm:$0xff] }
 0x32c   : > { %3289 = vmatpush.msra.mxu0 %v3242_v23  ;;  %3415 = vmatpush.msra.mxu2 %v3394_v55  ;;  %v5225_v37 = vld [vmem:[%s7446_s30 + $0x90] sm:$0xff]  ;;  %v3355_v23 = vld [vmem:[#allocation11 + $0x8] sm:$0xff]  ;;  %v5270_v11 = vld [vmem:[%s7446_s30 + $0x1f8] sm:$0xff] }
 0x32d   : > { %3318 = vmatpush.msra.mxu1 %v3258_v13  ;;  %3290 = vmatmul.f32.vlgmr.msra.gmra.mxu0 %v3234_v15  ;;  %v3372_v19 = vld [vmem:[%s7446_s30 + $0x10] sm:$0xff]  ;;  %v5224_v13 = vld [vmem:[%s7446_s30 + $0x88] sm:$0xff]  ;;  %v3516_v26 = vld [vmem:[#allocation11 + $0x158] sm:$0xff] }
 0x32e   : > { %3319 = vmatmul.f32.vlgmr.msra.gmra.mxu1 %v3235_v22  ;;  %3462 = vmatpush.msrb.mxu0 %v5238_v24  ;;  %v3371_v15 = vld [vmem:[%s7446_s30 + $0x8] sm:$0xff]  ;;  %v3389_v22 = vld [vmem:[#allocation11 + $0x80] sm:$0xff]  ;;  %v3519_v3 = vld [vmem:[#allocation11 + $0x170] sm:$0xff] }
 0x32f   : > { %3482 = vmatpush.msrb.mxu1 %v3385_v14  ;;  %3435 = vmatpush.msra.mxu3 %v3359_v63  ;;  %v3354_v24 = vld [vmem:[#allocation11] sm:$0xff]  ;;  %v5253_v31 = vld [vmem:[%s7446_s30 + $0x170] sm:$0xff]  ;;  %v3518_v27 = vld [vmem:[#allocation11 + $0x168] sm:$0xff] }
 0x330   : > { %3463 = vmatpush.msrb.mxu0 %v5237_v28  ;;  %3416 = vmatpush.msra.mxu2 %v3393_v47  ;;  %v5223_v14 = vld [vmem:[%s7446_s30 + $0x80] sm:$0xff]  ;;  %v5254_v28 = vld [vmem:[%s7446_s30 + $0x178] sm:$0xff]  ;;  %v5252_v54 = vld [vmem:[%s7446_s30 + $0x168] sm:$0xff] }
 0x331   : > { %3483 = vmatpush.msrb.mxu1 %v3384_v17  ;;  %3436 = vmatpush.msra.mxu3 %v3358_v49  ;;  %v3598_v17 = vld [vmem:[#allocation11 + $0x1f8] sm:$0xff]  ;;  %v3515_v10 = vld [vmem:[#allocation11 + $0x150] sm:$0xff]  ;;  %v5248_v60 = vld [vmem:[%s7446_s30 + $0x148] sm:$0xff] }
 0x332   : > { %3464 = vmatpush.msrb.mxu0 %v5236_v21  ;;  %3417 = vmatpush.msra.mxu2 %v3392_v32  ;;  %v3597_v21 = vld [vmem:[#allocation11 + $0x1f0] sm:$0xff]  ;;  %v5250_v45 = vld [vmem:[%s7446_s30 + $0x158] sm:$0xff]  ;;  %v3592_v43 = vld [vmem:[#allocation11 + $0x1c8] sm:$0xff] }
 0x333   : > { %3484 = vmatpush.msrb.mxu1 %v3383_v48  ;;  %3437 = vmatpush.msra.mxu3 %v3357_v40  ;;  %v5269_v48 = vld [vmem:[%s7446_s30 + $0x1f0] sm:$0xff]  ;;  %v5246_v53 = vld [vmem:[%s7446_s30 + $0x138] sm:$0xff]  ;;  %v3588_v47 = vld [vmem:[#allocation11 + $0x1a8] sm:$0xff] }
 0x334   : > { %3465 = vmatpush.msrb.mxu0 %v5235_v33  ;;  %3418 = vmatpush.msra.mxu2 %v3391_v34  ;;  %v3517_v33 = vld [vmem:[#allocation11 + $0x160] sm:$0xff]  ;;  %v5249_v38 = vld [vmem:[%s7446_s30 + $0x150] sm:$0xff]  ;;  %v3590_v5 = vld [vmem:[#allocation11 + $0x1b8] sm:$0xff] }
 0x335   : > { %3485 = vmatpush.msrb.mxu1 %v3382_v1  ;;  %3293 = vmatmul.f32.gmra.mxu0 %v3236_v39  ;;  %v3596_v39 = vld [vmem:[#allocation11 + $0x1e8] sm:$0xff]  ;;  %v5251_v1 = vld [vmem:[%s7446_s30 + $0x160] sm:$0xff]  ;;  %v3593_v52 = vld [vmem:[#allocation11 + $0x1d0] sm:$0xff] }
 0x336   : > { %3322 = vmatmul.f32.gmra.mxu1 %v3237_v30  ;;  %3466 = vmatpush.msrb.mxu0 %v5234_v2  ;;  %v5268_v30 = vld [vmem:[%s7446_s30 + $0x1e8] sm:$0xff]  ;;  %v3595_v2 = vld [vmem:[#allocation11 + $0x1e0] sm:$0xff]  ;;  %v5245_v50 = vld [vmem:[%s7446_s30 + $0x130] sm:$0xff] }
 0x337   : > { %3486 = vmatpush.msrb.mxu1 %v3381_v0  ;;  %3438 = vmatpush.msra.mxu3 %v3356_v36  ;;  %v5267_v0 = vld [vmem:[%s7446_s30 + $0x1e0] sm:$0xff]  ;;  %v3589_v55 = vld [vmem:[#allocation11 + $0x1b0] sm:$0xff]  ;;  %v5260_v49 = vld [vmem:[%s7446_s30 + $0x1a8] sm:$0xff] }
 0x338   : > { %3467 = vmatpush.msrb.mxu0 %v5233_v35  ;;  %3419 = vmatpush.msra.mxu2 %v3390_v16  ;;  %v3594_v35 = vld [vmem:[#allocation11 + $0x1d8] sm:$0xff]  ;;  %v5261_v63 = vld [vmem:[%s7446_s30 + $0x1b0] sm:$0xff]  ;;  %v3506_v16 = vld [vmem:[#allocation11 + $0x108] sm:$0xff] }
 0x339   : > { %3487 = vmatpush.msrb.mxu1 %v3380_v20  ;;  %3439 = vmatpush.msra.mxu3 %v3355_v23  ;;  %v5266_v20 = vld [vmem:[%s7446_s30 + $0x1d8] sm:$0xff]  ;;  %v3507_v34 = vld [vmem:[#allocation11 + $0x110] sm:$0xff]  ;;  %v5240_v23 = vld [vmem:[%s7446_s30 + $0x108] sm:$0xff] }
 0x33a   : > { %3468 = vmatpush.msrb.mxu0 %v5232_v7  ;;  %3420 = vmatpush.msra.mxu2 %v3389_v22  ;;  %v5265_v7 = vld [vmem:[%s7446_s30 + $0x1d0] sm:$0xff]  ;;  %v3508_v32 = vld [vmem:[#allocation11 + $0x118] sm:$0xff]  ;;  %v5256_v22 = vld [vmem:[%s7446_s30 + $0x188] sm:$0xff] }
 0x33b   : > { %3488 = vmatpush.msrb.mxu1 %v3379_v59  ;;  %3440 = vmatpush.msra.mxu3 %v3354_v24  ;;  %v3514_v59 = vld [vmem:[#allocation11 + $0x148] sm:$0xff]  ;;  %v5242_v40 = vld [vmem:[%s7446_s30 + $0x118] sm:$0xff]  ;;  %v5241_v36 = vld [vmem:[%s7446_s30 + $0x110] sm:$0xff] }
 0x33c   : > { %3469 = vmatpush.msrb.mxu0 %v5231_v4  ;;  %3521 = vmatpush.msrb.mxu2 %v3520_v58  ;;  %v5247_v4 = vld [vmem:[%s7446_s30 + $0x140] sm:$0xff] }
 0x33d   : > { %3489 = vmatpush.msrb.mxu1 %v3378_v62  ;;  %3296 = vmatmul.f32.gmra.mxu0 %v3238_v42  ;;  %v5264_v42 = vld [vmem:[%s7446_s30 + $0x1c8] sm:$0xff]  ;;  %v3591_v62 = vld [vmem:[#allocation11 + $0x1c0] sm:$0xff] }
 0x33e   : > { %3325 = vmatmul.f32.gmra.mxu1 %v3239_v12  ;;  %3470 = vmatpush.msrb.mxu0 %v5230_v25  ;;  %v3513_v12 = vld [vmem:[#allocation11 + $0x140] sm:$0xff] }
 0x33f   : > { %3490 = vmatpush.msrb.mxu1 %v3377_v61  ;;  %3559 = vmatpush.msrb.mxu3 %v5254_v28  ;;  %v5263_v25 = vld [vmem:[%s7446_s30 + $0x1c0] sm:$0xff]  ;;  %v3512_v61 = vld [vmem:[#allocation11 + $0x138] sm:$0xff] }
 0x340   : > { %3471 = vmatpush.msrb.mxu0 %v5229_v56  ;;  %3522 = vmatpush.msrb.mxu2 %v3519_v3  ;;  %v5262_v56 = vld [vmem:[%s7446_s30 + $0x1b8] sm:$0xff]  ;;  %v3505_v24 = vld [vmem:[#allocation11 + $0x100] sm:$0xff] }
 0x341   : > { %3491 = vmatpush.msrb.mxu1 %v3376_v29  ;;  %3560 = vmatpush.msrb.mxu3 %v5253_v31  ;;  %v3511_v29 = vld [vmem:[#allocation11 + $0x130] sm:$0xff]  ;;  %v5677_v3 = vld [vmem:[%s7447_s9 + $0x1] ss:$0 sm:$0xff] }
 0x342   : > { %3472 = vmatpush.msrb.mxu0 %v5228_v9  ;;  %3523 = vmatpush.msrb.mxu2 %v3518_v27  ;;  %v3510_v9 = vld [vmem:[#allocation11 + $0x128] sm:$0xff] }
 0x343   : > { %3492 = vmatpush.msrb.mxu1 %v3375_v46  ;;  %3561 = vmatpush.msrb.mxu3 %v5252_v54  ;;  %v5244_v46 = vld [vmem:[%s7446_s30 + $0x128] sm:$0xff] }
 0x344   : > { %3473 = vmatpush.msrb.mxu0 %v5227_v8  ;;  %3524 = vmatpush.msrb.mxu2 %v3517_v33  ;;  %v3587_v8 = vld [vmem:[#allocation11 + $0x1a0] sm:$0xff] }
 0x345   : > { %3493 = vmatpush.msrb.mxu1 %v3374_v6  ;;  %3299 = vmatmul.f32.gmra.mxu0 %v3240_v57  ;;  %v3509_v57 = vld [vmem:[#allocation11 + $0x120] sm:$0xff] }
 0x346   : > { %3328 = vmatmul.f32.gmra.mxu1 %v3241_v41  ;;  %3474 = vmatpush.msrb.mxu0 %v5226_v18  ;;  %v5243_v41 = vld [vmem:[%s7446_s30 + $0x120] sm:$0xff]  ;;  %v3586_v18 = vld [vmem:[#allocation11 + $0x198] sm:$0xff] }
 0x347   : > { %3494 = vmatpush.msrb.mxu1 %v3373_v44  ;;  %3562 = vmatpush.msrb.mxu3 %v5251_v1  ;;  %v5259_v6 = vld [vmem:[%s7446_s30 + $0x1a0] sm:$0xff]  ;;  %v5258_v44 = vld [vmem:[%s7446_s30 + $0x198] sm:$0xff] }
 0x348   : > { %3475 = vmatpush.msrb.mxu0 %v5225_v37  ;;  %3525 = vmatpush.msrb.mxu2 %v3516_v26  ;;  %v3585_v37 = vld [vmem:[#allocation11 + $0x190] sm:$0xff] }
 0x349   : > { %3495 = vmatpush.msrb.mxu1 %v3372_v19  ;;  %3563 = vmatpush.msrb.mxu3 %v5250_v45  ;;  %v5257_v19 = vld [vmem:[%s7446_s30 + $0x190] sm:$0xff] }
 0x34a   : > { %3476 = vmatpush.msrb.mxu0 %v5224_v13  ;;  %3526 = vmatpush.msrb.mxu2 %v3515_v10  ;;  %v3584_v13 = vld [vmem:[#allocation11 + $0x188] sm:$0xff] }
 0x34b   : > { %3496 = vmatpush.msrb.mxu1 %v3371_v15  ;;  %3564 = vmatpush.msrb.mxu3 %v5249_v38  ;;  %v5676_v15 = vld [vmem:[%s7447_s9] ss:$0 sm:$0xff] }
 0x34c   : > { %3477 = vmatpush.msrb.mxu0 %v5223_v14  ;;  %3527 = vmatpush.msrb.mxu2 %v3514_v59  ;;  %v5239_v14 = vld [vmem:[%s7446_s30 + $0x100] sm:$0xff] }
 0x34d   : > { %3497 = vmatpush.msrb.mxu1 %v3370_v51  ;;  %3565 = vmatpush.msrb.mxu3 %v5248_v60  ;;  %v3583_v51 = vld [vmem:[#allocation11 + $0x180] sm:$0xff] }
 0x34e   : > { %3599 = vmatpush.msra.mxu0 %v3598_v17  ;;  %3528 = vmatpush.msrb.mxu2 %v3513_v12  ;;  %v5255_v17 = vld [vmem:[%s7446_s30 + $0x180] sm:$0xff] }
 0x34f   : > { %3637 = vmatpush.msra.mxu1 %v5270_v11  ;;  %3566 = vmatpush.msrb.mxu3 %v5247_v4 }
 0x350   : > { %3600 = vmatpush.msra.mxu0 %v3597_v21  ;;  %3529 = vmatpush.msrb.mxu2 %v3512_v61  ;;  %v3675_v61 = vld [vmem:[#allocation11 + $0x270] sm:$0xff] }
 0x351   : > { %3638 = vmatpush.msra.mxu1 %v5269_v48  ;;  %3567 = vmatpush.msrb.mxu3 %v5246_v53  ;;  %v5285_v53 = vld [vmem:[%s7446_s30 + $0x270] sm:$0xff] }
 0x352   : > { %3601 = vmatpush.msra.mxu0 %v3596_v39  ;;  %3530 = vmatpush.msrb.mxu2 %v3511_v29  ;;  %v3674_v29 = vld [vmem:[#allocation11 + $0x268] sm:$0xff] }
 0x353   : > { %3639 = vmatpush.msra.mxu1 %v5268_v30  ;;  %3568 = vmatpush.msrb.mxu3 %v5245_v50  ;;  %v5284_v50 = vld [vmem:[%s7446_s30 + $0x268] sm:$0xff] }
 0x354   : > { %3602 = vmatpush.msra.mxu0 %v3595_v2  ;;  %3531 = vmatpush.msrb.mxu2 %v3510_v9  ;;  %v3673_v9 = vld [vmem:[#allocation11 + $0x260] sm:$0xff] }
 0x355   : > { %3640 = vmatpush.msra.mxu1 %v5267_v0  ;;  %3569 = vmatpush.msrb.mxu3 %v5244_v46  ;;  %v5283_v46 = vld [vmem:[%s7446_s30 + $0x260] sm:$0xff] }
 0x356   : > { %3603 = vmatpush.msra.mxu0 %v3594_v35  ;;  %3532 = vmatpush.msrb.mxu2 %v3509_v57 }
 0x357   : > { %3641 = vmatpush.msra.mxu1 %v5266_v20  ;;  %3570 = vmatpush.msrb.mxu3 %v5243_v41  ;;  %v3672_v41 = vld [vmem:[#allocation11 + $0x258] sm:$0xff] }
 0x358   : > { %3604 = vmatpush.msra.mxu0 %v3593_v52  ;;  %3533 = vmatpush.msrb.mxu2 %v3508_v32  ;;  %v3750_v32 = vld [vmem:[#allocation11 + $0x2d8] sm:$0xff] }
 0x359   : > { %3642 = vmatpush.msra.mxu1 %v5265_v7  ;;  %3571 = vmatpush.msrb.mxu3 %v5242_v40  ;;  %v5298_v40 = vld [vmem:[%s7446_s30 + $0x2d8] sm:$0xff] }
 0x35a   : > { %3605 = vmatpush.msra.mxu0 %v3592_v43  ;;  %3534 = vmatpush.msrb.mxu2 %v3507_v34  ;;  %v3676_v43 = vld [vmem:[#allocation11 + $0x278] sm:$0xff]  ;;  %v3749_v34 = vld [vmem:[#allocation11 + $0x2d0] sm:$0xff] }
 0x35b   : > { %3643 = vmatpush.msra.mxu1 %v5264_v42  ;;  %3572 = vmatpush.msrb.mxu3 %v5241_v36  ;;  %v5286_v42 = vld [vmem:[%s7446_s30 + $0x278] sm:$0xff]  ;;  %v5297_v36 = vld [vmem:[%s7446_s30 + $0x2d0] sm:$0xff] }
 0x35c   : > { %3606 = vmatpush.msra.mxu0 %v3591_v62  ;;  %3535 = vmatpush.msrb.mxu2 %v3506_v16  ;;  %v3754_v62 = vld [vmem:[#allocation11 + $0x2f8] sm:$0xff]  ;;  %v3748_v16 = vld [vmem:[#allocation11 + $0x2c8] sm:$0xff] }
 0x35d   : > { %3644 = vmatpush.msra.mxu1 %v5263_v25  ;;  %3573 = vmatpush.msrb.mxu3 %v5240_v23  ;;  %v5302_v25 = vld [vmem:[%s7446_s30 + $0x2f8] sm:$0xff]  ;;  %v5296_v23 = vld [vmem:[%s7446_s30 + $0x2c8] sm:$0xff] }
 0x35e   : > { %3607 = vmatpush.msra.mxu0 %v3590_v5  ;;  %3536 = vmatpush.msrb.mxu2 %v3505_v24  ;;  %v3753_v5 = vld [vmem:[#allocation11 + $0x2f0] sm:$0xff]  ;;  %v5295_v24 = vld [vmem:[%s7446_s30 + $0x2c0] sm:$0xff] }
 0x35f   : > { %3645 = vmatpush.msra.mxu1 %v5262_v56  ;;  %3574 = vmatpush.msrb.mxu3 %v5239_v14  ;;  %v5301_v56 = vld [vmem:[%s7446_s30 + $0x2f0] sm:$0xff]  ;;  %v3668_v14 = vld [vmem:[#allocation11 + $0x238] sm:$0xff] }
 0x360   : > { %3608 = vmatpush.msra.mxu0 %v3589_v55  ;;  %v3752_v55 = vld [vmem:[#allocation11 + $0x2e8] sm:$0xff] }
 0x361   : > { %3646 = vmatpush.msra.mxu1 %v5261_v63  ;;  %v5300_v63 = vld [vmem:[%s7446_s30 + $0x2e8] sm:$0xff] }
 0x362   : > { %3609 = vmatpush.msra.mxu0 %v3588_v47  ;;  %v3751_v47 = vld [vmem:[#allocation11 + $0x2e0] sm:$0xff] }
 0x363   : > { %3647 = vmatpush.msra.mxu1 %v5260_v49  ;;  %v5299_v49 = vld [vmem:[%s7446_s30 + $0x2e0] sm:$0xff] }
 0x364   : > { %3610 = vmatpush.msra.mxu0 %v3587_v8  ;;  %v5282_v8 = vld [vmem:[%s7446_s30 + $0x258] sm:$0xff] }
 0x365   : > { %3648 = vmatpush.msra.mxu1 %v5259_v6 }
 0x366   : > { %3611 = vmatpush.msra.mxu0 %v3586_v18  ;;  %v3671_v18 = vld [vmem:[#allocation11 + $0x250] sm:$0xff] }
 0x367   : > { %3649 = vmatpush.msra.mxu1 %v5258_v44  ;;  %v5281_v44 = vld [vmem:[%s7446_s30 + $0x250] sm:$0xff] }
 0x368   : > { %3612 = vmatpush.msra.mxu0 %v3585_v37  ;;  %v3670_v37 = vld [vmem:[#allocation11 + $0x248] sm:$0xff] }
 0x369   : > { %3650 = vmatpush.msra.mxu1 %v5257_v19  ;;  %v5280_v19 = vld [vmem:[%s7446_s30 + $0x248] sm:$0xff] }
 0x36a   : > { %3613 = vmatpush.msra.mxu0 %v3584_v13  ;;  %v3669_v13 = vld [vmem:[#allocation11 + $0x240] sm:$0xff] }
 0x36b   : > { %3651 = vmatpush.msra.mxu1 %v5256_v22  ;;  %v3747_v22 = vld [vmem:[#allocation11 + $0x2c0] sm:$0xff] }
 0x36c   : > { %3614 = vmatpush.msra.mxu0 %v3583_v51  ;;  %v5278_v51 = vld [vmem:[%s7446_s30 + $0x238] sm:$0xff] }
 0x36d   : > { %3652 = vmatpush.msra.mxu1 %v5255_v17  ;;  %v3667_v17 = vld [vmem:[#allocation11 + $0x230] sm:$0xff] }
 0x3aa   : > { %v3291_v58 = vpop.f32.mrf.mxu0 }
 0x3ab   : > { %v3320_v28 = vpop.f32.mrf.mxu1 }
 0x3ac   : > { %v3321_v11 = vadd.f32 %v3320_v28, %v3291_v58  ;;  %v3746_v58 = vld [vmem:[#allocation11 + $0x2b8] sm:$0xff] }
 0x3ad   : > { %v5294_v28 = vld [vmem:[%s7446_s30 + $0x2b8] sm:$0xff] }
 0x3ae   : > { %v3334_v31 = vmul.f32 %v5676_v15, %v3321_v11  ;;  %v5277_v11 = vld [vmem:[%s7446_s30 + $0x230] sm:$0xff] }
 0x3b0   : > { %v3340_v21 = vadd.f32 %v5677_v3, %v3334_v31  ;;  %v5293_v31 = vld [vmem:[%s7446_s30 + $0x2b0] sm:$0xff] }
 0x3b2   : > { %v3344_v48 = vmax.f32 %v3340_v21, 0.0  ;;  %v3294_v27 = vpop.f32.mrf.mxu0  ;;  %v3666_v21 = vld [vmem:[#allocation11 + $0x228] sm:$0xff] }
 0x3b3   : > { %v3323_v54 = vpop.f32.mrf.mxu1 }
 0x3b4   : > { %3348 = vst [vmem:[#allocation5] sm:$0xff] %v3344_v48  ;;  %v3324_v39 = vadd.f32 %v3323_v54, %v3294_v27  ;;  %v5276_v48 = vld [vmem:[%s7446_s30 + $0x228] sm:$0xff] }
 0x3b5   : > { %v3744_v27 = vld [vmem:[#allocation11 + $0x2a8] sm:$0xff] }
 0x3b6   : > { %v3335_v30 = vmul.f32 %v5676_v15, %v3324_v39  ;;  %v5292_v54 = vld [vmem:[%s7446_s30 + $0x2a8] sm:$0xff]  ;;  %v3665_v39 = vld [vmem:[#allocation11 + $0x220] sm:$0xff] }
 0x3b8   : > { %v3341_v33 = vadd.f32 %v5677_v3, %v3335_v30  ;;  %v5275_v30 = vld [vmem:[%s7446_s30 + $0x220] sm:$0xff] }
 0x3ba   : > { %v3345_v1 = vmax.f32 %v3341_v33, 0.0  ;;  %v3297_v2 = vpop.f32.mrf.mxu0  ;;  %v3743_v33 = vld [vmem:[#allocation11 + $0x2a0] sm:$0xff] }
 0x3bb   : > { %v3326_v0 = vpop.f32.mrf.mxu1 }
 0x3bc   : > { %3349 = vst [vmem:[#allocation5 + $0x8] sm:$0xff] %v3345_v1  ;;  %v3327_v26 = vadd.f32 %v3326_v0, %v3297_v2  ;;  %v5291_v1 = vld [vmem:[%s7446_s30 + $0x2a0] sm:$0xff]  ;;  %v3664_v2 = vld [vmem:[#allocation11 + $0x218] sm:$0xff] }
 0x3bd   : > { %v5274_v0 = vld [vmem:[%s7446_s30 + $0x218] sm:$0xff] }
 0x3be   : > { %v3336_v45 = vmul.f32 %v5676_v15, %v3327_v26  ;;  %v3742_v26 = vld [vmem:[#allocation11 + $0x298] sm:$0xff] }
 0x3c0   : > { %v3342_v35 = vadd.f32 %v5677_v3, %v3336_v45  ;;  %v5290_v45 = vld [vmem:[%s7446_s30 + $0x298] sm:$0xff] }
 0x3c2   : > { %v3346_v20 = vmax.f32 %v3342_v35, 0.0  ;;  %v3300_v10 = vpop.f32.mrf.mxu0  ;;  %v3663_v35 = vld [vmem:[#allocation11 + $0x210] sm:$0xff] }
 0x3c3   : > { %v3329_v38 = vpop.f32.mrf.mxu1 }
 0x3c4   : > { %3350 = vst [vmem:[#allocation5 + $0x10] sm:$0xff] %v3346_v20  ;;  %v3330_v52 = vadd.f32 %v3329_v38, %v3300_v10  ;;  %v5273_v20 = vld [vmem:[%s7446_s30 + $0x210] sm:$0xff] }
 0x3c5   : > { %v3741_v10 = vld [vmem:[#allocation11 + $0x290] sm:$0xff] }
 0x3c6   : > { %v3337_v7 = vmul.f32 %v5676_v15, %v3330_v52  ;;  %v5279_v15 = vld [vmem:[%s7446_s30 + $0x240] sm:$0xff]  ;;  %v5289_v38 = vld [vmem:[%s7446_s30 + $0x290] sm:$0xff]  ;;  %v3662_v52 = vld [vmem:[#allocation11 + $0x208] sm:$0xff] }
 0x3c8   : > { %v3343_v59 = vadd.f32 %v5677_v3, %v3337_v7  ;;  %v3745_v3 = vld [vmem:[#allocation11 + $0x2b0] sm:$0xff]  ;;  %v5272_v7 = vld [vmem:[%s7446_s30 + $0x208] sm:$0xff] }
 0x3ca   : > { %v3347_v60 = vmax.f32 %v3343_v59, 0.0  ;;  %v3740_v59 = vld [vmem:[#allocation11 + $0x288] sm:$0xff] }
 0x3cb   : > { %v3387_v12 = vld [vmem:[#allocation5 + $0x2] ss:$16 sm:$0x3]  ;;  %v3353_v4 = vld [vmem:[#allocation5 + $0x1] ss:$16 sm:$0x3] }
 0x3cc   : > { %3351 = vst [vmem:[#allocation5 + $0x18] sm:$0xff] %v3347_v60  ;;  %3421 = vmatmul.f32.vlgmr.msra.gmra.mxu2 %v3387_v12  ;;  %3441 = vmatmul.f32.vlgmr.msra.gmra.mxu3 %v3353_v4  ;;  %v3503_v57 = vld [vmem:[#allocation5 + $0x3] ss:$16 sm:$0x3]  ;;  %v5288_v60 = vld [vmem:[%s7446_s30 + $0x288] sm:$0xff] }
 0x3cd   : > { %3478 = vmatmul.f32.vlgmr.msrb.gmra.mxu0 %v3387_v12  ;;  %3498 = vmatmul.f32.vlgmr.msrb.gmra.mxu1 %v3353_v4  ;;  %v3581_v6 = vld [vmem:[#allocation5 + $0x4] ss:$16 sm:$0x3] }
 0x3ce   : > { %3677 = vmatpush.msra.mxu2 %v3676_v43  ;;  %3715 = vmatpush.msra.mxu3 %v5286_v42  ;;  %v3661_v43 = vld [vmem:[#allocation11 + $0x200] sm:$0xff] }
 0x3cf   : > { %3755 = vmatpush.msrb.mxu0 %v3754_v62  ;;  %3793 = vmatpush.msrb.mxu1 %v5302_v25  ;;  %v5271_v42 = vld [vmem:[%s7446_s30 + $0x200] sm:$0xff]  ;;  %v3832_v25 = vld [vmem:[#allocation11 + $0x378] sm:$0xff] }
 0x3d0   : > { %3678 = vmatpush.msra.mxu2 %v3675_v61  ;;  %3716 = vmatpush.msra.mxu3 %v5285_v53  ;;  %v3739_v12 = vld [vmem:[#allocation11 + $0x280] sm:$0xff]  ;;  %v5318_v61 = vld [vmem:[%s7446_s30 + $0x378] sm:$0xff] }
 0x3d1   : > { %3756 = vmatpush.msrb.mxu0 %v3753_v5  ;;  %3794 = vmatpush.msrb.mxu1 %v5301_v56  ;;  %v5287_v4 = vld [vmem:[%s7446_s30 + $0x280] sm:$0xff]  ;;  %v3910_v5 = vld [vmem:[#allocation11 + $0x3f8] sm:$0xff] }
 0x3d2   : > { %3679 = vmatpush.msra.mxu2 %v3674_v29  ;;  %3717 = vmatpush.msra.mxu3 %v5284_v50  ;;  %v3659_v62 = vld [vmem:[#allocation5 + $0x5] ss:$16 sm:$0x3]  ;;  %v3737_v53 = vld [vmem:[#allocation5 + $0x6] ss:$16 sm:$0x3] }
 0x3d3   : > { %3757 = vmatpush.msrb.mxu0 %v3752_v55  ;;  %3795 = vmatpush.msrb.mxu1 %v5300_v63  ;;  %v5334_v56 = vld [vmem:[%s7446_s30 + $0x3f8] sm:$0xff]  ;;  %v3831_v29 = vld [vmem:[#allocation11 + $0x370] sm:$0xff] }
 0x3d4   : > { %3680 = vmatpush.msra.mxu2 %v3673_v9  ;;  %3718 = vmatpush.msra.mxu3 %v5283_v46  ;;  %v5317_v50 = vld [vmem:[%s7446_s30 + $0x370] sm:$0xff]  ;;  %v3830_v9 = vld [vmem:[#allocation11 + $0x368] sm:$0xff] }
 0x3d5   : > { %3758 = vmatpush.msrb.mxu0 %v3751_v47  ;;  %3796 = vmatpush.msrb.mxu1 %v5299_v49  ;;  %v3909_v55 = vld [vmem:[#allocation11 + $0x3f0] sm:$0xff]  ;;  %v5316_v46 = vld [vmem:[%s7446_s30 + $0x368] sm:$0xff] }
 0x3d6   : > { %3537 = vmatmul.f32.vlgmr.msrb.gmra.mxu2 %v3503_v57  ;;  %3575 = vmatmul.f32.vlgmr.msrb.gmra.mxu3 %v3503_v57  ;;  %v5333_v63 = vld [vmem:[%s7446_s30 + $0x3f0] sm:$0xff]  ;;  %v3908_v47 = vld [vmem:[#allocation11 + $0x3e8] sm:$0xff]  ;;  %v3829_v57 = vld [vmem:[#allocation11 + $0x360] sm:$0xff] }
 0x3d7   : > { %3615 = vmatmul.f32.vlgmr.msra.gmra.mxu0 %v3581_v6  ;;  %3653 = vmatmul.f32.vlgmr.msra.gmra.mxu1 %v3581_v6  ;;  %v5332_v49 = vld [vmem:[%s7446_s30 + $0x3e8] sm:$0xff]  ;;  %v5331_v6 = vld [vmem:[%s7446_s30 + $0x3e0] sm:$0xff] }
 0x3d8   : > { %3681 = vmatpush.msra.mxu2 %v3672_v41  ;;  %3719 = vmatpush.msra.mxu3 %v5282_v8  ;;  %v5315_v41 = vld [vmem:[%s7446_s30 + $0x360] sm:$0xff] }
 0x3d9   : > { %3759 = vmatpush.msrb.mxu0 %v3750_v32  ;;  %3797 = vmatpush.msrb.mxu1 %v5298_v40  ;;  %v3907_v8 = vld [vmem:[#allocation11 + $0x3e0] sm:$0xff]  ;;  %v3828_v32 = vld [vmem:[#allocation11 + $0x358] sm:$0xff] }
 0x3da   : > { %3682 = vmatpush.msra.mxu2 %v3671_v18  ;;  %3720 = vmatpush.msra.mxu3 %v5281_v44  ;;  %v5314_v40 = vld [vmem:[%s7446_s30 + $0x358] sm:$0xff] }
 0x3db   : > { %3760 = vmatpush.msrb.mxu0 %v3749_v34  ;;  %3798 = vmatpush.msrb.mxu1 %v5297_v36  ;;  %v3906_v18 = vld [vmem:[#allocation11 + $0x3d8] sm:$0xff]  ;;  %v3827_v34 = vld [vmem:[#allocation11 + $0x350] sm:$0xff] }
 0x3dc   : > { %3683 = vmatpush.msra.mxu2 %v3670_v37  ;;  %3721 = vmatpush.msra.mxu3 %v5280_v19  ;;  %v5330_v44 = vld [vmem:[%s7446_s30 + $0x3d8] sm:$0xff]  ;;  %v5313_v36 = vld [vmem:[%s7446_s30 + $0x350] sm:$0xff] }
 0x3dd   : > { %3761 = vmatpush.msrb.mxu0 %v3748_v16  ;;  %3799 = vmatpush.msrb.mxu1 %v5296_v23  ;;  %v3905_v37 = vld [vmem:[#allocation11 + $0x3d0] sm:$0xff]  ;;  %v3826_v16 = vld [vmem:[#allocation11 + $0x348] sm:$0xff] }
 0x3de   : > { %3684 = vmatpush.msra.mxu2 %v3669_v13  ;;  %3722 = vmatpush.msra.mxu3 %v5279_v15  ;;  %v5329_v19 = vld [vmem:[%s7446_s30 + $0x3d0] sm:$0xff]  ;;  %v5312_v23 = vld [vmem:[%s7446_s30 + $0x348] sm:$0xff] }
 0x3df   : > { %3762 = vmatpush.msrb.mxu0 %v3747_v22  ;;  %3800 = vmatpush.msrb.mxu1 %v5295_v24  ;;  %v3904_v13 = vld [vmem:[#allocation11 + $0x3c8] sm:$0xff]  ;;  %v3825_v22 = vld [vmem:[#allocation11 + $0x340] sm:$0xff] }
 0x3e0   : > { %3685 = vmatpush.msra.mxu2 %v3668_v14  ;;  %3723 = vmatpush.msra.mxu3 %v5278_v51  ;;  %v5328_v15 = vld [vmem:[%s7446_s30 + $0x3c8] sm:$0xff]  ;;  %v5311_v24 = vld [vmem:[%s7446_s30 + $0x340] sm:$0xff] }
 0x3e1   : > { %3763 = vmatpush.msrb.mxu0 %v3746_v58  ;;  %3801 = vmatpush.msrb.mxu1 %v5294_v28  ;;  %v3903_v14 = vld [vmem:[#allocation11 + $0x3c0] sm:$0xff]  ;;  %v3824_v58 = vld [vmem:[#allocation11 + $0x338] sm:$0xff] }
 0x3e2   : > { %3686 = vmatpush.msra.mxu2 %v3667_v17  ;;  %3724 = vmatpush.msra.mxu3 %v5277_v11  ;;  %v5327_v51 = vld [vmem:[%s7446_s30 + $0x3c0] sm:$0xff]  ;;  %v5310_v28 = vld [vmem:[%s7446_s30 + $0x338] sm:$0xff] }
 0x3e3   : > { %3764 = vmatpush.msrb.mxu0 %v3745_v3  ;;  %3802 = vmatpush.msrb.mxu1 %v5293_v31  ;;  %v3902_v17 = vld [vmem:[#allocation11 + $0x3b8] sm:$0xff]  ;;  %v3823_v3 = vld [vmem:[#allocation11 + $0x330] sm:$0xff] }
 0x3e4   : > { %3687 = vmatpush.msra.mxu2 %v3666_v21  ;;  %3725 = vmatpush.msra.mxu3 %v5276_v48  ;;  %v5326_v11 = vld [vmem:[%s7446_s30 + $0x3b8] sm:$0xff]  ;;  %v5309_v31 = vld [vmem:[%s7446_s30 + $0x330] sm:$0xff] }
 0x3e5   : > { %3765 = vmatpush.msrb.mxu0 %v3744_v27  ;;  %3803 = vmatpush.msrb.mxu1 %v5292_v54  ;;  %v3901_v21 = vld [vmem:[#allocation11 + $0x3b0] sm:$0xff]  ;;  %v3822_v27 = vld [vmem:[#allocation11 + $0x328] sm:$0xff] }
 0x3e6   : > { %3688 = vmatpush.msra.mxu2 %v3665_v39  ;;  %3726 = vmatpush.msra.mxu3 %v5275_v30  ;;  %v5325_v48 = vld [vmem:[%s7446_s30 + $0x3b0] sm:$0xff]  ;;  %v5308_v54 = vld [vmem:[%s7446_s30 + $0x328] sm:$0xff] }
 0x3e7   : > { %3766 = vmatpush.msrb.mxu0 %v3743_v33  ;;  %3804 = vmatpush.msrb.mxu1 %v5291_v1  ;;  %v3900_v39 = vld [vmem:[#allocation11 + $0x3a8] sm:$0xff]  ;;  %v3821_v33 = vld [vmem:[#allocation11 + $0x320] sm:$0xff] }
 0x3e8   : > { %3689 = vmatpush.msra.mxu2 %v3664_v2  ;;  %3727 = vmatpush.msra.mxu3 %v5274_v0  ;;  %v5324_v30 = vld [vmem:[%s7446_s30 + $0x3a8] sm:$0xff]  ;;  %v5307_v1 = vld [vmem:[%s7446_s30 + $0x320] sm:$0xff] }
 0x3e9   : > { %3767 = vmatpush.msrb.mxu0 %v3742_v26  ;;  %3805 = vmatpush.msrb.mxu1 %v5290_v45  ;;  %v3899_v2 = vld [vmem:[#allocation11 + $0x3a0] sm:$0xff]  ;;  %v3820_v26 = vld [vmem:[#allocation11 + $0x318] sm:$0xff] }
 0x3ea   : > { %3690 = vmatpush.msra.mxu2 %v3663_v35  ;;  %3728 = vmatpush.msra.mxu3 %v5273_v20  ;;  %v5323_v0 = vld [vmem:[%s7446_s30 + $0x3a0] sm:$0xff]  ;;  %v5306_v45 = vld [vmem:[%s7446_s30 + $0x318] sm:$0xff] }
 0x3eb   : > { %3768 = vmatpush.msrb.mxu0 %v3741_v10  ;;  %3806 = vmatpush.msrb.mxu1 %v5289_v38  ;;  %v3898_v35 = vld [vmem:[#allocation11 + $0x398] sm:$0xff]  ;;  %v3819_v10 = vld [vmem:[#allocation11 + $0x310] sm:$0xff] }
 0x3ec   : > { %3691 = vmatpush.msra.mxu2 %v3662_v52  ;;  %3729 = vmatpush.msra.mxu3 %v5272_v7  ;;  %v5322_v20 = vld [vmem:[%s7446_s30 + $0x398] sm:$0xff]  ;;  %v5305_v38 = vld [vmem:[%s7446_s30 + $0x310] sm:$0xff] }
 0x3ed   : > { %3769 = vmatpush.msrb.mxu0 %v3740_v59  ;;  %3807 = vmatpush.msrb.mxu1 %v5288_v60  ;;  %v3897_v52 = vld [vmem:[#allocation11 + $0x390] sm:$0xff]  ;;  %v3818_v59 = vld [vmem:[#allocation11 + $0x308] sm:$0xff] }
 0x3ee   : > { %3692 = vmatpush.msra.mxu2 %v3661_v43  ;;  %3730 = vmatpush.msra.mxu3 %v5271_v42  ;;  %v5321_v7 = vld [vmem:[%s7446_s30 + $0x390] sm:$0xff]  ;;  %v5304_v60 = vld [vmem:[%s7446_s30 + $0x308] sm:$0xff] }
 0x3ef   : > { %3770 = vmatpush.msrb.mxu0 %v3739_v12  ;;  %3808 = vmatpush.msrb.mxu1 %v5287_v4  ;;  %v3896_v43 = vld [vmem:[#allocation11 + $0x388] sm:$0xff]  ;;  %v3817_v12 = vld [vmem:[#allocation11 + $0x300] sm:$0xff] }
 0x3f0   : > { %3693 = vmatmul.f32.vlgmr.msra.gmra.mxu2 %v3659_v62  ;;  %3731 = vmatmul.f32.vlgmr.msra.gmra.mxu3 %v3659_v62  ;;  %v5320_v42 = vld [vmem:[%s7446_s30 + $0x388] sm:$0xff]  ;;  %v5303_v4 = vld [vmem:[%s7446_s30 + $0x300] sm:$0xff] }
 0x3f1   : > { %3771 = vmatmul.f32.vlgmr.msrb.gmra.mxu0 %v3737_v53  ;;  %3809 = vmatmul.f32.vlgmr.msrb.gmra.mxu1 %v3737_v53  ;;  %v3895_v62 = vld [vmem:[#allocation11 + $0x380] sm:$0xff]  ;;  %v3893_v53 = vld [vmem:[#allocation5 + $0x8] ss:$16 sm:$0x3] }
 0x3f2   : > { %3833 = vmatpush.msrb.mxu2 %v3832_v25  ;;  %3871 = vmatpush.msrb.mxu3 %v5318_v61  ;;  %v5319_v25 = vld [vmem:[%s7446_s30 + $0x380] sm:$0xff] }
 0x3f3   : > { %3911 = vmatpush.msra.mxu0 %v3910_v5  ;;  %3949 = vmatpush.msra.mxu1 %v5334_v56  ;;  %v3815_v61 = vld [vmem:[#allocation5 + $0x7] ss:$16 sm:$0x3]  ;;  %v3989_v5 = vld [vmem:[%s7448_s18 + $0x38] sm:$0xff] }
 0x3f4   : > { %3834 = vmatpush.msrb.mxu2 %v3831_v29  ;;  %3872 = vmatpush.msrb.mxu3 %v5317_v50  ;;  %v3988_v56 = vld [vmem:[%s7449_s27 + $0x30] sm:$0xff]  ;;  %v3987_v29 = vld [vmem:[%s7449_s27 + $0x28] sm:$0xff]  ;;  %v3986_v50 = vld [vmem:[%s7449_s27 + $0x20] sm:$0xff] }
 0x3f5   : > { %3912 = vmatpush.msra.mxu0 %v3909_v55  ;;  %3950 = vmatpush.msra.mxu1 %v5333_v63  ;;  %v3985_v55 = vld [vmem:[%s7449_s27 + $0x18] sm:$0xff]  ;;  %v3984_v63 = vld [vmem:[%s7449_s27 + $0x10] sm:$0xff] }
 0x3f6   : > { %3835 = vmatpush.msrb.mxu2 %v3830_v9  ;;  %3873 = vmatpush.msrb.mxu3 %v5316_v46 }
 0x3f7   : > { %3913 = vmatpush.msra.mxu0 %v3908_v47  ;;  %3951 = vmatpush.msra.mxu1 %v5332_v49  ;;  %v3983_v47 = vld [vmem:[%s7449_s27 + $0x8] sm:$0xff]  ;;  %v3982_v49 = vld [vmem:[%s7449_s27] sm:$0xff] }
 0x3f8   : > { %3836 = vmatpush.msrb.mxu2 %v3829_v57  ;;  %3874 = vmatpush.msrb.mxu3 %v5315_v41 }
 0x3f9   : > { %3914 = vmatpush.msra.mxu0 %v3907_v8  ;;  %3952 = vmatpush.msra.mxu1 %v5331_v6 }
 0x3fa   : > { %3837 = vmatpush.msrb.mxu2 %v3828_v32  ;;  %3875 = vmatpush.msrb.mxu3 %v5314_v40 }
 0x3fb   : > { %3915 = vmatpush.msra.mxu0 %v3906_v18  ;;  %3953 = vmatpush.msra.mxu1 %v5330_v44 }
 0x3fc   : > { %3838 = vmatpush.msrb.mxu2 %v3827_v34  ;;  %3876 = vmatpush.msrb.mxu3 %v5313_v36 }
 0x3fd   : > { %3916 = vmatpush.msra.mxu0 %v3905_v37  ;;  %3954 = vmatpush.msra.mxu1 %v5329_v19 }
 0x3fe   : > { %3839 = vmatpush.msrb.mxu2 %v3826_v16  ;;  %3877 = vmatpush.msrb.mxu3 %v5312_v23 }
 0x3ff   : > { %3917 = vmatpush.msra.mxu0 %v3904_v13  ;;  %3955 = vmatpush.msra.mxu1 %v5328_v15 }
 0x400   : > { %3840 = vmatpush.msrb.mxu2 %v3825_v22  ;;  %3878 = vmatpush.msrb.mxu3 %v5311_v24 }
 0x401   : > { %3918 = vmatpush.msra.mxu0 %v3903_v14  ;;  %3956 = vmatpush.msra.mxu1 %v5327_v51 }
 0x402   : > { %3841 = vmatpush.msrb.mxu2 %v3824_v58  ;;  %3879 = vmatpush.msrb.mxu3 %v5310_v28 }
 0x403   : > { %3919 = vmatpush.msra.mxu0 %v3902_v17  ;;  %3957 = vmatpush.msra.mxu1 %v5326_v11  ;;  %v5678_v11 = vld [vmem:[%s7450_s26] ss:$0 sm:$0xff] }
 0x404   : > { %3842 = vmatpush.msrb.mxu2 %v3823_v3  ;;  %3880 = vmatpush.msrb.mxu3 %v5309_v31  ;;  %v5679_v31 = vld [vmem:[%s7451_s17] ss:$0 sm:$0xff] }
 0x405   : > { %3920 = vmatpush.msra.mxu0 %v3901_v21  ;;  %3958 = vmatpush.msra.mxu1 %v5325_v48 }
 0x406   : > { %3843 = vmatpush.msrb.mxu2 %v3822_v27  ;;  %3881 = vmatpush.msrb.mxu3 %v5308_v54 }
 0x407   : > { %3921 = vmatpush.msra.mxu0 %v3900_v39  ;;  %3959 = vmatpush.msra.mxu1 %v5324_v30 }
 0x408   : > { %3844 = vmatpush.msrb.mxu2 %v3821_v33  ;;  %3882 = vmatpush.msrb.mxu3 %v5307_v1  ;;  %v5680_v1 = vld [vmem:[%s7452_s16] ss:$0 sm:$0xff] }
 0x409   : > { %3922 = vmatpush.msra.mxu0 %v3899_v2  ;;  %3960 = vmatpush.msra.mxu1 %v5323_v0 }
 0x40a   : > { %3845 = vmatpush.msrb.mxu2 %v3820_v26  ;;  %3883 = vmatpush.msrb.mxu3 %v5306_v45 }
 0x40b   : > { %3923 = vmatpush.msra.mxu0 %v3898_v35  ;;  %3961 = vmatpush.msra.mxu1 %v5322_v20 }
 0x40c   : > { %3846 = vmatpush.msrb.mxu2 %v3819_v10  ;;  %3884 = vmatpush.msrb.mxu3 %v5305_v38 }
 0x40d   : > { %3924 = vmatpush.msra.mxu0 %v3897_v52  ;;  %3962 = vmatpush.msra.mxu1 %v5321_v7 }
 0x40e   : > { %3847 = vmatpush.msrb.mxu2 %v3818_v59  ;;  %3885 = vmatpush.msrb.mxu3 %v5304_v60 }
 0x40f   : > { %3925 = vmatpush.msra.mxu0 %v3896_v43  ;;  %3963 = vmatpush.msra.mxu1 %v5320_v42 }
 0x410   : > { %3848 = vmatpush.msrb.mxu2 %v3817_v12  ;;  %3886 = vmatpush.msrb.mxu3 %v5303_v4 }
 0x411   : > { %3926 = vmatpush.msra.mxu0 %v3895_v62  ;;  %3964 = vmatpush.msra.mxu1 %v5319_v25 }
 0x412   : > { %3849 = vmatmul.f32.vlgmr.msrb.gmra.mxu2 %v3815_v61  ;;  %3887 = vmatmul.f32.vlgmr.msrb.gmra.mxu3 %v3815_v61 }
 0x413   : > { %3927 = vmatmul.f32.vlgmr.msra.gmra.mxu0 %v3893_v53  ;;  %3965 = vmatmul.f32.vlgmr.msra.gmra.mxu1 %v3893_v53 }
 0x414   : > { %4006 = vmatpush.msra.mxu2 %v3989_v5 }
 0x416   : > { %4007 = vmatpush.msra.mxu2 %v3988_v56 }
 0x418   : > { %4008 = vmatpush.msra.mxu2 %v3987_v29 }
 0x41a   : > { %4009 = vmatpush.msra.mxu2 %v3986_v50 }
 0x41c   : > { %4010 = vmatpush.msra.mxu2 %v3985_v55 }
 0x41e   : > { %4011 = vmatpush.msra.mxu2 %v3984_v63 }
 0x420   : > { %4012 = vmatpush.msra.mxu2 %v3983_v47 }
 0x422   : > { %4013 = vmatpush.msra.mxu2 %v3982_v49 }
 0x44a   : > { %v3479_v57 = vpop.f32.mrf.mxu0  ;;  %v3499_v41 = vpop.f32.mrf.mxu1 }
 0x44b   : > { %v3500_v18 = vadd.f32 %v3499_v41, %v3479_v57 }
 0x44f   : > { %v3422_v9 = vpop.f32.mrf.mxu2  ;;  %v3442_v46 = vpop.f32.mrf.mxu3 }
 0x450   : > { %v3443_v44 = vadd.f32 %v3442_v46, %v3422_v9 }
 0x454   : > { %v3616_v32 = vpop.f32.mrf.mxu0  ;;  %v3654_v40 = vpop.f32.mrf.mxu1 }
 0x459   : > { %v3538_v8 = vpop.f32.mrf.mxu2  ;;  %v3576_v6 = vpop.f32.mrf.mxu3 }
 0x45a   : > { %v3541_v34 = vadd.f32 %v3538_v8, %v3443_v44  ;;  %v3579_v36 = vadd.f32 %v3576_v6, %v3500_v18 }
 0x45c   : > { %v3619_v16 = vadd.f32 %v3616_v32, %v3541_v34  ;;  %v3657_v23 = vadd.f32 %v3654_v40, %v3579_v36 }
 0x46e   : > { %v3772_v13 = vpop.f32.mrf.mxu0  ;;  %v3810_v15 = vpop.f32.mrf.mxu1 }
 0x473   : > { %v3694_v37 = vpop.f32.mrf.mxu2  ;;  %v3732_v19 = vpop.f32.mrf.mxu3 }
 0x474   : > { %v3697_v22 = vadd.f32 %v3694_v37, %v3619_v16  ;;  %v3735_v24 = vadd.f32 %v3732_v19, %v3657_v23 }
 0x476   : > { %v3775_v14 = vadd.f32 %v3772_v13, %v3697_v22  ;;  %v3813_v51 = vadd.f32 %v3810_v15, %v3735_v24 }
 0x490   : > { %v3928_v21 = vpop.f32.mrf.mxu0  ;;  %v3966_v48 = vpop.f32.mrf.mxu1 }
 0x495   : > { %v3850_v58 = vpop.f32.mrf.mxu2  ;;  %v3888_v28 = vpop.f32.mrf.mxu3 }
 0x496   : > { %v3853_v17 = vadd.f32 %v3850_v58, %v3775_v14  ;;  %v3891_v3 = vadd.f32 %v3888_v28, %v3813_v51 }
 0x498   : > { %v3931_v27 = vadd.f32 %v3928_v21, %v3853_v17  ;;  %v3969_v54 = vadd.f32 %v3966_v48, %v3891_v3 }
 0x49a   : > { %v3974_v39 = vadd.f32 %v5678_v11, %v3931_v27  ;;  %v3980_v30 = vadd.f32 %v5679_v31, %v3969_v54 }
 0x49c   : > { %3975 = vst [vmem:[#allocation12] sm:$0x3] %v3974_v39  ;;  %v3981_v33 = vmax.f32 %v3980_v30, 0.0 }
 0x49e   : > { %5335 = vmatmul.msk.f32.vlgmr.msra.gmra.mxu2 %vm3994_vm10, %v3981_v33 }
 0x521   : > { %v4015_v2 = vpop.f32.mrf.mxu2 }
 0x522   : > { %v4016_v0 = vadd.f32 %v5680_v1, %v4015_v2 }
 0x524   : > { %5681 = vtanh.f32 %v4016_v0 }
 0x52a   : > { %v5682_v26 = vpop.eup %5681 }
 0x52b   : > { %4019 = vst [vmem:[%s7453_s21] sm:$0x3] %v5682_v26 }
 0x52c PF: > { %s7454_s24 = sadd.s32 4294967295, %s5859_s23   ;;  %s7455_s7 = sld [smem:[#allocation26_spill]] }
 0x52d   : > { %p5620_p8 = scmp.eq.s32.totalorder %s7454_s24, 2  ;;  %s5866_s12 = smov [#allocation12]  }
 0x52e   : > { %s4032_s13 = sshll.u32 %s5866_s12, 4  ;;  %s4033_s13 = int_to_ptr.vmem [resolvable:$true] %s4032_s13 }
 0x532   : > { %s4034_s10 = sshll.u32 %s7455_s7, 4  ;;  %s4035_s10 = int_to_ptr.hbm [resolvable:$true] %s4034_s10 }
 0x533   : > { %5601 = dma.vmem_to_hbm [thread:$0]  (%p5620_p8), %s4033_s13, 32, %s4035_s10, [#allocation8]  }
 0x534   : > { %5834 = dma.done.wait (%p5620_p8), [#allocation8], 32  }
 0x535   : > { %5836 = vsyncadd (%p5620_p8), [#allocation8], 4294967264 }
 0x536 PF: > { %s31_s23 = sadd.s32 1, %s5859_s23   ;;  %s7456_s21 = sld [smem:[#allocation16_spill]] }
 0x537   : > { %p28_p9 = scmp.ge.s32.totalorder %s31_s23, 5   ;;  %s7457_s22 = sld [smem:[#allocation17_spill]] }
 0x538   : > { %s7458_s18 = smov %s5843_s19  ;;  %s7459_s19 = smov %s5847_s20 }
 0x539   : > { %s7460_s20 = smov %s6030_s11  ;;  %30 = sbr.rel (!%p28_p9) target bundleno = 17 (0x11), region = 188 }
 0x53e   :  { %4058 = vsyncpa [#allocation7], 1 }
 0x53f   :  { %4060 = vsyncpa [#allocation7 + $0x1], 1 }
 0x540   :  { %4061 = vsyncpa [#allocation10], 1 }
 0x541   :  { %4062 = vsyncpa [#allocation8], 1 }
 0x542   :  { %4064 = vsyncpa [#allocation8 + $0x1], 1 }

</bundles_post_ra>
